<compile_context>
chip_gen: v7x
topology: tpu7x:2x2x1
jax: 0.10.0
libtpu: 0.0.40
codegen_flags: <defaults>
</compile_context>

<pallas_src>
import numpy as np
import jax
import jax.numpy as jnp
from jax.experimental import pallas as pl
from jax.experimental.pallas import tpu as pltpu

# ----------------------------- constants ------------------------------------

FILTER_LENGTH = 1024
HOP_LENGTH = 256
WIN_LENGTH = 1024
N_MEL = 100
MEL_FMIN = 0.0
MEL_FMAX = 12000.0
SAMPLING_RATE = 24000
CUTOFF = FILTER_LENGTH // 2 + 1      # 513
FBINS = 640                          # 513 padded up to 5 * 128 lanes
N_MEL_PAD = 128                      # 100 padded up to the lane width

TACOTRON_MEL_MAX = 2.3143386840820312
TACOTRON_MEL_MIN = -11.512925148010254

UNIV_MEL_MEAN = [-0.362987, -0.275609, -0.214799, -0.176162, -0.176303, -0.195624, -0.188264, -0.217266, -0.206322, -0.236198, -0.230255, -0.242623, -0.248435, -0.250025, -0.271565, -0.26491, -0.300047, -0.295445, -0.324223, -0.32709, -0.338537, -0.347669, -0.342723, -0.363253, -0.345126, -0.369813, -0.355268, -0.369003, -0.365699, -0.368747, -0.369996, -0.378038, -0.367995, -0.379941, -0.379833, -0.381345, -0.38327, -0.384336, -0.384647, -0.384184, -0.385162, -0.388269, -0.384823, -0.39465, -0.39181, -0.397424, -0.396999, -0.400669, -0.406701, -0.411146, -0.41552, -0.415664, -0.417809, -0.416316, -0.415557, -0.414445, -0.416581, -0.419495, -0.425628, -0.434221, -0.445579, -0.454643, -0.46044, -0.463075, -0.465277, -0.466486, -0.467568, -0.471848, -0.478277, -0.488004, -0.499497, -0.512124, -0.523796, -0.534602, -0.545295, -0.555952, -0.564757, -0.571438, -0.574683, -0.576825, -0.578338, -0.582372, -0.587675, -0.591264, -0.5942, -0.597116, -0.601883, -0.608677, -0.614729, -0.622859, -0.636373, -0.62917, -0.639739, -0.66359, -0.689774, -0.711324, -0.729637, -0.75747, -0.792535, -0.827708]

UNIV_MEL_STD = [0.484793, 0.558647, 0.617948, 0.650929, 0.653919, 0.645172, 0.652674, 0.63584, 0.642193, 0.62401, 0.627954, 0.620662, 0.618184, 0.617792, 0.604684, 0.606978, 0.583991, 0.58455, 0.566241, 0.563311, 0.555793, 0.549769, 0.551699, 0.538963, 0.548138, 0.532589, 0.539796, 0.531262, 0.532754, 0.531231, 0.5306, 0.526173, 0.532573, 0.526033, 0.525931, 0.524744, 0.523234, 0.521965, 0.521219, 0.521147, 0.519988, 0.517817, 0.519525, 0.513181, 0.514215, 0.510456, 0.510157, 0.50744, 0.50323, 0.499716, 0.496558, 0.496374, 0.495435, 0.496737, 0.497759, 0.499278, 0.498958, 0.49797, 0.494302, 0.488204, 0.479295, 0.471905, 0.466698, 0.464347, 0.463399, 0.463593, 0.463878, 0.462138, 0.458525, 0.451914, 0.443669, 0.434572, 0.426364, 0.418768, 0.411126, 0.403654, 0.398076, 0.395058, 0.39447, 0.39439, 0.39391, 0.391522, 0.387822, 0.386098, 0.38549, 0.384492, 0.380791, 0.375684, 0.373089, 0.368683, 0.359776, 0.373195, 0.379856, 0.377202, 0.370769, 0.3642, 0.355851, 0.338883, 0.313291, 0.283525]


# --------------------- deterministic parameter construction -----------------

def _stft_bases():
    """Windowed real/imag Fourier bases, shapes (filter_length, cutoff)."""
    fourier = np.fft.fft(np.eye(FILTER_LENGTH))
    real = np.real(fourier[:CUTOFF, :])      # (cutoff, filter_length)
    imag = np.imag(fourier[:CUTOFF, :])
    # periodic Hann window (scipy get_window('hann', N, fftbins=True))
    n = np.arange(WIN_LENGTH)
    win = 0.5 - 0.5 * np.cos(2.0 * np.pi * n / WIN_LENGTH)
    # win_length == filter_length -> pad_center is a no-op
    b_real = (real * win[None, :]).T.astype(np.float32)   # (filter_length, cutoff)
    b_imag = (imag * win[None, :]).T.astype(np.float32)
    return b_real, b_imag


def _mel_filterbank(sr, n_fft, n_mels, fmin, fmax):
    """librosa.filters.mel(..., htk=False, norm='slaney') reimplemented."""
    f_sp = 200.0 / 3
    min_log_hz = 1000.0
    min_log_mel = min_log_hz / f_sp
    logstep = np.log(6.4) / 27.0

    def hz_to_mel(f):
        f = np.asarray(f, dtype=np.float64)
        lin = f / f_sp
        log = min_log_mel + np.log(np.maximum(f, min_log_hz) / min_log_hz) / logstep
        return np.where(f >= min_log_hz, log, lin)

    def mel_to_hz(m):
        m = np.asarray(m, dtype=np.float64)
        lin = f_sp * m
        log = min_log_hz * np.exp(logstep * (m - min_log_mel))
        return np.where(m >= min_log_mel, log, lin)

    fftfreqs = np.linspace(0.0, sr / 2.0, n_fft // 2 + 1)
    mel_pts = np.linspace(hz_to_mel(fmin), hz_to_mel(fmax), n_mels + 2)
    mel_f = mel_to_hz(mel_pts)

    fdiff = np.diff(mel_f)
    ramps = mel_f[:, None] - fftfreqs[None, :]
    lower = -ramps[:-2] / fdiff[:-1, None]
    upper = ramps[2:] / fdiff[1:, None]
    weights = np.maximum(0.0, np.minimum(lower, upper))
    enorm = 2.0 / (mel_f[2:n_mels + 2] - mel_f[:n_mels])   # slaney norm
    weights = weights * enorm[:, None]
    return weights.astype(np.float32)                       # (n_mels, cutoff)


def _build_constants():
    """Fused STFT basis, lane-padded mel basis, and folded affine norm."""
    b_real, b_imag = _stft_bases()                      # (1024, 513) each
    basis = np.zeros((FILTER_LENGTH, 2 * FBINS), np.float32)
    basis[:, :CUTOFF] = b_real                          # real half  -> lanes [0, 640)
    basis[:, FBINS:FBINS + CUTOFF] = b_imag             # imag half  -> lanes [640, 1280)

    mel_w = _mel_filterbank(SAMPLING_RATE, FILTER_LENGTH, N_MEL, MEL_FMIN, MEL_FMAX)
    melT = np.zeros((FBINS, N_MEL_PAD), np.float32)
    melT[:CUTOFF, :N_MEL] = mel_w.T

    mean = np.asarray(UNIV_MEL_MEAN, np.float64)
    std = np.asarray(UNIV_MEL_STD, np.float64)
    scale = 2.0 / (TACOTRON_MEL_MAX - TACOTRON_MEL_MIN)
    # out = (2*(logmel - MIN)/(MAX-MIN) - 1 - mean)/std = a*logmel + b
    a = np.zeros((1, N_MEL_PAD), np.float32)
    b = np.zeros((1, N_MEL_PAD), np.float32)
    a[0, :N_MEL] = (scale / std).astype(np.float32)
    b[0, :N_MEL] = ((-TACOTRON_MEL_MIN * scale - 1.0 - mean) / std).astype(np.float32)
    return basis, melT, a, b


# ------------------------------- Pallas kernel -------------------------------

def _mel_kernel(main_ref, tail_ref, basis_ref, melT_ref, a_ref, b_ref,
                out_ref, chunk_ref):
    tm = out_ref.shape[0]

    # Assemble the (tm + 8, 256) overlapping audio chunk in VMEM:
    # rows 0..tm-1 from the main block, rows tm..tm+7 from the tail block.
    chunk_ref[pl.ds(0, tm), :] = main_ref[0, :, :]
    chunk_ref[pl.ds(tm, 8), :] = tail_ref[0, :, :]

    # STFT as 4 accumulated matmuls: frame k, sub-window c (256 samples) is
    # chunk row k + c, so frames[:, c*256:(c+1)*256] == chunk[c : c + tm].
    stft = jnp.dot(chunk_ref[pl.ds(0, tm), :],
                   basis_ref[pl.ds(0, HOP_LENGTH), :],
                   preferred_element_type=jnp.float32)          # (tm, 1280)
    for c in range(1, 4):
        stft = stft + jnp.dot(chunk_ref[pl.ds(c, tm), :],
                              basis_ref[pl.ds(c * HOP_LENGTH, HOP_LENGTH), :],
                              preferred_element_type=jnp.float32)

    real = stft[:, :FBINS]
    imag = stft[:, FBINS:]
    mag = jnp.sqrt(real * real + imag * imag)                   # (tm, 640)

    mel = jnp.dot(mag, melT_ref[...], preferred_element_type=jnp.float32)  # (tm, 128)
    # log-clamp + folded (tacotron-normalize, mean/std-normalize) affine.
    out_ref[...] = jnp.log(jnp.maximum(mel, 1e-5)) * a_ref[...] + b_ref[...]


def mel_spectrogram(audio, *, tile_frames=256):
    """JAX/Pallas equivalent of MelSpectrogram.forward (tacotron, diff-normalized).

    audio: (1, T) or (B, 1, T) float32 mono audio.
    returns: (B, n_mel_channels, n_frames) float32.
    """
    audio = jnp.asarray(audio, jnp.float32)
    if audio.ndim == 3:
        assert audio.shape[1] == 1, f"expected mono audio, got {audio.shape}"
        audio = audio[:, 0, :]
    else:
        assert audio.ndim == 2 and audio.shape[0] == 1, \
            f"expected mono audio, got {audio.shape}"

    B, T = audio.shape
    pad = FILTER_LENGTH // 2
    padded = jnp.pad(audio, ((0, 0), (pad, pad)), mode="reflect")   # (B, T + 1024)
    n_frames = T // HOP_LENGTH + 1

    # Frame tile: 256 rows (or fewer, rounded to 8, for very short audio).
    TM = int(min(tile_frames, ((n_frames + 7) // 8) * 8))
    tiles = int(pl.cdiv(n_frames, TM))
    rows_pad = tiles * TM
    rows_total = rows_pad + 8                       # extra rows for the window overlap
    total_len = rows_total * HOP_LENGTH
    padded = jnp.pad(padded, ((0, 0), (0, total_len - (T + 2 * pad))))
    rows = padded.reshape(B, rows_total, HOP_LENGTH)   # non-overlapping 256-sample rows

    basis_np, melT_np, a_np, b_np = _build_constants()
    basis = jnp.asarray(basis_np)                   # (1024, 1280)
    melT = jnp.asarray(melT_np)                     # (640, 128)
    a = jnp.asarray(a_np)                           # (1, 128)
    b = jnp.asarray(b_np)                           # (1, 128)

    grid = (B, tiles)
    out = pl.pallas_call(
        _mel_kernel,
        out_shape=jax.ShapeDtypeStruct((B * rows_pad, N_MEL_PAD), jnp.float32),
        grid_spec=pltpu.PrefetchScalarGridSpec(
            num_scalar_prefetch=0,
            grid=grid,
            in_specs=[
                # main TM rows of the chunk
                pl.BlockSpec((1, TM, HOP_LENGTH), lambda bi, ti: (bi, ti, 0)),
                # 8 tail rows (same array, 8-row blocks starting at (ti+1)*TM)
                pl.BlockSpec((1, 8, HOP_LENGTH),
                             lambda bi, ti: (bi, (ti + 1) * (TM // 8), 0)),
                # constant operands (index maps constant -> DMA'd once)
                pl.BlockSpec((FILTER_LENGTH, 2 * FBINS), lambda bi, ti: (0, 0)),
                pl.BlockSpec((FBINS, N_MEL_PAD), lambda bi, ti: (0, 0)),
                pl.BlockSpec((1, N_MEL_PAD), lambda bi, ti: (0, 0)),
                pl.BlockSpec((1, N_MEL_PAD), lambda bi, ti: (0, 0)),
            ],
            out_specs=pl.BlockSpec((TM, N_MEL_PAD),
                                   lambda bi, ti: (bi * tiles + ti, 0)),
            scratch_shapes=[pltpu.VMEM((TM + 8, HOP_LENGTH), jnp.float32)],
        ),
        compiler_params=pltpu.CompilerParams(
            dimension_semantics=("parallel", "parallel"),
            vmem_limit_bytes=48 * 1024 * 1024),
    )(rows, rows, basis, melT, a, b)

    out = out.reshape(B, rows_pad, N_MEL_PAD)[:, :n_frames, :N_MEL]
    # (B, n_mel, n_frames) to match the PyTorch output convention.
    return jnp.transpose(out, (0, 2, 1))


# ------------------------- pure-JAX reference (for test) ---------------------

def _reference(audio):
    audio = jnp.asarray(audio, jnp.float32)
    B, T = audio.shape
    pad = FILTER_LENGTH // 2
    padded = jnp.pad(audio, ((0, 0), (pad, pad)), mode="reflect")
    n_frames = T // HOP_LENGTH + 1
    idx = (np.arange(n_frames)[:, None] * HOP_LENGTH
           + np.arange(FILTER_LENGTH)[None, :])
    frames = padded[:, idx]                                     # (B, F, 1024)
    b_real, b_imag = _stft_bases()
    hi = jax.lax.Precision.HIGHEST
    real = jnp.einsum("bfk,kc->bfc", frames, jnp.asarray(b_real), precision=hi)
    imag = jnp.einsum("bfk,kc->bfc", frames, jnp.asarray(b_imag), precision=hi)
    mag = jnp.sqrt(real * real + imag * imag)
    mel_w = jnp.asarray(_mel_filterbank(SAMPLING_RATE, FILTER_LENGTH, N_MEL,
                                        MEL_FMIN, MEL_FMAX))
    mel = jnp.einsum("bfc,mc->bfm", mag, mel_w, precision=hi)
    logm = jnp.log(jnp.maximum(mel, 1e-5))
    nmel = 2.0 * ((logm - TACOTRON_MEL_MIN)
                  / (TACOTRON_MEL_MAX - TACOTRON_MEL_MIN)) - 1.0
    mean = jnp.asarray(UNIV_MEL_MEAN, jnp.float32)[None, None, :]
    std = jnp.asarray(UNIV_MEL_STD, jnp.float32)[None, None, :]
    out = (nmel - mean) / std
    return jnp.transpose(out, (0, 2, 1))


# ---------------------------------- test -------------------------------------

if __name__ == "__main__":
    key = jax.random.PRNGKey(0)
    T = 4096                                   # small: 17 STFT frames
    audio = 0.1 * jax.random.normal(key, (1, T), dtype=jnp.float32)

    mel = mel_spectrogram(audio)
    jax.block_until_ready(mel)

    assert mel.shape == (1, N_MEL, T // HOP_LENGTH + 1), mel.shape
    assert bool(jnp.all(jnp.isfinite(mel)))

    ref = _reference(audio)
    np.testing.assert_allclose(np.asarray(mel), np.asarray(ref),
                               rtol=0.0, atol=5e-2)
    print("KERNEL_OK")
</pallas_src>

<mosaic_0001>
module attributes {stable_mosaic.version = 11 : i64} {
  func.func @_mel_kernel(%arg0: i32, %arg1: i32, %arg2: memref<1x24x256xf32, #tpu.memory_space<vmem>>, %arg3: memref<1x8x256xf32, #tpu.memory_space<vmem>>, %arg4: memref<1024x1280xf32, #tpu.memory_space<vmem>>, %arg5: memref<640x128xf32, #tpu.memory_space<vmem>>, %arg6: memref<1x128xf32, #tpu.memory_space<vmem>>, %arg7: memref<1x128xf32, #tpu.memory_space<vmem>>, %arg8: memref<24x128xf32, #tpu.memory_space<vmem>>, %arg9: memref<32x256xf32, #tpu.memory_space<vmem>>) attributes {dimension_semantics = [#tpu.dimension_semantics<parallel>, #tpu.dimension_semantics<parallel>], iteration_bounds = array<i64: 1, 1>, scalar_prefetch = 0 : i64, scratch_operands = 1 : i64, tpu.core_type = #tpu.core_type<tc>, window_params = [{transform_indices = @transform_0, window_bounds = array<i64: 1, 24, 256>}, {transform_indices = @transform_1, window_bounds = array<i64: 1, 8, 256>}, {pipeline_mode = #tpu.pipeline_mode<synchronous>, transform_indices = @transform_2, window_bounds = array<i64: 1024, 1280>}, {pipeline_mode = #tpu.pipeline_mode<synchronous>, transform_indices = @transform_3, window_bounds = array<i64: 640, 128>}, {pipeline_mode = #tpu.pipeline_mode<synchronous>, transform_indices = @transform_4, window_bounds = array<i64: 1, 128>}, {pipeline_mode = #tpu.pipeline_mode<synchronous>, transform_indices = @transform_5, window_bounds = array<i64: 1, 128>}, {transform_indices = @transform_6, window_bounds = array<i64: 24, 128>}]} {
    %c0 = arith.constant 0 : index
    %c0_0 = arith.constant 0 : index
    %c0_1 = arith.constant 0 : index
    %0 = vector.load %arg2[%c0, %c0_0, %c0_1] : memref<1x24x256xf32, #tpu.memory_space<vmem>>, vector<1x24x256xf32>
    %1 = vector.shape_cast %0 : vector<1x24x256xf32> to vector<24x256xf32>
    %c0_2 = arith.constant 0 : index
    %c0_3 = arith.constant 0 : index
    %2 = vector.load %arg9[%c0_2, %c0_3] : memref<32x256xf32, #tpu.memory_space<vmem>>, vector<24x256xf32>
    tpu.vector_store %arg9[%c0_2, %c0_3], %1 {strides = array<i32>} : memref<32x256xf32, #tpu.memory_space<vmem>>, vector<24x256xf32>,
    %c0_4 = arith.constant 0 : index
    %c0_5 = arith.constant 0 : index
    %c0_6 = arith.constant 0 : index
    %3 = vector.load %arg3[%c0_4, %c0_5, %c0_6] : memref<1x8x256xf32, #tpu.memory_space<vmem>>, vector<1x8x256xf32>
    %4 = vector.shape_cast %3 : vector<1x8x256xf32> to vector<8x256xf32>
    %c24 = arith.constant 24 : index
    %c0_7 = arith.constant 0 : index
    %5 = vector.load %arg9[%c24, %c0_7] : memref<32x256xf32, #tpu.memory_space<vmem>>, vector<8x256xf32>
    tpu.vector_store %arg9[%c24, %c0_7], %4 {strides = array<i32>} : memref<32x256xf32, #tpu.memory_space<vmem>>, vector<8x256xf32>,
    %c0_8 = arith.constant 0 : index
    %c0_9 = arith.constant 0 : index
    %6 = vector.load %arg9[%c0_8, %c0_9] : memref<32x256xf32, #tpu.memory_space<vmem>>, vector<24x256xf32>
    %c0_10 = arith.constant 0 : index
    %c0_11 = arith.constant 0 : index
    %7 = vector.load %arg4[%c0_10, %c0_11] : memref<1024x1280xf32, #tpu.memory_space<vmem>>, vector<256x1280xf32>
    %cst = arith.constant dense<0.000000e+00> : vector<24x1280xf32>
    %8 = tpu.matmul %6, %7, %cst {dimension_numbers = #tpu.dot_dimension_numbers<[1], [0], [0], [1], [0, 0, 1, 1], [], []>} : vector<24x256xf32>, vector<256x1280xf32>, vector<24x1280xf32> -> vector<24x1280xf32>
    %c1 = arith.constant 1 : index
    %c0_12 = arith.constant 0 : index
    %9 = vector.load %arg9[%c1, %c0_12] : memref<32x256xf32, #tpu.memory_space<vmem>>, vector<24x256xf32>
    %c256 = arith.constant 256 : index
    %c0_13 = arith.constant 0 : index
    %10 = vector.load %arg4[%c256, %c0_13] : memref<1024x1280xf32, #tpu.memory_space<vmem>>, vector<256x1280xf32>
    %cst_14 = arith.constant dense<0.000000e+00> : vector<24x1280xf32>
    %11 = tpu.matmul %9, %10, %cst_14 {dimension_numbers = #tpu.dot_dimension_numbers<[1], [0], [0], [1], [0, 0, 1, 1], [], []>} : vector<24x256xf32>, vector<256x1280xf32>, vector<24x1280xf32> -> vector<24x1280xf32>
    %12 = arith.addf %8, %11 : vector<24x1280xf32>
    %c2 = arith.constant 2 : index
    %c0_15 = arith.constant 0 : index
    %13 = vector.load %arg9[%c2, %c0_15] : memref<32x256xf32, #tpu.memory_space<vmem>>, vector<24x256xf32>
    %c512 = arith.constant 512 : index
    %c0_16 = arith.constant 0 : index
    %14 = vector.load %arg4[%c512, %c0_16] : memref<1024x1280xf32, #tpu.memory_space<vmem>>, vector<256x1280xf32>
    %cst_17 = arith.constant dense<0.000000e+00> : vector<24x1280xf32>
    %15 = tpu.matmul %13, %14, %cst_17 {dimension_numbers = #tpu.dot_dimension_numbers<[1], [0], [0], [1], [0, 0, 1, 1], [], []>} : vector<24x256xf32>, vector<256x1280xf32>, vector<24x1280xf32> -> vector<24x1280xf32>
    %16 = arith.addf %12, %15 : vector<24x1280xf32>
    %c3 = arith.constant 3 : index
    %c0_18 = arith.constant 0 : index
    %17 = vector.load %arg9[%c3, %c0_18] : memref<32x256xf32, #tpu.memory_space<vmem>>, vector<24x256xf32>
    %c768 = arith.constant 768 : index
    %c0_19 = arith.constant 0 : index
    %18 = vector.load %arg4[%c768, %c0_19] : memref<1024x1280xf32, #tpu.memory_space<vmem>>, vector<256x1280xf32>
    %cst_20 = arith.constant dense<0.000000e+00> : vector<24x1280xf32>
    %19 = tpu.matmul %17, %18, %cst_20 {dimension_numbers = #tpu.dot_dimension_numbers<[1], [0], [0], [1], [0, 0, 1, 1], [], []>} : vector<24x256xf32>, vector<256x1280xf32>, vector<24x1280xf32> -> vector<24x1280xf32>
    %20 = arith.addf %16, %19 : vector<24x1280xf32>
    %21 = vector.extract_strided_slice %20 {offsets = [0, 0], sizes = [24, 640], strides = [1, 1]} : vector<24x1280xf32> to vector<24x640xf32>
    %22 = vector.extract_strided_slice %20 {offsets = [0, 640], sizes = [24, 640], strides = [1, 1]} : vector<24x1280xf32> to vector<24x640xf32>
    %23 = arith.mulf %21, %21 : vector<24x640xf32>
    %24 = arith.mulf %22, %22 : vector<24x640xf32>
    %25 = arith.addf %23, %24 : vector<24x640xf32>
    %26 = math.sqrt %25 : vector<24x640xf32>
    %c0_21 = arith.constant 0 : index
    %c0_22 = arith.constant 0 : index
    %27 = vector.load %arg5[%c0_21, %c0_22] : memref<640x128xf32, #tpu.memory_space<vmem>>, vector<640x128xf32>
    %cst_23 = arith.constant dense<0.000000e+00> : vector<24x128xf32>
    %28 = tpu.matmul %26, %27, %cst_23 {dimension_numbers = #tpu.dot_dimension_numbers<[1], [0], [0], [1], [0, 0, 1, 1], [], []>} : vector<24x640xf32>, vector<640x128xf32>, vector<24x128xf32> -> vector<24x128xf32>
    %cst_24 = arith.constant 9.99999974E-6 : f32
    %29 = vector.broadcast %cst_24 : f32 to vector<24x128xf32>
    %30 = arith.maximumf %28, %29 : vector<24x128xf32>
    %31 = math.log %30 : vector<24x128xf32>
    %c0_25 = arith.constant 0 : index
    %c0_26 = arith.constant 0 : index
    %32 = vector.load %arg6[%c0_25, %c0_26] : memref<1x128xf32, #tpu.memory_space<vmem>>, vector<1x128xf32>
    %33 = vector.broadcast %32 : vector<1x128xf32> to vector<24x128xf32>
    %34 = arith.mulf %31, %33 : vector<24x128xf32>
    %c0_27 = arith.constant 0 : index
    %c0_28 = arith.constant 0 : index
    %35 = vector.load %arg7[%c0_27, %c0_28] : memref<1x128xf32, #tpu.memory_space<vmem>>, vector<1x128xf32>
    %36 = vector.broadcast %35 : vector<1x128xf32> to vector<24x128xf32>
    %37 = arith.addf %34, %36 : vector<24x128xf32>
    %c0_29 = arith.constant 0 : index
    %c0_30 = arith.constant 0 : index
    %38 = vector.load %arg8[%c0_29, %c0_30] : memref<24x128xf32, #tpu.memory_space<vmem>>, vector<24x128xf32>
    tpu.vector_store %arg8[%c0_29, %c0_30], %37 {strides = array<i32>} : memref<24x128xf32, #tpu.memory_space<vmem>>, vector<24x128xf32>,
    return
  }
  func.func @transform_0(%arg0: i32, %arg1: i32) -> (i32, i32, i32) {
    %c0_i32 = arith.constant 0 : i32
    %c0_i32_0 = arith.constant 0 : i32
    return %arg0, %arg1, %c0_i32 : i32, i32, i32
  }
  func.func @transform_1(%arg0: i32, %arg1: i32) -> (i32, i32, i32) {
    %c1_i32 = arith.constant 1 : i32
    %0 = arith.addi %arg1, %c1_i32 : i32
    %c3_i32 = arith.constant 3 : i32
    %1 = arith.muli %0, %c3_i32 : i32
    %c0_i32 = arith.constant 0 : i32
    %c0_i32_0 = arith.constant 0 : i32
    return %arg0, %1, %c0_i32 : i32, i32, i32
  }
  func.func @transform_2(%arg0: i32, %arg1: i32) -> (i32, i32) {
    %c0_i32 = arith.constant 0 : i32
    %c0_i32_0 = arith.constant 0 : i32
    %c0_i32_1 = arith.constant 0 : i32
    return %c0_i32, %c0_i32_0 : i32, i32
  }
  func.func @transform_3(%arg0: i32, %arg1: i32) -> (i32, i32) {
    %c0_i32 = arith.constant 0 : i32
    %c0_i32_0 = arith.constant 0 : i32
    %c0_i32_1 = arith.constant 0 : i32
    return %c0_i32, %c0_i32_0 : i32, i32
  }
  func.func @transform_4(%arg0: i32, %arg1: i32) -> (i32, i32) {
    %c0_i32 = arith.constant 0 : i32
    %c0_i32_0 = arith.constant 0 : i32
    %c0_i32_1 = arith.constant 0 : i32
    return %c0_i32, %c0_i32_0 : i32, i32
  }
  func.func @transform_5(%arg0: i32, %arg1: i32) -> (i32, i32) {
    %c0_i32 = arith.constant 0 : i32
    %c0_i32_0 = arith.constant 0 : i32
    %c0_i32_1 = arith.constant 0 : i32
    return %c0_i32, %c0_i32_0 : i32, i32
  }
  func.func @transform_6(%arg0: i32, %arg1: i32) -> (i32, i32) {
    %c1_i32 = arith.constant 1 : i32
    %0 = arith.muli %arg0, %c1_i32 : i32
    %1 = arith.addi %0, %arg1 : i32
    %c0_i32 = arith.constant 0 : i32
    %c0_i32_0 = arith.constant 0 : i32
    return %1, %c0_i32 : i32, i32
  }
}

</mosaic_0001>

<bundles_post_ra>
// kernel: tpu_custom_call.1
= control target key start
LH: loop header
LB: loop body
LE: loop exit
PB: predicated region body
PF: predicated region fallthrough
CT: control target
= control target key end

     0   :  { %11 = vsyncpa [#allocation4], 0  ;;  %s6074_s0 = inlined_call_operand.hbm [shape: f32[1,32,256], index: 0, kind: input, shape index: {}]   ;;  %s6075_s1 = inlined_call_operand.hbm [shape: f32[1,32,256], index: 1, kind: input, shape index: {}]   ;;  %s6076_s2 = inlined_call_operand.hbm [shape: f32[1024,1280], index: 2, kind: input, shape index: {}]   ;;  %s6077_s3 = inlined_call_operand.hbm [shape: f32[640,128], index: 3, kind: input, shape index: {}]   ;;  %s6078_s4 = inlined_call_operand.hbm [shape: f32[1,128], index: 4, kind: input, shape index: {}]   ;;  %s6079_s5 = inlined_call_operand.hbm [shape: f32[1,128], index: 5, kind: input, shape index: {}]   ;;  %s6080_s6 = inlined_call_operand.hbm [shape: f32[24,128], index: 6, kind: output, shape index: {}]  }
   0x1   :  { %12 = vsyncpa [#allocation7], 0 }
   0x2   :  { %13 = vsyncpa [#allocation10], 0 }
   0x3   :  { %14 = vsyncpa [#allocation13], 0  ;;  %s3752_s23 = scalar_lea.hbm %s6075_s1, 768 }
   0x4   :  { %15 = vsyncpa [#allocation5], 0  ;;  %s5588_s24 = smov [#allocation6]   ;;  %s5589_s26 = smov [#allocation9]  }
   0x5   :  { %s39_s25 = sshll.u32 %s5588_s24, 4  ;;  %s60_s27 = sshll.u32 %s5589_s26, 4  ;;  %s40_s25 = int_to_ptr.vmem [resolvable:$true] %s39_s25  ;;  %s61_s27 = int_to_ptr.vmem [resolvable:$true] %s60_s27 }
   0x6   :  { %s5445_s30 = scalar_lea.hbm %s6075_s1, 1024  ;;  %p5424_p1 = scmp.lt.u32.totalorder %s3752_s23, %s6075_s1 }
   0x7   :  { %p5422_p0 = scmp.ne.s32.totalorder %s3752_s23, %s5445_s30  ;;  %p5425_p2 = scmp.lt.u32.totalorder %s5445_s30, %s5445_s30 }
   0x8   :  { %p5427_p4 = scmp.lt.u32.totalorder %s5445_s30, %s3752_s23 }
   0x9   :  { %p5426_p3 = por %p5425_p2, %p5424_p1 }
   0xb   :  { %p5428_p5 = por %p5427_p4, %p5426_p3 }
   0xd   :  { %p5429_p6 = pnand %p5428_p5, %p5422_p0 }
   0xf   :  { %5432 = shalt.err (!%p5429_p6)
}
  0x10   :  { %s5433_s9 = scalar_lea.vmem %s40_s25, 256  ;;  %p5438_p8 = scmp.lt.s32.totalorder %s40_s25, %s40_s25 }
  0x11   :  { %p5434_p7 = scmp.ne.s32.totalorder %s40_s25, %s5433_s9  ;;  %p5439_p9 = scmp.lt.s32.totalorder %s5433_s9, %s5433_s9 }
  0x13   :  { %p5440_p10 = por %p5439_p9, %p5438_p8 }
  0x15   :  { %p5441_p11 = pnand %p5440_p10, %p5434_p7 }
  0x17   :  { %5444 = shalt.err (!%p5441_p11)
}
  0x18   :  { %42 = dma.hbm_to_vmem [thread:$0]  %s3752_s23, 256, %s40_s25, [#allocation7]  }
  0x19   :  { %s5446_s12 = scalar_lea.hbm %s6077_s3, 10240 }
  0x1a   :  { %p5447_p12 = scmp.ne.s32.totalorder %s6077_s3, %s5446_s12  ;;  %p5450_p13 = scmp.lt.u32.totalorder %s5446_s12, %s6077_s3 }
  0x1c   :  { %p5452_p0 = pnand %p5450_p13, %p5447_p12 }
  0x1e   :  { %5455 = shalt.err (!%p5452_p0)
}
  0x1f   :  { %s5456_s16 = scalar_lea.vmem %s61_s27, 10240  ;;  %p5461_p2 = scmp.lt.s32.totalorder %s61_s27, %s61_s27 }
  0x20   :  { %p5457_p1 = scmp.ne.s32.totalorder %s61_s27, %s5456_s16  ;;  %p5462_p3 = scmp.lt.s32.totalorder %s5456_s16, %s5456_s16 }
  0x22   :  { %p5463_p4 = por %p5462_p3, %p5461_p2 }
  0x24   :  { %p5464_p5 = pnand %p5463_p4, %p5457_p1 }
  0x26   :  { %5467 = shalt.err (!%p5464_p5)
}
  0x27   :  { %s5590_s17 = smov 128   ;;  %s5591_s18 = smov 8  }
  0x28   :  { %66 = dma.hbm_to_vmem [thread:$0]  %s6077_s3, 10240, %s61_s27, [#allocation10], %s5590_s17, %s5590_s17, %s5591_s18  }
  0x29   :  { %s5592_s21 = smov [#allocation3]   ;;  %s5468_s25 = scalar_lea.hbm %s6074_s0, 768 }
  0x2a   :  { %s21_s22 = sshll.u32 %s5592_s21, 4  ;;  %p5469_p6 = scmp.ne.s32.totalorder %s6074_s0, %s5468_s25  ;;  %s22_s22 = int_to_ptr.vmem [resolvable:$true] %s21_s22 }
  0x2b   :  { %s5470_s7 = scalar_lea.hbm %s6074_s0, 1024  ;;  %p5472_p8 = scmp.lt.u32.totalorder %s5468_s25, %s6074_s0 }
  0x2c   :  { %p5471_p7 = scmp.lt.u32.totalorder %s5470_s7, %s5468_s25 }
  0x2e   :  { %p5473_p9 = por %p5472_p8, %p5471_p7 }
  0x30   :  { %p5474_p10 = pnand %p5473_p9, %p5469_p6 }
  0x32   :  { %5477 = shalt.err (!%p5474_p10)
}
  0x33   :  { %s5478_s3 = scalar_lea.vmem %s22_s22, 768  ;;  %p5483_p12 = scmp.lt.s32.totalorder %s22_s22, %s22_s22 }
  0x34   :  { %p5479_p11 = scmp.ne.s32.totalorder %s22_s22, %s5478_s3  ;;  %p5484_p13 = scmp.lt.s32.totalorder %s5478_s3, %s5478_s3 }
  0x36   :  { %p5485_p0 = por %p5484_p13, %p5483_p12 }
  0x38   :  { %p5486_p1 = pnand %p5485_p0, %p5479_p11 }
  0x3a   :  { %5489 = shalt.err (!%p5486_p1)
}
  0x3b   :  { %s5593_s27 = smov 256   ;;  %s5594_s10 = smov 16  }
  0x3c   :  { %27 = dma.hbm_to_vmem [thread:$0]  %s6074_s0, 768, %s22_s22, [#allocation4], %s5593_s27, %s5593_s27, %s5594_s10  }
  0x3d   :  { %s5595_s1 = smov [#allocation8]   ;;  %s5490_s16 = scalar_lea.hbm %s6076_s2, 163840 }
  0x3e   :  { %s48_s13 = sshll.u32 %s5595_s1, 4  ;;  %p5491_p2 = scmp.ne.s32.totalorder %s6076_s2, %s5490_s16  ;;  %s49_s13 = int_to_ptr.vmem [resolvable:$true] %s48_s13 }
  0x3f   :  { %p5494_p3 = scmp.lt.u32.totalorder %s5490_s16, %s6076_s2 }
  0x41   :  { %p5496_p4 = pnand %p5494_p3, %p5491_p2 }
  0x43   :  { %5499 = shalt.err (!%p5496_p4)
}
  0x44   :  { %s5500_s24 = scalar_lea.vmem %s49_s13, 163840  ;;  %p5505_p6 = scmp.lt.s32.totalorder %s49_s13, %s49_s13 }
  0x45   :  { %p5501_p5 = scmp.ne.s32.totalorder %s49_s13, %s5500_s24  ;;  %p5506_p7 = scmp.lt.s32.totalorder %s5500_s24, %s5500_s24 }
  0x47   :  { %p5507_p8 = por %p5506_p7, %p5505_p6 }
  0x49   :  { %p5508_p9 = pnand %p5507_p8, %p5501_p5 }
  0x4b   :  { %5511 = shalt.err (!%p5508_p9)
}
  0x4c   :  { %s5596_s0 = smov 1280   ;;  %s5597_s22 = smov 80  }
  0x4d   :  { %54 = dma.hbm_to_vmem [thread:$0]  %s6076_s2, 163840, %s49_s13, [#allocation7], %s5596_s0, %s5596_s0, %s5597_s22  }
  0x4e   :  { %s5598_s28 = smov [#allocation11]   ;;  %s5599_s30 = smov [#allocation12]  }
  0x4f   :  { %s73_s29 = sshll.u32 %s5598_s28, 4  ;;  %s83_s7 = sshll.u32 %s5599_s30, 4  ;;  %s74_s29 = int_to_ptr.vmem [resolvable:$true] %s73_s29  ;;  %s84_s7 = int_to_ptr.vmem [resolvable:$true] %s83_s7 }
  0x50   :  { %s5512_s3 = scalar_lea.hbm %s6078_s4, 16 }
  0x51   :  { %p5513_p10 = scmp.ne.s32.totalorder %s6078_s4, %s5512_s3  ;;  %p5516_p11 = scmp.lt.u32.totalorder %s5512_s3, %s6078_s4 }
  0x53   :  { %p5518_p12 = pnand %p5516_p11, %p5513_p10 }
  0x55   :  { %5521 = shalt.err (!%p5518_p12)
}
  0x56   :  { %s5522_s2 = scalar_lea.vmem %s74_s29, 16  ;;  %s5526_s1 = scalar_lea.vmem %s74_s29, 32 }
  0x57   :  { %p5523_p13 = scmp.ne.s32.totalorder %s74_s29, %s5522_s2  ;;  %p5527_p0 = scmp.lt.s32.totalorder %s74_s29, %s74_s29 }
  0x58   :  { %p5528_p1 = scmp.lt.s32.totalorder %s5526_s1, %s5522_s2 }
  0x5a   :  { %p5529_p2 = por %p5528_p1, %p5527_p0 }
  0x5c   :  { %p5530_p3 = pnand %p5529_p2, %p5523_p13 }
  0x5e   :  { %5533 = shalt.err (!%p5530_p3)
}
  0x5f   :  { %76 = dma.hbm_to_vmem [thread:$0]  %s6078_s4, 16, %s74_s29, [#allocation10]  }
  0x60   :  { %s5534_s19 = scalar_lea.hbm %s6079_s5, 16 }
  0x61   :  { %p5535_p4 = scmp.ne.s32.totalorder %s6079_s5, %s5534_s19  ;;  %p5538_p5 = scmp.lt.u32.totalorder %s5534_s19, %s6079_s5 }
  0x63   :  { %p5540_p6 = pnand %p5538_p5, %p5535_p4 }
  0x65   :  { %5543 = shalt.err (!%p5540_p6)
}
  0x66   :  { %s5544_s0 = scalar_lea.vmem %s84_s7, 16  ;;  %s5548_s22 = scalar_lea.vmem %s84_s7, 32 }
  0x67   :  { %p5545_p7 = scmp.ne.s32.totalorder %s84_s7, %s5544_s0  ;;  %p5549_p8 = scmp.lt.s32.totalorder %s84_s7, %s84_s7 }
  0x68   :  { %p5550_p9 = scmp.lt.s32.totalorder %s5548_s22, %s5544_s0 }
  0x6a   :  { %p5551_p10 = por %p5550_p9, %p5549_p8 }
  0x6c   :  { %p5552_p11 = pnand %p5551_p10, %p5545_p7 }
  0x6e   :  { %5555 = shalt.err (!%p5552_p11)
}
  0x6f   :  { %86 = dma.hbm_to_vmem [thread:$0]  %s6079_s5, 16, %s84_s7, [#allocation13]  }
  0x70   :  { %5578 = dma.done.wait [#allocation4], 768  }
  0x71   :  { %5579 = vsyncadd [#allocation4], 4294966528 }
  0x72   :  { %5580 = dma.done.wait [#allocation7], 164096  }
  0x73   :  { %5581 = vsyncadd [#allocation7], 4294803200 }
  0x74   :  { %5582 = dma.done.wait [#allocation10], 10256  }
  0x75   :  { %5583 = vsyncadd [#allocation10], 4294957040 }
  0x76   :  { %5584 = dma.done.wait [#allocation13], 16  }
  0x77   :  { %5585 = vsyncadd [#allocation13], 4294967280  ;;  %v460_v0 = vld [vmem:[#allocation8 + $0xa08] sm:$0xff]  ;;  %v470_v1 = vld [vmem:[#allocation8 + $0xa58] sm:$0xff]  ;;  %vm787_vm0 = vcmask 1046528   ;;  %vm1966_vm1 = vcmask 1045504  }
  0x78   :  { %v464_v2 = vld [vmem:[#allocation8 + $0xa28] sm:$0xff]  ;;  %v3897_v3 = vpack.c.bf16 %v470_v1, %v460_v0  ;;  %v474_v4 = vld [vmem:[#allocation8 + $0xa78] sm:$0xff]  ;;  %v459_v5 = vld [vmem:[#allocation8 + $0xa00] sm:$0xff]  ;;  %vm2760_vm2 = vcmask 1044480   ;;  %s5603_s5 = smov [#allocation14]  }
  0x79   :  { %v469_v6 = vld [vmem:[#allocation8 + $0xa50] sm:$0xff]  ;;  %v4025_v7 = vpack.c.bf16 %v474_v4, %v464_v2  ;;  %v463_v9 = vld [vmem:[#allocation8 + $0xa20] sm:$0xff]  ;;  %v480_v11 = vld [vmem:[#allocation8 + $0xaa8] sm:$0xff]  ;;  %s3737_s26 = sshll.u32 %s5603_s5, 4  ;;  %s3738_s26 = int_to_ptr.vmem [resolvable:$true] %s3737_s26 }
  0x7a   :  { %v3899_v8 = vpack.c.bf16 %v469_v6, %v459_v5  ;;  %v473_v10 = vld [vmem:[#allocation8 + $0xa70] sm:$0xff]  ;;  %3898 = vmatprep.subr.bf16.mxu1 %v3897_v3  ;;  %v490_v13 = vld [vmem:[#allocation8 + $0xaf8] sm:$0xff]  ;;  %v484_v14 = vld [vmem:[#allocation8 + $0xac8] sm:$0xff]  ;;  %s5556_s28 = scalar_lea.vmem %s3738_s26, 384  ;;  %p5561_p13 = scmp.lt.s32.totalorder %s3738_s26, %s3738_s26 }
  0x7b   :  { %v4027_v12 = vpack.c.bf16 %v473_v10, %v463_v9  ;;  %v494_v15 = vld [vmem:[#allocation8 + $0xb18] sm:$0xff]  ;;  %4026 = vmatprep.subr.bf16.mxu0 %v4025_v7  ;;  %v3901_v16 = vpack.c.bf16 %v490_v13, %v480_v11  ;;  %v479_v18 = vld [vmem:[#allocation8 + $0xaa0] sm:$0xff]  ;;  %v489_v19 = vld [vmem:[#allocation8 + $0xaf0] sm:$0xff]  ;;  %p5557_p12 = scmp.ne.s32.totalorder %s3738_s26, %s5556_s28  ;;  %p5562_p0 = scmp.lt.s32.totalorder %s5556_s28, %s5556_s28 }
  0x7c   :  { %3900 = vmatpush1.bf16.msra.mxu1 %v3899_v8  ;;  %v4029_v17 = vpack.c.bf16 %v494_v15, %v484_v14  ;;  %v483_v20 = vld [vmem:[#allocation8 + $0xac0] sm:$0xff]  ;;  %v3903_v21 = vpack.c.bf16 %v489_v19, %v479_v18  ;;  %v493_v22 = vld [vmem:[#allocation8 + $0xb10] sm:$0xff]  ;;  %v500_v23 = vld [vmem:[#allocation8 + $0xb48] sm:$0xff] }
  0x7d   :  { %4028 = vmatpush1.bf16.msra.mxu0 %v4027_v12  ;;  %v510_v24 = vld [vmem:[#allocation8 + $0xb98] sm:$0xff]  ;;  %3902 = vmatprep.subr.bf16.mxu1 %v3901_v16  ;;  %v4031_v25 = vpack.c.bf16 %v493_v22, %v483_v20  ;;  %v504_v27 = vld [vmem:[#allocation8 + $0xb68] sm:$0xff]  ;;  %v499_v29 = vld [vmem:[#allocation8 + $0xb40] sm:$0xff]  ;;  %p5563_p1 = por %p5562_p0, %p5561_p13 }
  0x7e   :  { %4030 = vmatprep.subr.bf16.mxu0 %v4029_v17  ;;  %v3905_v26 = vpack.c.bf16 %v510_v24, %v500_v23  ;;  %v514_v28 = vld [vmem:[#allocation8 + $0xbb8] sm:$0xff]  ;;  %v509_v31 = vld [vmem:[#allocation8 + $0xb90] sm:$0xff]  ;;  %v503_v32 = vld [vmem:[#allocation8 + $0xb60] sm:$0xff] }
  0x7f   :  { %v4033_v30 = vpack.c.bf16 %v514_v28, %v504_v27  ;;  %v513_v33 = vld [vmem:[#allocation8 + $0xbb0] sm:$0xff]  ;;  %v3907_v34 = vpack.c.bf16 %v509_v31, %v499_v29  ;;  %v520_v35 = vld [vmem:[#allocation8 + $0xbe8] sm:$0xff]  ;;  %v530_v36 = vld [vmem:[#allocation8 + $0xc38] sm:$0xff]  ;;  %p5564_p2 = pnand %p5563_p1, %p5557_p12 }
  0x80   :  { %3904 = vmatpush1.bf16.msra.mxu1 %v3903_v21  ;;  %v524_v37 = vld [vmem:[#allocation8 + $0xc08] sm:$0xff]  ;;  %v4035_v38 = vpack.c.bf16 %v513_v33, %v503_v32  ;;  %v3909_v39 = vpack.c.bf16 %v530_v36, %v520_v35  ;;  %v534_v40 = vld [vmem:[#allocation8 + $0xc58] sm:$0xff]  ;;  %v519_v41 = vld [vmem:[#allocation8 + $0xbe0] sm:$0xff] }
  0x81   :  { %4032 = vmatpush1.bf16.msra.mxu0 %v4031_v25  ;;  %3906 = vmatprep.subr.bf16.mxu1 %v3905_v26  ;;  %v529_v42 = vld [vmem:[#allocation8 + $0xc30] sm:$0xff]  ;;  %v4037_v43 = vpack.c.bf16 %v534_v40, %v524_v37  ;;  %v523_v44 = vld [vmem:[#allocation8 + $0xc00] sm:$0xff]  ;;  %v540_v46 = vld [vmem:[#allocation8 + $0xc88] sm:$0xff] }
  0x82   :  { %4034 = vmatprep.subr.bf16.mxu0 %v4033_v30  ;;  %v533_v45 = vld [vmem:[#allocation8 + $0xc50] sm:$0xff]  ;;  %v550_v47 = vld [vmem:[#allocation8 + $0xcd8] sm:$0xff]  ;;  %v544_v48 = vld [vmem:[#allocation8 + $0xca8] sm:$0xff]  ;;  %v3911_v50 = vpack.c.bf16 %v529_v42, %v519_v41 }
  0x83   :  { %v554_v49 = vld [vmem:[#allocation8 + $0xcf8] sm:$0xff]  ;;  %v4039_v51 = vpack.c.bf16 %v533_v45, %v523_v44  ;;  %v3913_v52 = vpack.c.bf16 %v550_v47, %v540_v46  ;;  %v539_v53 = vld [vmem:[#allocation8 + $0xc80] sm:$0xff]  ;;  %v549_v54 = vld [vmem:[#allocation8 + $0xcd0] sm:$0xff] }
  0x84   :  { %3908 = vmatpush1.bf16.msra.mxu1 %v3907_v34  ;;  %v543_v55 = vld [vmem:[#allocation8 + $0xca0] sm:$0xff]  ;;  %v4041_v56 = vpack.c.bf16 %v554_v49, %v544_v48  ;;  %v553_v57 = vld [vmem:[#allocation8 + $0xcf0] sm:$0xff]  ;;  %v560_v58 = vld [vmem:[#allocation8 + $0xd28] sm:$0xff]  ;;  %v3915_v62 = vpack.c.bf16 %v549_v54, %v539_v53 }
  0x85   :  { %4036 = vmatpush1.bf16.msra.mxu0 %v4035_v38  ;;  %3910 = vmatprep.subr.bf16.mxu1 %v3909_v39  ;;  %v570_v59 = vld [vmem:[#allocation8 + $0xd78] sm:$0xff]  ;;  %v564_v60 = vld [vmem:[#allocation8 + $0xd48] sm:$0xff]  ;;  %v4043_v63 = vpack.c.bf16 %v553_v57, %v543_v55  ;;  %v559_v1 = vld [vmem:[#allocation8 + $0xd20] sm:$0xff] }
  0x86   :  { %4038 = vmatprep.subr.bf16.mxu0 %v4037_v43  ;;  %v574_v61 = vld [vmem:[#allocation8 + $0xd98] sm:$0xff]  ;;  %v3917_v0 = vpack.c.bf16 %v570_v59, %v560_v58  ;;  %v569_v2 = vld [vmem:[#allocation8 + $0xd70] sm:$0xff]  ;;  %v563_v3 = vld [vmem:[#allocation8 + $0xd40] sm:$0xff] }
  0x87   :  { %v4045_v4 = vpack.c.bf16 %v574_v61, %v564_v60  ;;  %v573_v5 = vld [vmem:[#allocation8 + $0xd90] sm:$0xff]  ;;  %v580_v6 = vld [vmem:[#allocation8 + $0xdc8] sm:$0xff]  ;;  %v590_v7 = vld [vmem:[#allocation8 + $0xe18] sm:$0xff]  ;;  %v3919_v10 = vpack.c.bf16 %v569_v2, %v559_v1 }
  0x88   :  { %3912 = vmatpush1.bf16.msra.mxu1 %v3911_v50  ;;  %v584_v8 = vld [vmem:[#allocation8 + $0xde8] sm:$0xff]  ;;  %v594_v9 = vld [vmem:[#allocation8 + $0xe38] sm:$0xff]  ;;  %v4047_v11 = vpack.c.bf16 %v573_v5, %v563_v3  ;;  %v3921_v12 = vpack.c.bf16 %v590_v7, %v580_v6  ;;  %v579_v13 = vld [vmem:[#allocation8 + $0xdc0] sm:$0xff] }
  0x89   :  { %4040 = vmatpush1.bf16.msra.mxu0 %v4039_v51  ;;  %3914 = vmatprep.subr.bf16.mxu1 %v3913_v52  ;;  %v589_v14 = vld [vmem:[#allocation8 + $0xe10] sm:$0xff]  ;;  %v583_v15 = vld [vmem:[#allocation8 + $0xde0] sm:$0xff]  ;;  %v4049_v16 = vpack.c.bf16 %v594_v9, %v584_v8  ;;  %v600_v18 = vld [vmem:[#allocation8 + $0xe68] sm:$0xff] }
  0x8a   :  { %4042 = vmatprep.subr.bf16.mxu0 %v4041_v56  ;;  %v593_v17 = vld [vmem:[#allocation8 + $0xe30] sm:$0xff]  ;;  %v610_v19 = vld [vmem:[#allocation8 + $0xeb8] sm:$0xff]  ;;  %v604_v20 = vld [vmem:[#allocation8 + $0xe88] sm:$0xff]  ;;  %v3923_v22 = vpack.c.bf16 %v589_v14, %v579_v13 }
  0x8b   :  { %v614_v21 = vld [vmem:[#allocation8 + $0xed8] sm:$0xff]  ;;  %v4051_v23 = vpack.c.bf16 %v593_v17, %v583_v15  ;;  %v3925_v24 = vpack.c.bf16 %v610_v19, %v600_v18  ;;  %v599_v25 = vld [vmem:[#allocation8 + $0xe60] sm:$0xff]  ;;  %v609_v26 = vld [vmem:[#allocation8 + $0xeb0] sm:$0xff] }
  0x8c   :  { %3916 = vmatpush1.bf16.msra.mxu1 %v3915_v62  ;;  %v603_v27 = vld [vmem:[#allocation8 + $0xe80] sm:$0xff]  ;;  %v4053_v28 = vpack.c.bf16 %v614_v21, %v604_v20  ;;  %v613_v29 = vld [vmem:[#allocation8 + $0xed0] sm:$0xff]  ;;  %v620_v30 = vld [vmem:[#allocation8 + $0xf08] sm:$0xff]  ;;  %v3927_v34 = vpack.c.bf16 %v609_v26, %v599_v25 }
  0x8d   :  { %4044 = vmatpush1.bf16.msra.mxu0 %v4043_v63  ;;  %3918 = vmatprep.subr.bf16.mxu1 %v3917_v0  ;;  %v630_v31 = vld [vmem:[#allocation8 + $0xf58] sm:$0xff]  ;;  %v624_v32 = vld [vmem:[#allocation8 + $0xf28] sm:$0xff]  ;;  %v4055_v35 = vpack.c.bf16 %v613_v29, %v603_v27  ;;  %v619_v37 = vld [vmem:[#allocation8 + $0xf00] sm:$0xff] }
  0x8e   :  { %4046 = vmatprep.subr.bf16.mxu0 %v4045_v4  ;;  %v634_v33 = vld [vmem:[#allocation8 + $0xf78] sm:$0xff]  ;;  %v3929_v36 = vpack.c.bf16 %v630_v31, %v620_v30  ;;  %v629_v38 = vld [vmem:[#allocation8 + $0xf50] sm:$0xff]  ;;  %v623_v39 = vld [vmem:[#allocation8 + $0xf20] sm:$0xff] }
  0x8f   :  { %v4057_v40 = vpack.c.bf16 %v634_v33, %v624_v32  ;;  %v633_v41 = vld [vmem:[#allocation8 + $0xf70] sm:$0xff]  ;;  %v640_v42 = vld [vmem:[#allocation8 + $0xfa8] sm:$0xff]  ;;  %v650_v43 = vld [vmem:[#allocation8 + $0xff8] sm:$0xff]  ;;  %v3931_v46 = vpack.c.bf16 %v629_v38, %v619_v37 }
  0x90   :  { %3920 = vmatpush1.bf16.msra.mxu1 %v3919_v10  ;;  %v644_v44 = vld [vmem:[#allocation8 + $0xfc8] sm:$0xff]  ;;  %v654_v45 = vld [vmem:[#allocation8 + $0x1018] sm:$0xff]  ;;  %v4059_v47 = vpack.c.bf16 %v633_v41, %v623_v39  ;;  %v3933_v48 = vpack.c.bf16 %v650_v43, %v640_v42  ;;  %v639_v49 = vld [vmem:[#allocation8 + $0xfa0] sm:$0xff] }
  0x91   :  { %4048 = vmatpush1.bf16.msra.mxu0 %v4047_v11  ;;  %3922 = vmatprep.subr.bf16.mxu1 %v3921_v12  ;;  %v649_v50 = vld [vmem:[#allocation8 + $0xff0] sm:$0xff]  ;;  %v643_v51 = vld [vmem:[#allocation8 + $0xfc0] sm:$0xff]  ;;  %v4061_v52 = vpack.c.bf16 %v654_v45, %v644_v44  ;;  %v660_v54 = vld [vmem:[#allocation8 + $0x1048] sm:$0xff] }
  0x92   :  { %4050 = vmatprep.subr.bf16.mxu0 %v4049_v16  ;;  %v653_v53 = vld [vmem:[#allocation8 + $0x1010] sm:$0xff]  ;;  %v670_v55 = vld [vmem:[#allocation8 + $0x1098] sm:$0xff]  ;;  %v664_v56 = vld [vmem:[#allocation8 + $0x1068] sm:$0xff]  ;;  %v3935_v58 = vpack.c.bf16 %v649_v50, %v639_v49 }
  0x93   :  { %v674_v57 = vld [vmem:[#allocation8 + $0x10b8] sm:$0xff]  ;;  %v4063_v59 = vpack.c.bf16 %v653_v53, %v643_v51  ;;  %v3937_v60 = vpack.c.bf16 %v670_v55, %v660_v54  ;;  %v659_v61 = vld [vmem:[#allocation8 + $0x1040] sm:$0xff]  ;;  %v669_v62 = vld [vmem:[#allocation8 + $0x1090] sm:$0xff] }
  0x94   :  { %3924 = vmatpush1.bf16.msra.mxu1 %v3923_v22  ;;  %v663_v63 = vld [vmem:[#allocation8 + $0x1060] sm:$0xff]  ;;  %v4065_v0 = vpack.c.bf16 %v674_v57, %v664_v56  ;;  %v673_v1 = vld [vmem:[#allocation8 + $0x10b0] sm:$0xff]  ;;  %v680_v2 = vld [vmem:[#allocation8 + $0x10e8] sm:$0xff]  ;;  %v3939_v6 = vpack.c.bf16 %v669_v62, %v659_v61 }
  0x95   :  { %4052 = vmatpush1.bf16.msra.mxu0 %v4051_v23  ;;  %3926 = vmatprep.subr.bf16.mxu1 %v3925_v24  ;;  %v690_v3 = vld [vmem:[#allocation8 + $0x1138] sm:$0xff]  ;;  %v684_v4 = vld [vmem:[#allocation8 + $0x1108] sm:$0xff]  ;;  %v679_v7 = vld [vmem:[#allocation8 + $0x10e0] sm:$0xff]  ;;  %v4067_v8 = vpack.c.bf16 %v673_v1, %v663_v63 }
  0x96   :  { %4054 = vmatprep.subr.bf16.mxu0 %v4053_v28  ;;  %v694_v5 = vld [vmem:[#allocation8 + $0x1158] sm:$0xff]  ;;  %v3941_v9 = vpack.c.bf16 %v690_v3, %v680_v2  ;;  %v689_v10 = vld [vmem:[#allocation8 + $0x1130] sm:$0xff]  ;;  %v683_v11 = vld [vmem:[#allocation8 + $0x1100] sm:$0xff] }
  0x97   :  { %v693_v12 = vld [vmem:[#allocation8 + $0x1150] sm:$0xff]  ;;  %v4069_v13 = vpack.c.bf16 %v694_v5, %v684_v4  ;;  %v700_v14 = vld [vmem:[#allocation8 + $0x1188] sm:$0xff]  ;;  %v710_v15 = vld [vmem:[#allocation8 + $0x11d8] sm:$0xff]  ;;  %v3943_v20 = vpack.c.bf16 %v689_v10, %v679_v7 }
  0x98   :  { %3928 = vmatpush1.bf16.msra.mxu1 %v3927_v34  ;;  %v110_v16 = vld [vmem:[#allocation3 + $0x8] sm:$0xff]  ;;  %v714_v18 = vld [vmem:[#allocation8 + $0x11f8] sm:$0xff]  ;;  %v699_v21 = vld [vmem:[#allocation8 + $0x1180] sm:$0xff]  ;;  %v4071_v23 = vpack.c.bf16 %v693_v12, %v683_v11  ;;  %v3945_v24 = vpack.c.bf16 %v710_v15, %v700_v14 }
  0x99   :  { %4056 = vmatpush1.bf16.msra.mxu0 %v4055_v35  ;;  %3930 = vmatprep.subr.bf16.mxu1 %v3929_v36  ;;  %v704_v17 = vld [vmem:[#allocation8 + $0x11a8] sm:$0xff]  ;;  %v5714_v19 = vld [vmem:[#allocation3 + $0x18] sm:$0xff]  ;;  %116 = vst [vmem:[#allocation2 + $0x8] sm:$0xff] %v110_v16  ;;  %v109_v22 = vld [vmem:[#allocation3] sm:$0xff] }
  0x9a   :  { %4058 = vmatprep.subr.bf16.mxu0 %v4057_v40  ;;  %118 = vst [vmem:[#allocation2 + $0x18] sm:$0xff] %v5714_v19  ;;  %v709_v25 = vld [vmem:[#allocation8 + $0x11d0] sm:$0xff]  ;;  %v703_v26 = vld [vmem:[#allocation8 + $0x11a0] sm:$0xff]  ;;  %115 = vst [vmem:[#allocation2] sm:$0xff] %v109_v22  ;;  %v4073_v28 = vpack.c.bf16 %v714_v18, %v704_v17  ;;  %v792_v41 = vrot.slane %v5714_v19, 1 }
  0x9b   :  { %v5717_v27 = vld [vmem:[#allocation3 + $0x10] sm:$0xff]  ;;  %v720_v30 = vld [vmem:[#allocation8 + $0x1228] sm:$0xff]  ;;  %v730_v31 = vld [vmem:[#allocation8 + $0x1278] sm:$0xff]  ;;  %v3947_v34 = vpack.c.bf16 %v709_v25, %v699_v21 }
  0x9c   :  { %3932 = vmatpush1.bf16.msra.mxu1 %v3931_v46  ;;  %v713_v29 = vld [vmem:[#allocation8 + $0x11f0] sm:$0xff]  ;;  %117 = vst [vmem:[#allocation2 + $0x10] sm:$0xff] %v5717_v27  ;;  %v724_v32 = vld [vmem:[#allocation8 + $0x1248] sm:$0xff]  ;;  %v734_v33 = vld [vmem:[#allocation8 + $0x1298] sm:$0xff]  ;;  %v3949_v37 = vpack.c.bf16 %v730_v31, %v720_v30 }
  0x9d   :  { %4060 = vmatpush1.bf16.msra.mxu0 %v4059_v47  ;;  %3934 = vmatprep.subr.bf16.mxu1 %v3933_v48  ;;  %v719_v35 = vld [vmem:[#allocation8 + $0x1220] sm:$0xff]  ;;  %v4075_v36 = vpack.c.bf16 %v713_v29, %v703_v26  ;;  %v729_v38 = vld [vmem:[#allocation8 + $0x1270] sm:$0xff]  ;;  %v4077_v42 = vpack.c.bf16 %v734_v33, %v724_v32  ;;  %v740_v43 = vld [vmem:[#allocation8 + $0x12c8] sm:$0xff] }
  0x9e   :  { %4062 = vmatprep.subr.bf16.mxu0 %v4061_v52  ;;  %v723_v39 = vld [vmem:[#allocation8 + $0x1240] sm:$0xff]  ;;  %v733_v40 = vld [vmem:[#allocation8 + $0x1290] sm:$0xff]  ;;  %v750_v44 = vld [vmem:[#allocation8 + $0x1318] sm:$0xff]  ;;  %v3951_v49 = vpack.c.bf16 %v729_v38, %v719_v35 }
  0x9f   :  { %v744_v46 = vld [vmem:[#allocation8 + $0x12e8] sm:$0xff]  ;;  %v754_v47 = vld [vmem:[#allocation8 + $0x1338] sm:$0xff]  ;;  %v4079_v50 = vpack.c.bf16 %v733_v40, %v723_v39  ;;  %v3953_v51 = vpack.c.bf16 %v750_v44, %v740_v43  ;;  %v739_v52 = vld [vmem:[#allocation8 + $0x12c0] sm:$0xff] }
  0xa0   :  { %3936 = vmatpush1.bf16.msra.mxu1 %v3935_v58  ;;  %v452_v45 = vld [vmem:[#allocation2 + $0x8] sm:$0xfe]  ;;  %v749_v53 = vld [vmem:[#allocation8 + $0x1310] sm:$0xff]  ;;  %v743_v54 = vld [vmem:[#allocation8 + $0x12e0] sm:$0xff]  ;;  %v4081_v56 = vpack.c.bf16 %v754_v47, %v744_v46 }
  0xa1   :  { %4064 = vmatpush1.bf16.msra.mxu0 %v4063_v59  ;;  %3938 = vmatprep.subr.bf16.mxu1 %v3937_v60  ;;  %v791_v48 = vrot.slane %v452_v45, 1  ;;  %v753_v57 = vld [vmem:[#allocation8 + $0x1330] sm:$0xff]  ;;  %v760_v58 = vld [vmem:[#allocation8 + $0x1368] sm:$0xff]  ;;  %v770_v59 = vld [vmem:[#allocation8 + $0x13b8] sm:$0xff]  ;;  %v3955_v62 = vpack.c.bf16 %v749_v53, %v739_v52 }
  0xa2   :  { %4066 = vmatprep.subr.bf16.mxu0 %v4065_v0  ;;  %v764_v60 = vld [vmem:[#allocation8 + $0x1388] sm:$0xff]  ;;  %v774_v61 = vld [vmem:[#allocation8 + $0x13d8] sm:$0xff]  ;;  %v759_v63 = vld [vmem:[#allocation8 + $0x1360] sm:$0xff]  ;;  %v4083_v0 = vpack.c.bf16 %v753_v57, %v743_v54  ;;  %v3957_v1 = vpack.c.bf16 %v770_v59, %v760_v58 }
  0xa3   :  { %v5724_v55 = vsel %vm787_vm0, %v791_v48, %v792_v41  ;;  %v769_v2 = vld [vmem:[#allocation8 + $0x13b0] sm:$0xff]  ;;  %v763_v3 = vld [vmem:[#allocation8 + $0x1380] sm:$0xff]  ;;  %v4085_v5 = vpack.c.bf16 %v774_v61, %v764_v60  ;;  %v462_v7 = vld [vmem:[#allocation8 + $0xa18] sm:$0xff] }
  0xa4   :  { %3940 = vmatpush1.bf16.msra.mxu1 %v3939_v6  ;;  %872 = vmatprep.mubr.f32.mxu1 %v5724_v55  ;;  %v451_v4 = vld [vmem:[#allocation2] sm:$0xfe]  ;;  %v773_v6 = vld [vmem:[#allocation8 + $0x13d0] sm:$0xff]  ;;  %v478_v10 = vld [vmem:[#allocation8 + $0xa98] sm:$0xff]  ;;  %v3959_v11 = vpack.c.bf16 %v769_v2, %v759_v63 }
  0xa5   :  { %4068 = vmatpush1.bf16.msra.mxu0 %v4067_v8  ;;  %3942 = vmatprep.subr.bf16.mxu1 %v3941_v9  ;;  %v472_v8 = vld [vmem:[#allocation8 + $0xa68] sm:$0xff]  ;;  %v788_v12 = vrot.slane %v451_v4, 1  ;;  %v4087_v14 = vpack.c.bf16 %v773_v6, %v763_v3  ;;  %v461_v16 = vld [vmem:[#allocation8 + $0xa10] sm:$0xff]  ;;  %v471_v17 = vld [vmem:[#allocation8 + $0xa60] sm:$0xff] }
  0xa6   :  { %4070 = vmatprep.subr.bf16.mxu0 %v4069_v13  ;;  %1038 = vmatprep.mubr.f32.mxu0 %v5724_v55  ;;  %v468_v9 = vld [vmem:[#allocation8 + $0xa48] sm:$0xff]  ;;  %v789_v13 = vrot.slane %v5717_v27, 1  ;;  %v3961_v15 = vpack.c.bf16 %v472_v8, %v462_v7  ;;  %v467_v18 = vld [vmem:[#allocation8 + $0xa40] sm:$0xff]  ;;  %v477_v21 = vld [vmem:[#allocation8 + $0xa90] sm:$0xff] }
  0xa7   :  { %v482_v22 = vld [vmem:[#allocation8 + $0xab8] sm:$0xff]  ;;  %v4155_v29 = vpack.c.bf16 %v477_v21, %v467_v18  ;;  %v481_v31 = vld [vmem:[#allocation8 + $0xab0] sm:$0xff]  ;;  %v491_v32 = vld [vmem:[#allocation8 + $0xb00] sm:$0xff] }
  0xa8   :  { %3944 = vmatpush1.bf16.msra.mxu1 %v3943_v20  ;;  %v4153_v20 = vpack.c.bf16 %v478_v10, %v468_v9  ;;  %v498_v25 = vld [vmem:[#allocation8 + $0xb38] sm:$0xff]  ;;  %v5732_v26 = vsel %vm787_vm0, %v788_v12, %v789_v13  ;;  %v487_v33 = vld [vmem:[#allocation8 + $0xae0] sm:$0xff]  ;;  %v497_v35 = vld [vmem:[#allocation8 + $0xb30] sm:$0xff]  ;;  %v3967_v40 = vpack.c.bf16 %v491_v32, %v481_v31 }
  0xa9   :  { %4072 = vmatpush1.bf16.msra.mxu0 %v4071_v23  ;;  %3946 = vmatprep.subr.bf16.mxu1 %v3945_v24  ;;  %v492_v23 = vld [vmem:[#allocation8 + $0xb08] sm:$0xff]  ;;  %v518_v39 = vld [vmem:[#allocation8 + $0xbd8] sm:$0xff]  ;;  %v501_v44 = vld [vmem:[#allocation8 + $0xb50] sm:$0xff] }
  0xaa   :  { %4074 = vmatprep.subr.bf16.mxu0 %v4073_v28  ;;  %v488_v24 = vld [vmem:[#allocation8 + $0xae8] sm:$0xff]  ;;  %v3963_v28 = vpack.c.bf16 %v471_v17, %v461_v16  ;;  %v3965_v30 = vpack.c.bf16 %v492_v23, %v482_v22  ;;  %v511_v45 = vld [vmem:[#allocation8 + $0xba0] sm:$0xff]  ;;  %v517_v48 = vld [vmem:[#allocation8 + $0xbd0] sm:$0xff] }
  0xab   :  { %v508_v38 = vld [vmem:[#allocation8 + $0xb88] sm:$0xff]  ;;  %v507_v46 = vld [vmem:[#allocation8 + $0xb80] sm:$0xff]  ;;  %v538_v52 = vld [vmem:[#allocation8 + $0xc78] sm:$0xff]  ;;  %v3971_v53 = vpack.c.bf16 %v511_v45, %v501_v44 }
  0xac   :  { %3948 = vmatpush1.bf16.msra.mxu1 %v3947_v34  ;;  %v4157_v34 = vpack.c.bf16 %v498_v25, %v488_v24  ;;  %v4161_v47 = vpack.c.bf16 %v518_v39, %v508_v38  ;;  %v4163_v54 = vpack.c.bf16 %v517_v48, %v507_v46  ;;  %v521_v57 = vld [vmem:[#allocation8 + $0xbf0] sm:$0xff]  ;;  %v531_v58 = vld [vmem:[#allocation8 + $0xc40] sm:$0xff]  ;;  %v552_v63 = vld [vmem:[#allocation8 + $0xce8] sm:$0xff] }
  0xad   :  { %4076 = vmatpush1.bf16.msra.mxu0 %v4075_v36  ;;  %3950 = vmatprep.subr.bf16.mxu1 %v3949_v37  ;;  %v502_v36 = vld [vmem:[#allocation8 + $0xb58] sm:$0xff]  ;;  %v512_v37 = vld [vmem:[#allocation8 + $0xba8] sm:$0xff]  ;;  %v527_v59 = vld [vmem:[#allocation8 + $0xc20] sm:$0xff]  ;;  %v3975_v2 = vpack.c.bf16 %v531_v58, %v521_v57 }
  0xae   :  { %4078 = vmatprep.subr.bf16.mxu0 %v4077_v42  ;;  %v4159_v42 = vpack.c.bf16 %v497_v35, %v487_v33  ;;  %v3969_v43 = vpack.c.bf16 %v512_v37, %v502_v36  ;;  %v537_v61 = vld [vmem:[#allocation8 + $0xc70] sm:$0xff]  ;;  %v551_v6 = vld [vmem:[#allocation8 + $0xce0] sm:$0xff]  ;;  %v562_v10 = vld [vmem:[#allocation8 + $0xd38] sm:$0xff] }
  0xaf   :  { %v4167_v3 = vpack.c.bf16 %v537_v61, %v527_v59  ;;  %v547_v7 = vld [vmem:[#allocation8 + $0xcc0] sm:$0xff]  ;;  %v557_v9 = vld [vmem:[#allocation8 + $0xd10] sm:$0xff]  ;;  %v568_v12 = vld [vmem:[#allocation8 + $0xd68] sm:$0xff] }
  0xb0   :  { %3952 = vmatpush1.bf16.msra.mxu1 %v3951_v49  ;;  %v522_v49 = vld [vmem:[#allocation8 + $0xbf8] sm:$0xff]  ;;  %v561_v16 = vld [vmem:[#allocation8 + $0xd30] sm:$0xff]  ;;  %v4171_v17 = vpack.c.bf16 %v557_v9, %v547_v7  ;;  %v567_v21 = vld [vmem:[#allocation8 + $0xd60] sm:$0xff] }
  0xb1   :  { %4080 = vmatpush1.bf16.msra.mxu0 %v4079_v50  ;;  %3954 = vmatprep.subr.bf16.mxu1 %v3953_v51  ;;  %v532_v50 = vld [vmem:[#allocation8 + $0xc48] sm:$0xff]  ;;  %v577_v22 = vld [vmem:[#allocation8 + $0xdb0] sm:$0xff]  ;;  %v582_v24 = vld [vmem:[#allocation8 + $0xdd8] sm:$0xff] }
  0xb2   :  { %4082 = vmatprep.subr.bf16.mxu0 %v4081_v56  ;;  %v528_v51 = vld [vmem:[#allocation8 + $0xc28] sm:$0xff]  ;;  %v3973_v56 = vpack.c.bf16 %v532_v50, %v522_v49  ;;  %v5740_v32 = vld [vmem:[#allocation3 + $0x20] sm:$0xff]  ;;  %v4175_v36 = vpack.c.bf16 %v577_v22, %v567_v21  ;;  %v597_v44 = vld [vmem:[#allocation8 + $0xe50] sm:$0xff] }
  0xb3   :  { %v4165_v60 = vpack.c.bf16 %v538_v52, %v528_v51  ;;  %v592_v25 = vld [vmem:[#allocation8 + $0xe28] sm:$0xff]  ;;  %119 = vst [vmem:[#allocation2 + $0x20] sm:$0xff] %v5740_v32  ;;  %v794_v35 = vrot.slane %v5740_v32, 1  ;;  %v591_v38 = vld [vmem:[#allocation8 + $0xe20] sm:$0xff]  ;;  %v602_v45 = vld [vmem:[#allocation8 + $0xe78] sm:$0xff] }
  0xb4   :  { %3956 = vmatpush1.bf16.msra.mxu1 %v3955_v62  ;;  %v542_v62 = vld [vmem:[#allocation8 + $0xc98] sm:$0xff]  ;;  %v3985_v37 = vpack.c.bf16 %v592_v25, %v582_v24  ;;  %v587_v39 = vld [vmem:[#allocation8 + $0xe00] sm:$0xff]  ;;  %v612_v46 = vld [vmem:[#allocation8 + $0xec8] sm:$0xff] }
  0xb5   :  { %4084 = vmatpush1.bf16.msra.mxu0 %v4083_v0  ;;  %3958 = vmatprep.subr.bf16.mxu1 %v3957_v1  ;;  %v548_v0 = vld [vmem:[#allocation8 + $0xcc8] sm:$0xff]  ;;  %v558_v1 = vld [vmem:[#allocation8 + $0xd18] sm:$0xff]  ;;  %v3977_v4 = vpack.c.bf16 %v552_v63, %v542_v62  ;;  %v4179_v50 = vpack.c.bf16 %v597_v44, %v587_v39  ;;  %v3989_v27 = vpack.c.bf16 %v612_v46, %v602_v45  ;;  %v601_v51 = vld [vmem:[#allocation8 + $0xe70] sm:$0xff] }
  0xb6   :  { %4086 = vmatprep.subr.bf16.mxu0 %v4085_v5  ;;  %v541_v5 = vld [vmem:[#allocation8 + $0xc90] sm:$0xff]  ;;  %v4169_v8 = vpack.c.bf16 %v558_v1, %v548_v0  ;;  %v608_v19 = vld [vmem:[#allocation8 + $0xea8] sm:$0xff]  ;;  %v618_v48 = vld [vmem:[#allocation8 + $0xef8] sm:$0xff] }
  0xb7   :  { %v607_v52 = vld [vmem:[#allocation8 + $0xea0] sm:$0xff]  ;;  %v632_v57 = vld [vmem:[#allocation8 + $0xf68] sm:$0xff]  ;;  %v638_v59 = vld [vmem:[#allocation8 + $0xf98] sm:$0xff] }
  0xb8   :  { %3960 = vmatpush1.bf16.msra.mxu1 %v3959_v11  ;;  %v572_v11 = vld [vmem:[#allocation8 + $0xd88] sm:$0xff]  ;;  %v621_v61 = vld [vmem:[#allocation8 + $0xf10] sm:$0xff]  ;;  %v631_v0 = vld [vmem:[#allocation8 + $0xf60] sm:$0xff] }
  0xb9   :  { %4088 = vmatpush1.bf16.msra.mxu0 %v4087_v14  ;;  %3962 = vmatprep.subr.bf16.mxu1 %v3961_v15  ;;  %v578_v14 = vld [vmem:[#allocation8 + $0xdb8] sm:$0xff]  ;;  %v3979_v15 = vpack.c.bf16 %v551_v6, %v541_v5  ;;  %v3981_v18 = vpack.c.bf16 %v572_v11, %v562_v10  ;;  %v628_v58 = vld [vmem:[#allocation8 + $0xf48] sm:$0xff]  ;;  %v627_v1 = vld [vmem:[#allocation8 + $0xf40] sm:$0xff]  ;;  %v3995_v11 = vpack.c.bf16 %v631_v0, %v621_v61 }
  0xba   :  { %4154 = vmatprep.subr.bf16.mxu0 %v4153_v20  ;;  %v571_v20 = vld [vmem:[#allocation8 + $0xd80] sm:$0xff]  ;;  %v4173_v23 = vpack.c.bf16 %v578_v14, %v568_v12  ;;  %v642_v5 = vld [vmem:[#allocation8 + $0xfb8] sm:$0xff]  ;;  %v652_v6 = vld [vmem:[#allocation8 + $0x1008] sm:$0xff] }
  0xbb   :  { %873 = vmatmul.mubr.f32.vlgmr.msra.gmra.mrb[0].mxu1 %v5732_v26  ;;  %v3983_v33 = vpack.c.bf16 %v571_v20, %v561_v16  ;;  %v658_v9 = vld [vmem:[#allocation8 + $0x1038] sm:$0xff]  ;;  %v3997_v16 = vpack.c.bf16 %v652_v6, %v642_v5  ;;  %v647_v20 = vld [vmem:[#allocation8 + $0xfe0] sm:$0xff]  ;;  %v657_v22 = vld [vmem:[#allocation8 + $0x1030] sm:$0xff] }
  0xbc   :  { %3964 = vmatpush1.bf16.msra.mxu1 %v3963_v28  ;;  %1039 = vmatmul.mubr.f32.vlgmr.msra.gmra.mrb[0].mxu0 %v5732_v26  ;;  %v5736_v28 = vld [vmem:[#allocation3 + $0x28] sm:$0xff]  ;;  %v667_v32 = vld [vmem:[#allocation8 + $0x1080] sm:$0xff]  ;;  %v717_v61 = vld [vmem:[#allocation8 + $0x1210] sm:$0xff] }
  0xbd   :  { %4156 = vmatpush1.bf16.msra.mxu0 %v4155_v29  ;;  %3966 = vmatprep.subr.bf16.mxu1 %v3965_v30  ;;  %v588_v29 = vld [vmem:[#allocation8 + $0xe08] sm:$0xff]  ;;  %v598_v30 = vld [vmem:[#allocation8 + $0xe58] sm:$0xff]  ;;  %120 = vst [vmem:[#allocation2 + $0x28] sm:$0xff] %v5736_v28  ;;  %v796_v31 = vrot.slane %v5736_v28, 1  ;;  %v721_v5 = vld [vmem:[#allocation8 + $0x1230] sm:$0xff] }
  0xbe   :  { %4158 = vmatprep.subr.bf16.mxu0 %v4157_v34  ;;  %v581_v34 = vld [vmem:[#allocation8 + $0xdd0] sm:$0xff]  ;;  %v672_v24 = vld [vmem:[#allocation8 + $0x10a8] sm:$0xff]  ;;  %v731_v6 = vld [vmem:[#allocation8 + $0x1280] sm:$0xff] }
  0xbf   :  { %v3987_v49 = vpack.c.bf16 %v591_v38, %v581_v34  ;;  %v668_v28 = vld [vmem:[#allocation8 + $0x1088] sm:$0xff]  ;;  %v661_v34 = vld [vmem:[#allocation8 + $0x1050] sm:$0xff]  ;;  %v682_v38 = vld [vmem:[#allocation8 + $0x10f8] sm:$0xff] }
  0xc0   :  { %3968 = vmatpush1.bf16.msra.mxu1 %v3967_v40  ;;  %v5749_v40 = vsel %vm787_vm0, %v792_v41, %v796_v31  ;;  %v121_v41 = vld [vmem:[#allocation6] sm:$0xff]  ;;  %v692_v39 = vld [vmem:[#allocation8 + $0x1148] sm:$0xff] }
  0xc1   :  { %4160 = vmatpush1.bf16.msra.mxu0 %v4159_v42  ;;  %3970 = vmatprep.subr.bf16.mxu1 %v3969_v43  ;;  %v122_v42 = vld [vmem:[#allocation6 + $0x8] sm:$0xff]  ;;  %v4177_v43 = vpack.c.bf16 %v598_v30, %v588_v29  ;;  %123 = vst [vmem:[#allocation2 + $0x30] sm:$0xff] %v121_v41  ;;  %v4005_v46 = vpack.c.bf16 %v692_v39, %v682_v38  ;;  %v687_v41 = vld [vmem:[#allocation8 + $0x1120] sm:$0xff]  ;;  %v728_v0 = vld [vmem:[#allocation8 + $0x1268] sm:$0xff] }
  0xc2   :  { %4162 = vmatprep.subr.bf16.mxu0 %v4161_v47  ;;  %878 = vmatprep.mubr.f32.mxu1 %v5749_v40  ;;  %v5757_v47 = vsel %vm787_vm0, %v789_v13, %v794_v35  ;;  %124 = vst [vmem:[#allocation2 + $0x38] sm:$0xff] %v122_v42  ;;  %v611_v13 = vld [vmem:[#allocation8 + $0xec0] sm:$0xff]  ;;  %v678_v29 = vld [vmem:[#allocation8 + $0x10d8] sm:$0xff]  ;;  %v688_v42 = vld [vmem:[#allocation8 + $0x1128] sm:$0xff] }
  0xc3   :  { %1044 = vmatprep.mubr.f32.mxu0 %v5749_v40  ;;  %879 = vmatmul.mubr.f32.gmra.mrb[2].mxu1 %v5757_v47  ;;  %v777_v39 = vld [vmem:[#allocation8 + $0x13f0] sm:$0xff] }
  0xc4   :  { %3972 = vmatpush1.bf16.msra.mxu1 %v3971_v53  ;;  %1045 = vmatmul.mubr.f32.gmra.mrb[2].mxu0 %v5757_v47  ;;  %v4181_v53 = vpack.c.bf16 %v618_v48, %v608_v19  ;;  %v681_v19 = vld [vmem:[#allocation8 + $0x10f0] sm:$0xff]  ;;  %v691_v48 = vld [vmem:[#allocation8 + $0x1140] sm:$0xff] }
  0xc5   :  { %4164 = vmatpush1.bf16.msra.mxu0 %v4163_v54  ;;  %3974 = vmatprep.subr.bf16.mxu1 %v3973_v56  ;;  %v617_v54 = vld [vmem:[#allocation8 + $0xef0] sm:$0xff]  ;;  %v622_v56 = vld [vmem:[#allocation8 + $0xf18] sm:$0xff] }
  0xc6   :  { %4166 = vmatprep.subr.bf16.mxu0 %v4165_v60  ;;  %v3991_v60 = vpack.c.bf16 %v611_v13, %v601_v51  ;;  %v4183_v62 = vpack.c.bf16 %v617_v54, %v607_v52  ;;  %v3993_v63 = vpack.c.bf16 %v632_v57, %v622_v56  ;;  %v712_v51 = vld [vmem:[#allocation8 + $0x11e8] sm:$0xff]  ;;  %v718_v52 = vld [vmem:[#allocation8 + $0x1218] sm:$0xff]  ;;  %v701_v57 = vld [vmem:[#allocation8 + $0x1190] sm:$0xff] }
  0xc7   :  { %v708_v13 = vld [vmem:[#allocation8 + $0x11c8] sm:$0xff] }
  0xc8   :  { %3976 = vmatpush1.bf16.msra.mxu1 %v3975_v2  ;;  %v457_v10 = vld [vmem:[#allocation2 + $0x30] sm:$0x1] }
  0xc9   :  { %4168 = vmatpush1.bf16.msra.mxu0 %v4167_v3  ;;  %3978 = vmatprep.subr.bf16.mxu1 %v3977_v4  ;;  %v458_v2 = vld [vmem:[#allocation2 + $0x38] sm:$0x1]  ;;  %v4185_v3 = vpack.c.bf16 %v638_v59, %v628_v58  ;;  %v637_v4 = vld [vmem:[#allocation8 + $0xf90] sm:$0xff]  ;;  %v798_v14 = vrot.slane %v457_v10, 1  ;;  %v711_v58 = vld [vmem:[#allocation8 + $0x11e0] sm:$0xff] }
  0xca   :  { %4170 = vmatprep.subr.bf16.mxu0 %v4169_v8  ;;  %v800_v7 = vrot.slane %v458_v2, 1  ;;  %v648_v8 = vld [vmem:[#allocation8 + $0xfe8] sm:$0xff]  ;;  %v707_v59 = vld [vmem:[#allocation8 + $0x11c0] sm:$0xff]  ;;  %v4011_v2 = vpack.c.bf16 %v711_v58, %v701_v57  ;;  %v742_v10 = vld [vmem:[#allocation8 + $0x12d8] sm:$0xff] }
  0xcb   :  { %v4189_v21 = vpack.c.bf16 %v658_v9, %v648_v8  ;;  %v5771_v25 = vsel %vm787_vm0, %v794_v35, %v798_v14  ;;  %v4193_v35 = vpack.c.bf16 %v678_v29, %v668_v28  ;;  %v737_v9 = vld [vmem:[#allocation8 + $0x12b0] sm:$0xff]  ;;  %v748_v14 = vld [vmem:[#allocation8 + $0x1308] sm:$0xff]  ;;  %v762_v28 = vld [vmem:[#allocation8 + $0x1378] sm:$0xff] }
  0xcc   :  { %3980 = vmatpush1.bf16.msra.mxu1 %v3979_v15  ;;  %v5765_v12 = vsel %vm787_vm0, %v796_v31, %v800_v7  ;;  %v4187_v15 = vpack.c.bf16 %v637_v4, %v627_v1  ;;  %v4191_v31 = vpack.c.bf16 %v657_v22, %v647_v20  ;;  %v738_v1 = vld [vmem:[#allocation8 + $0x12b8] sm:$0xff]  ;;  %v727_v7 = vld [vmem:[#allocation8 + $0x1260] sm:$0xff]  ;;  %v741_v20 = vld [vmem:[#allocation8 + $0x12d0] sm:$0xff] }
  0xcd   :  { %4172 = vmatpush1.bf16.msra.mxu0 %v4171_v17  ;;  %3982 = vmatprep.subr.bf16.mxu1 %v3981_v18  ;;  %v641_v17 = vld [vmem:[#allocation8 + $0xfb0] sm:$0xff]  ;;  %v651_v18 = vld [vmem:[#allocation8 + $0x1000] sm:$0xff]  ;;  %v4205_v8 = vpack.c.bf16 %v738_v1, %v728_v0  ;;  %v772_v29 = vld [vmem:[#allocation8 + $0x13c8] sm:$0xff] }
  0xce   :  { %4174 = vmatprep.subr.bf16.mxu0 %v4173_v23  ;;  %v662_v23 = vld [vmem:[#allocation8 + $0x1058] sm:$0xff]  ;;  %884 = vmatprep.mubr.f32.mxu1 %v5765_v12  ;;  %v3999_v30 = vpack.c.bf16 %v651_v18, %v641_v17  ;;  %v4207_v17 = vpack.c.bf16 %v737_v9, %v727_v7  ;;  %v747_v22 = vld [vmem:[#allocation8 + $0x1300] sm:$0xff]  ;;  %v516_v1 = vld [vmem:[#allocation8 + $0xbc8] sm:$0xff] }
  0xcf   :  { %1050 = vmatprep.mubr.f32.mxu0 %v5765_v12  ;;  %885 = vmatmul.mubr.f32.gmra.mrb[4].mxu1 %v5771_v25  ;;  %v506_v0 = vld [vmem:[#allocation8 + $0xb78] sm:$0xff]  ;;  %v505_v7 = vld [vmem:[#allocation8 + $0xb70] sm:$0xff]  ;;  %v171_v9 = vld [vmem:[#allocation8 + $0x140] sm:$0xff] }
  0xd0   :  { %3984 = vmatpush1.bf16.msra.mxu1 %v3983_v33  ;;  %1051 = vmatmul.mubr.f32.gmra.mrb[4].mxu0 %v5771_v25  ;;  %v4001_v33 = vpack.c.bf16 %v672_v24, %v662_v23  ;;  %v757_v24 = vld [vmem:[#allocation8 + $0x1350] sm:$0xff] }
  0xd1   :  { %4176 = vmatpush1.bf16.msra.mxu0 %v4175_v36  ;;  %3986 = vmatprep.subr.bf16.mxu1 %v3985_v37  ;;  %v671_v36 = vld [vmem:[#allocation8 + $0x10a0] sm:$0xff]  ;;  %v677_v37 = vld [vmem:[#allocation8 + $0x10d0] sm:$0xff] }
  0xd2   :  { %4178 = vmatprep.subr.bf16.mxu0 %v4177_v43  ;;  %955 = vmatprep.mubr.f32.mxu1 %v5724_v55  ;;  %v698_v43 = vld [vmem:[#allocation8 + $0x1178] sm:$0xff]  ;;  %v4003_v44 = vpack.c.bf16 %v671_v36, %v661_v34  ;;  %v4195_v45 = vpack.c.bf16 %v677_v37, %v667_v32  ;;  %v4211_v34 = vpack.c.bf16 %v757_v24, %v747_v22  ;;  %v761_v32 = vld [vmem:[#allocation8 + $0x1370] sm:$0xff]  ;;  %v767_v37 = vld [vmem:[#allocation8 + $0x13a0] sm:$0xff] }
  0xd3   :  { %1204 = vmatprep.mubr.f32.mxu0 %v5724_v55  ;;  %v4021_v36 = vpack.c.bf16 %v772_v29, %v762_v28  ;;  %v525_v22 = vld [vmem:[#allocation8 + $0xc10] sm:$0xff]  ;;  %v191_v24 = vld [vmem:[#allocation8 + $0x1e0] sm:$0xff] }
  0xd4   :  { %3988 = vmatpush1.bf16.msra.mxu1 %v3987_v49  ;;  %v4197_v49 = vpack.c.bf16 %v698_v43, %v688_v42  ;;  %v466_v42 = vld [vmem:[#allocation8 + $0xa38] sm:$0xff]  ;;  %v476_v43 = vld [vmem:[#allocation8 + $0xa88] sm:$0xff]  ;;  %v201_v29 = vld [vmem:[#allocation8 + $0x230] sm:$0xff] }
  0xd5   :  { %4180 = vmatpush1.bf16.msra.mxu0 %v4179_v50  ;;  %3990 = vmatprep.subr.bf16.mxu1 %v3989_v27  ;;  %v697_v50 = vld [vmem:[#allocation8 + $0x1170] sm:$0xff]  ;;  %v702_v27 = vld [vmem:[#allocation8 + $0x1198] sm:$0xff] }
  0xd6   :  { %4182 = vmatprep.subr.bf16.mxu0 %v4181_v53  ;;  %v4007_v53 = vpack.c.bf16 %v691_v48, %v681_v19  ;;  %v4199_v54 = vpack.c.bf16 %v697_v50, %v687_v41  ;;  %v4009_v56 = vpack.c.bf16 %v712_v51, %v702_v27  ;;  %v4215_v19 = vpack.c.bf16 %v777_v39, %v767_v37  ;;  %v465_v41 = vld [vmem:[#allocation8 + $0xa30] sm:$0xff]  ;;  %v131_v50 = vld [vmem:[#allocation8] sm:$0xff] }
  0xd7   :  { %v4089_v48 = vpack.c.bf16 %v476_v43, %v466_v42  ;;  %v141_v51 = vld [vmem:[#allocation8 + $0x50] sm:$0xff]  ;;  %v555_v39 = vld [vmem:[#allocation8 + $0xd00] sm:$0xff] }
  0xd8   :  { %3992 = vmatpush1.bf16.msra.mxu1 %v3991_v60  ;;  %v4201_v60 = vpack.c.bf16 %v718_v52, %v708_v13  ;;  %v486_v13 = vld [vmem:[#allocation8 + $0xad8] sm:$0xff]  ;;  %v496_v52 = vld [vmem:[#allocation8 + $0xb28] sm:$0xff]  ;;  %v4219_v57 = vpack.c.bf16 %v141_v51, %v131_v50  ;;  %v211_v42 = vld [vmem:[#allocation8 + $0x280] sm:$0xff] }
  0xd9   :  { %4184 = vmatpush1.bf16.msra.mxu0 %v4183_v62  ;;  %3994 = vmatprep.subr.bf16.mxu1 %v3993_v63  ;;  %v722_v62 = vld [vmem:[#allocation8 + $0x1238] sm:$0xff]  ;;  %v732_v63 = vld [vmem:[#allocation8 + $0x1288] sm:$0xff]  ;;  %v4093_v58 = vpack.c.bf16 %v496_v52, %v486_v13  ;;  %v575_v51 = vld [vmem:[#allocation8 + $0xda0] sm:$0xff] }
  0xda   :  { %4186 = vmatprep.subr.bf16.mxu0 %v4185_v3  ;;  %v4203_v3 = vpack.c.bf16 %v717_v61, %v707_v59  ;;  %v4013_v4 = vpack.c.bf16 %v732_v63, %v722_v62  ;;  %v485_v59 = vld [vmem:[#allocation8 + $0xad0] sm:$0xff]  ;;  %v151_v61 = vld [vmem:[#allocation8 + $0xa0] sm:$0xff] }
  0xdb   :  { %v161_v63 = vld [vmem:[#allocation8 + $0xf0] sm:$0xff]  ;;  %v231_v13 = vld [vmem:[#allocation8 + $0x320] sm:$0xff] }
  0xdc   :  { %3996 = vmatpush1.bf16.msra.mxu1 %v3995_v11  ;;  %v752_v11 = vld [vmem:[#allocation8 + $0x1328] sm:$0xff] }
  0xdd   :  { %4188 = vmatpush1.bf16.msra.mxu0 %v4187_v15  ;;  %3998 = vmatprep.subr.bf16.mxu1 %v3997_v16  ;;  %v758_v15 = vld [vmem:[#allocation8 + $0x1358] sm:$0xff]  ;;  %v4015_v16 = vpack.c.bf16 %v731_v6, %v721_v5  ;;  %v4017_v18 = vpack.c.bf16 %v752_v11, %v742_v10  ;;  %v4223_v5 = vpack.c.bf16 %v161_v63, %v151_v61  ;;  %v181_v11 = vld [vmem:[#allocation8 + $0x190] sm:$0xff]  ;;  %v251_v63 = vld [vmem:[#allocation8 + $0x3c0] sm:$0xff] }
  0xde   :  { %4190 = vmatprep.subr.bf16.mxu0 %v4189_v21  ;;  %v751_v21 = vld [vmem:[#allocation8 + $0x1320] sm:$0xff]  ;;  %v4209_v23 = vpack.c.bf16 %v758_v15, %v748_v14  ;;  %v4097_v6 = vpack.c.bf16 %v516_v1, %v506_v0  ;;  %v526_v14 = vld [vmem:[#allocation8 + $0xc18] sm:$0xff]  ;;  %v536_v15 = vld [vmem:[#allocation8 + $0xc68] sm:$0xff] }
  0xdf   :  { %v585_v61 = vld [vmem:[#allocation8 + $0xdf0] sm:$0xff] }
  0xe0   :  { %4000 = vmatpush1.bf16.msra.mxu1 %v3999_v30  ;;  %v768_v30 = vld [vmem:[#allocation8 + $0x13a8] sm:$0xff]  ;;  %v261_v1 = vld [vmem:[#allocation8 + $0x410] sm:$0xff] }
  0xe1   :  { %4192 = vmatpush1.bf16.msra.mxu0 %v4191_v31  ;;  %4002 = vmatprep.subr.bf16.mxu1 %v4001_v33  ;;  %v778_v31 = vld [vmem:[#allocation8 + $0x13f8] sm:$0xff]  ;;  %v4019_v33 = vpack.c.bf16 %v751_v21, %v741_v20  ;;  %v4227_v20 = vpack.c.bf16 %v181_v11, %v171_v9  ;;  %v4101_v21 = vpack.c.bf16 %v536_v15, %v526_v14  ;;  %v605_v9 = vld [vmem:[#allocation8 + $0xe90] sm:$0xff]  ;;  %v271_v11 = vld [vmem:[#allocation8 + $0x460] sm:$0xff] }
  0xe2   :  { %4194 = vmatprep.subr.bf16.mxu0 %v4193_v35  ;;  %v771_v35 = vld [vmem:[#allocation8 + $0x13c0] sm:$0xff]  ;;  %v4213_v38 = vpack.c.bf16 %v778_v31, %v768_v30  ;;  %v546_v30 = vld [vmem:[#allocation8 + $0xcb8] sm:$0xff]  ;;  %v556_v31 = vld [vmem:[#allocation8 + $0xd08] sm:$0xff] }
  0xe3   :  { %v4105_v37 = vpack.c.bf16 %v556_v31, %v546_v30  ;;  %v281_v15 = vld [vmem:[#allocation8 + $0x4b0] sm:$0xff] }
  0xe4   :  { %4004 = vmatpush1.bf16.msra.mxu1 %v4003_v44  ;;  %v132_v44 = vld [vmem:[#allocation8 + $0x8] sm:$0xff]  ;;  %v301_v31 = vld [vmem:[#allocation8 + $0x550] sm:$0xff] }
  0xe5   :  { %4196 = vmatpush1.bf16.msra.mxu0 %v4195_v45  ;;  %4006 = vmatprep.subr.bf16.mxu1 %v4005_v46  ;;  %v142_v45 = vld [vmem:[#allocation8 + $0x58] sm:$0xff]  ;;  %v4023_v46 = vpack.c.bf16 %v771_v35, %v761_v32  ;;  %v5788_v32 = vld [vmem:[#allocation2 + $0x8] sm:$0xff]  ;;  %v4231_v35 = vpack.c.bf16 %v201_v29, %v191_v24  ;;  %v625_v24 = vld [vmem:[#allocation8 + $0xf30] sm:$0xff] }
  0xe6   :  { %4198 = vmatprep.subr.bf16.mxu0 %v4197_v49  ;;  %v475_v49 = vld [vmem:[#allocation8 + $0xa80] sm:$0xff]  ;;  %v4217_v27 = vpack.c.bf16 %v142_v45, %v132_v44  ;;  %v221_v44 = vld [vmem:[#allocation8 + $0x2d0] sm:$0xff]  ;;  %v566_v45 = vld [vmem:[#allocation8 + $0xd58] sm:$0xff] }
  0xe7   :  { %v291_v29 = vld [vmem:[#allocation8 + $0x500] sm:$0xff] }
  0xe8   :  { %4008 = vmatpush1.bf16.msra.mxu1 %v4007_v53  ;;  %v152_v53 = vld [vmem:[#allocation8 + $0xa8] sm:$0xff] }
  0xe9   :  { %4200 = vmatpush1.bf16.msra.mxu0 %v4199_v54  ;;  %4010 = vmatprep.subr.bf16.mxu1 %v4009_v56  ;;  %v162_v54 = vld [vmem:[#allocation8 + $0xf8] sm:$0xff]  ;;  %v4091_v56 = vpack.c.bf16 %v475_v49, %v465_v41  ;;  %v4235_v49 = vpack.c.bf16 %v221_v44, %v211_v42  ;;  %v645_v42 = vld [vmem:[#allocation8 + $0xfd0] sm:$0xff]  ;;  %v311_v44 = vld [vmem:[#allocation8 + $0x5a0] sm:$0xff] }
  0xea   :  { %4202 = vmatprep.subr.bf16.mxu0 %v4201_v60  ;;  %v495_v60 = vld [vmem:[#allocation8 + $0xb20] sm:$0xff]  ;;  %v4221_v62 = vpack.c.bf16 %v162_v54, %v152_v53  ;;  %v241_v53 = vld [vmem:[#allocation8 + $0x370] sm:$0xff]  ;;  %v586_v54 = vld [vmem:[#allocation8 + $0xdf8] sm:$0xff] }
  0xec   :  { %4012 = vmatpush1.bf16.msra.mxu1 %v4011_v2  ;;  %v172_v2 = vld [vmem:[#allocation8 + $0x148] sm:$0xff] }
  0xed   :  { %4204 = vmatpush1.bf16.msra.mxu0 %v4203_v3  ;;  %4014 = vmatprep.subr.bf16.mxu1 %v4013_v4  ;;  %v182_v3 = vld [vmem:[#allocation8 + $0x198] sm:$0xff]  ;;  %v4095_v4 = vpack.c.bf16 %v495_v60, %v485_v59  ;;  %v4239_v59 = vpack.c.bf16 %v241_v53, %v231_v13  ;;  %v665_v13 = vld [vmem:[#allocation8 + $0x1070] sm:$0xff]  ;;  %v331_v53 = vld [vmem:[#allocation8 + $0x640] sm:$0xff] }
  0xee   :  { %4206 = vmatprep.subr.bf16.mxu0 %v4205_v8  ;;  %v515_v8 = vld [vmem:[#allocation8 + $0xbc0] sm:$0xff]  ;;  %v4225_v10 = vpack.c.bf16 %v182_v3, %v172_v2  ;;  %v606_v2 = vld [vmem:[#allocation8 + $0xe98] sm:$0xff]  ;;  %v616_v3 = vld [vmem:[#allocation8 + $0xee8] sm:$0xff] }
  0xf0   :  { %4016 = vmatpush1.bf16.msra.mxu1 %v4015_v16  ;;  %v192_v16 = vld [vmem:[#allocation8 + $0x1e8] sm:$0xff] }
  0xf1   :  { %4208 = vmatpush1.bf16.msra.mxu0 %v4207_v17  ;;  %4018 = vmatprep.subr.bf16.mxu1 %v4017_v18  ;;  %v202_v17 = vld [vmem:[#allocation8 + $0x238] sm:$0xff]  ;;  %v4099_v18 = vpack.c.bf16 %v515_v8, %v505_v7  ;;  %v4243_v7 = vpack.c.bf16 %v261_v1, %v251_v63  ;;  %v4117_v8 = vpack.c.bf16 %v616_v3, %v606_v2  ;;  %v685_v63 = vld [vmem:[#allocation8 + $0x1110] sm:$0xff]  ;;  %v351_v1 = vld [vmem:[#allocation8 + $0x6e0] sm:$0xff] }
  0xf2   :  { %4210 = vmatprep.subr.bf16.mxu0 %v4209_v23  ;;  %v535_v23 = vld [vmem:[#allocation8 + $0xc60] sm:$0xff]  ;;  %v4229_v28 = vpack.c.bf16 %v202_v17, %v192_v16  ;;  %v626_v16 = vld [vmem:[#allocation8 + $0xf38] sm:$0xff]  ;;  %v636_v17 = vld [vmem:[#allocation8 + $0xf88] sm:$0xff] }
  0xf3   :  { %v361_v3 = vld [vmem:[#allocation8 + $0x730] sm:$0xff] }
  0xf4   :  { %4020 = vmatpush1.bf16.msra.mxu1 %v4019_v33  ;;  %v212_v33 = vld [vmem:[#allocation8 + $0x288] sm:$0xff] }
  0xf5   :  { %4212 = vmatpush1.bf16.msra.mxu0 %v4211_v34  ;;  %4022 = vmatprep.subr.bf16.mxu1 %v4021_v36  ;;  %v222_v34 = vld [vmem:[#allocation8 + $0x2d8] sm:$0xff]  ;;  %v4103_v36 = vpack.c.bf16 %v535_v23, %v525_v22  ;;  %v4247_v22 = vpack.c.bf16 %v281_v15, %v271_v11  ;;  %v4121_v23 = vpack.c.bf16 %v636_v17, %v626_v16  ;;  %v705_v11 = vld [vmem:[#allocation8 + $0x11b0] sm:$0xff]  ;;  %v371_v15 = vld [vmem:[#allocation8 + $0x780] sm:$0xff] }
  0xf6   :  { %4214 = vmatprep.subr.bf16.mxu0 %v4213_v38  ;;  %v545_v38 = vld [vmem:[#allocation8 + $0xcb0] sm:$0xff]  ;;  %v4233_v43 = vpack.c.bf16 %v222_v34, %v212_v33  ;;  %v646_v33 = vld [vmem:[#allocation8 + $0xfd8] sm:$0xff]  ;;  %v656_v34 = vld [vmem:[#allocation8 + $0x1028] sm:$0xff] }
  0xf7   :  { %v4107_v41 = vpack.c.bf16 %v555_v39, %v545_v38  ;;  %v4251_v38 = vpack.c.bf16 %v301_v31, %v291_v29  ;;  %v4125_v39 = vpack.c.bf16 %v656_v34, %v646_v33  ;;  %v381_v17 = vld [vmem:[#allocation8 + $0x7d0] sm:$0xff]  ;;  %v391_v31 = vld [vmem:[#allocation8 + $0x820] sm:$0xff] }
  0xf8   :  { %4024 = vmatpush1.bf16.msra.mxu1 %v4023_v46  ;;  %v576_v46 = vld [vmem:[#allocation8 + $0xda8] sm:$0xff]  ;;  %v725_v29 = vld [vmem:[#allocation8 + $0x1250] sm:$0xff] }
  0xf9   :  { %4216 = vmatpush1.bf16.msra.mxu0 %v4215_v19  ;;  %4090 = vmatprep.subr.bf16.mxu1 %v4089_v48  ;;  %v232_v19 = vld [vmem:[#allocation8 + $0x328] sm:$0xff]  ;;  %v242_v48 = vld [vmem:[#allocation8 + $0x378] sm:$0xff]  ;;  %v4109_v50 = vpack.c.bf16 %v576_v46, %v566_v45  ;;  %v321_v46 = vld [vmem:[#allocation8 + $0x5f0] sm:$0xff] }
  0xfa   :  { %4218 = vmatprep.subr.bf16.mxu0 %v4217_v27  ;;  %v565_v27 = vld [vmem:[#allocation8 + $0xd50] sm:$0xff]  ;;  %v4237_v52 = vpack.c.bf16 %v242_v48, %v232_v19  ;;  %v666_v19 = vld [vmem:[#allocation8 + $0x1078] sm:$0xff]  ;;  %v676_v48 = vld [vmem:[#allocation8 + $0x10c8] sm:$0xff] }
  0xfb   :  { %956 = vmatmul.mubr.f32.vlgmr.msra.gmra.mrb[6].mxu1 %v5732_v26  ;;  %v401_v34 = vld [vmem:[#allocation8 + $0x870] sm:$0xff] }
  0xfc   :  { %4092 = vmatpush1.bf16.msra.mxu1 %v4091_v56  ;;  %1205 = vmatmul.mubr.f32.vlgmr.msra.gmra.mrb[6].mxu0 %v5732_v26  ;;  %v596_v56 = vld [vmem:[#allocation8 + $0xe48] sm:$0xff] }
  0xfd   :  { %4220 = vmatpush1.bf16.msra.mxu0 %v4219_v57  ;;  %4094 = vmatprep.subr.bf16.mxu1 %v4093_v58  ;;  %v252_v57 = vld [vmem:[#allocation8 + $0x3c8] sm:$0xff]  ;;  %v4111_v58 = vpack.c.bf16 %v575_v51, %v565_v27  ;;  %v4113_v60 = vpack.c.bf16 %v596_v56, %v586_v54  ;;  %v4255_v27 = vpack.c.bf16 %v321_v46, %v311_v44  ;;  %v341_v56 = vld [vmem:[#allocation8 + $0x690] sm:$0xff]  ;;  %v411_v46 = vld [vmem:[#allocation8 + $0x8c0] sm:$0xff] }
  0xfe   :  { %4222 = vmatprep.subr.bf16.mxu0 %v4221_v62  ;;  %961 = vmatprep.mubr.f32.mxu1 %v5749_v40  ;;  %v595_v62 = vld [vmem:[#allocation8 + $0xe40] sm:$0xff]  ;;  %v4129_v51 = vpack.c.bf16 %v676_v48, %v666_v19  ;;  %v745_v44 = vld [vmem:[#allocation8 + $0x12f0] sm:$0xff] }
  0xff   :  { %1210 = vmatprep.mubr.f32.mxu0 %v5749_v40  ;;  %962 = vmatmul.mubr.f32.gmra.mrb[8].mxu1 %v5757_v47  ;;  %v421_v48 = vld [vmem:[#allocation8 + $0x910] sm:$0xff] }
 0x100   :  { %4096 = vmatpush1.bf16.msra.mxu1 %v4095_v4  ;;  %1211 = vmatmul.mubr.f32.gmra.mrb[8].mxu0 %v5757_v47  ;;  %v272_v4 = vld [vmem:[#allocation8 + $0x468] sm:$0xff] }
 0x101   :  { %4224 = vmatpush1.bf16.msra.mxu0 %v4223_v5  ;;  %4098 = vmatprep.subr.bf16.mxu1 %v4097_v6  ;;  %v282_v5 = vld [vmem:[#allocation8 + $0x4b8] sm:$0xff]  ;;  %v4115_v6 = vpack.c.bf16 %v595_v62, %v585_v61  ;;  %v4259_v61 = vpack.c.bf16 %v341_v56, %v331_v53  ;;  %v765_v53 = vld [vmem:[#allocation8 + $0x1390] sm:$0xff]  ;;  %v431_v56 = vld [vmem:[#allocation8 + $0x960] sm:$0xff] }
 0x102   :  { %4226 = vmatprep.subr.bf16.mxu0 %v4225_v10  ;;  %967 = vmatprep.mubr.f32.mxu1 %v5765_v12  ;;  %v615_v10 = vld [vmem:[#allocation8 + $0xee0] sm:$0xff]  ;;  %v4245_v14 = vpack.c.bf16 %v282_v5, %v272_v4  ;;  %v706_v4 = vld [vmem:[#allocation8 + $0x11b8] sm:$0xff]  ;;  %v716_v5 = vld [vmem:[#allocation8 + $0x1208] sm:$0xff] }
 0x103   :  { %1216 = vmatprep.mubr.f32.mxu0 %v5765_v12  ;;  %968 = vmatmul.mubr.f32.gmra.mrb[10].mxu1 %v5771_v25 }
 0x104   :  { %4100 = vmatpush1.bf16.msra.mxu1 %v4099_v18  ;;  %1217 = vmatmul.mubr.f32.gmra.mrb[10].mxu0 %v5771_v25  ;;  %v292_v18 = vld [vmem:[#allocation8 + $0x508] sm:$0xff] }
 0x105   :  { %4228 = vmatpush1.bf16.msra.mxu0 %v4227_v20  ;;  %4102 = vmatprep.subr.bf16.mxu1 %v4101_v21  ;;  %v302_v20 = vld [vmem:[#allocation8 + $0x558] sm:$0xff]  ;;  %v4119_v21 = vpack.c.bf16 %v615_v10, %v605_v9  ;;  %v4263_v9 = vpack.c.bf16 %v361_v3, %v351_v1  ;;  %v4137_v10 = vpack.c.bf16 %v716_v5, %v706_v4  ;;  %v133_v1 = vld [vmem:[#allocation8 + $0x10] sm:$0xff]  ;;  %v135_v3 = vld [vmem:[#allocation8 + $0x20] sm:$0xff] }
 0x106   :  { %4230 = vmatprep.subr.bf16.mxu0 %v4229_v28  ;;  %1121 = vmatprep.mubr.f32.mxu1 %v5724_v55  ;;  %v262_v55 = vld [vmem:[#allocation8 + $0x418] sm:$0xff]  ;;  %v635_v28 = vld [vmem:[#allocation8 + $0xf80] sm:$0xff]  ;;  %v4249_v30 = vpack.c.bf16 %v302_v20, %v292_v18  ;;  %v736_v20 = vld [vmem:[#allocation8 + $0x12a8] sm:$0xff] }
 0x107   :  { %1287 = vmatprep.mubr.f32.mxu0 %v5788_v32  ;;  %v4241_v0 = vpack.c.bf16 %v262_v55, %v252_v57  ;;  %v686_v57 = vld [vmem:[#allocation8 + $0x1118] sm:$0xff]  ;;  %v696_v55 = vld [vmem:[#allocation8 + $0x1168] sm:$0xff]  ;;  %v145_v5 = vld [vmem:[#allocation8 + $0x70] sm:$0xff] }
 0x108   :  { %4104 = vmatpush1.bf16.msra.mxu1 %v4103_v36  ;;  %v312_v36 = vld [vmem:[#allocation8 + $0x5a8] sm:$0xff]  ;;  %v4133_v62 = vpack.c.bf16 %v696_v55, %v686_v57  ;;  %v726_v18 = vld [vmem:[#allocation8 + $0x1258] sm:$0xff]  ;;  %v441_v55 = vld [vmem:[#allocation8 + $0x9b0] sm:$0xff] }
 0x109   :  { %4232 = vmatpush1.bf16.msra.mxu0 %v4231_v35  ;;  %4106 = vmatprep.subr.bf16.mxu1 %v4105_v37  ;;  %v322_v35 = vld [vmem:[#allocation8 + $0x5f8] sm:$0xff]  ;;  %v4123_v37 = vpack.c.bf16 %v635_v28, %v625_v24  ;;  %v4267_v24 = vpack.c.bf16 %v381_v17, %v371_v15  ;;  %v4141_v28 = vpack.c.bf16 %v736_v20, %v726_v18  ;;  %v163_v17 = vld [vmem:[#allocation8 + $0x100] sm:$0xff] }
 0x10a   :  { %4234 = vmatprep.subr.bf16.mxu0 %v4233_v43  ;;  %v655_v43 = vld [vmem:[#allocation8 + $0x1020] sm:$0xff]  ;;  %v4253_v45 = vpack.c.bf16 %v322_v35, %v312_v36  ;;  %v746_v36 = vld [vmem:[#allocation8 + $0x12f8] sm:$0xff]  ;;  %v756_v35 = vld [vmem:[#allocation8 + $0x1348] sm:$0xff] }
 0x10b   :  { %v155_v18 = vld [vmem:[#allocation8 + $0xc0] sm:$0xff] }
 0x10c   :  { %4108 = vmatpush1.bf16.msra.mxu1 %v4107_v41  ;;  %v332_v41 = vld [vmem:[#allocation8 + $0x648] sm:$0xff] }
 0x10d   :  { %4236 = vmatpush1.bf16.msra.mxu0 %v4235_v49  ;;  %4110 = vmatprep.subr.bf16.mxu1 %v4109_v50  ;;  %v342_v49 = vld [vmem:[#allocation8 + $0x698] sm:$0xff]  ;;  %v4127_v50 = vpack.c.bf16 %v655_v43, %v645_v42  ;;  %v4271_v42 = vpack.c.bf16 %v401_v34, %v391_v31  ;;  %v4145_v43 = vpack.c.bf16 %v756_v35, %v746_v36  ;;  %v183_v36 = vld [vmem:[#allocation8 + $0x1a0] sm:$0xff] }
 0x10e   :  { %4238 = vmatprep.subr.bf16.mxu0 %v4237_v52  ;;  %v675_v52 = vld [vmem:[#allocation8 + $0x10c0] sm:$0xff]  ;;  %v4257_v54 = vpack.c.bf16 %v342_v49, %v332_v41  ;;  %v766_v41 = vld [vmem:[#allocation8 + $0x1398] sm:$0xff]  ;;  %v776_v49 = vld [vmem:[#allocation8 + $0x13e8] sm:$0xff] }
 0x10f   :  { %v5796_v31 = vld [vmem:[#allocation2 + $0x18] sm:$0xff]  ;;  %v175_v35 = vld [vmem:[#allocation8 + $0x160] sm:$0xff] }
 0x110   :  { %4112 = vmatpush1.bf16.msra.mxu1 %v4111_v58  ;;  %v352_v58 = vld [vmem:[#allocation8 + $0x6e8] sm:$0xff] }
 0x111   :  { %4240 = vmatpush1.bf16.msra.mxu0 %v4239_v59  ;;  %4114 = vmatprep.subr.bf16.mxu1 %v4113_v60  ;;  %v362_v59 = vld [vmem:[#allocation8 + $0x738] sm:$0xff]  ;;  %v4131_v60 = vpack.c.bf16 %v675_v52, %v665_v13  ;;  %v4275_v13 = vpack.c.bf16 %v421_v48, %v411_v46  ;;  %v4149_v52 = vpack.c.bf16 %v776_v49, %v766_v41  ;;  %v193_v46 = vld [vmem:[#allocation8 + $0x1f0] sm:$0xff]  ;;  %v203_v49 = vld [vmem:[#allocation8 + $0x240] sm:$0xff] }
 0x112   :  { %4242 = vmatprep.subr.bf16.mxu0 %v4241_v0  ;;  %v695_v0 = vld [vmem:[#allocation8 + $0x1160] sm:$0xff]  ;;  %v4261_v2 = vpack.c.bf16 %v362_v59, %v352_v58  ;;  %v134_v58 = vld [vmem:[#allocation8 + $0x18] sm:$0xff]  ;;  %v144_v59 = vld [vmem:[#allocation8 + $0x68] sm:$0xff] }
 0x114   :  { %4116 = vmatpush1.bf16.msra.mxu1 %v4115_v6  ;;  %v372_v6 = vld [vmem:[#allocation8 + $0x788] sm:$0xff] }
 0x115   :  { %4244 = vmatpush1.bf16.msra.mxu0 %v4243_v7  ;;  %4118 = vmatprep.subr.bf16.mxu1 %v4117_v8  ;;  %v382_v7 = vld [vmem:[#allocation8 + $0x7d8] sm:$0xff]  ;;  %v4135_v8 = vpack.c.bf16 %v695_v0, %v685_v63  ;;  %v4279_v63 = vpack.c.bf16 %v441_v55, %v431_v56  ;;  %v4281_v0 = vpack.c.bf16 %v144_v59, %v134_v58  ;;  %v213_v55 = vld [vmem:[#allocation8 + $0x290] sm:$0xff]  ;;  %v223_v58 = vld [vmem:[#allocation8 + $0x2e0] sm:$0xff] }
 0x116   :  { %4246 = vmatprep.subr.bf16.mxu0 %v4245_v14  ;;  %v715_v14 = vld [vmem:[#allocation8 + $0x1200] sm:$0xff]  ;;  %v4265_v16 = vpack.c.bf16 %v382_v7, %v372_v6  ;;  %v154_v6 = vld [vmem:[#allocation8 + $0xb8] sm:$0xff]  ;;  %v164_v7 = vld [vmem:[#allocation8 + $0x108] sm:$0xff] }
 0x117   :  { %v4285_v15 = vpack.c.bf16 %v164_v7, %v154_v6  ;;  %v215_v59 = vld [vmem:[#allocation8 + $0x2a0] sm:$0xff]  ;;  %v245_v7 = vld [vmem:[#allocation8 + $0x390] sm:$0xff] }
 0x118   :  { %4120 = vmatpush1.bf16.msra.mxu1 %v4119_v21  ;;  %v392_v21 = vld [vmem:[#allocation8 + $0x828] sm:$0xff] }
 0x119   :  { %4248 = vmatpush1.bf16.msra.mxu0 %v4247_v22  ;;  %4122 = vmatprep.subr.bf16.mxu1 %v4121_v23  ;;  %v402_v22 = vld [vmem:[#allocation8 + $0x878] sm:$0xff]  ;;  %v4139_v23 = vpack.c.bf16 %v715_v14, %v705_v11  ;;  %v4347_v14 = vpack.c.bf16 %v145_v5, %v135_v3  ;;  %v233_v3 = vld [vmem:[#allocation8 + $0x330] sm:$0xff]  ;;  %v235_v5 = vld [vmem:[#allocation8 + $0x340] sm:$0xff] }
 0x11a   :  { %4250 = vmatprep.subr.bf16.mxu0 %v4249_v30  ;;  %v735_v30 = vld [vmem:[#allocation8 + $0x12a0] sm:$0xff]  ;;  %v4269_v33 = vpack.c.bf16 %v402_v22, %v392_v21  ;;  %v165_v21 = vld [vmem:[#allocation8 + $0x110] sm:$0xff]  ;;  %v174_v22 = vld [vmem:[#allocation8 + $0x158] sm:$0xff] }
 0x11c   :  { %4124 = vmatpush1.bf16.msra.mxu1 %v4123_v37  ;;  %v412_v37 = vld [vmem:[#allocation8 + $0x8c8] sm:$0xff] }
 0x11d   :  { %4252 = vmatpush1.bf16.msra.mxu0 %v4251_v38  ;;  %4126 = vmatprep.subr.bf16.mxu1 %v4125_v39  ;;  %v422_v38 = vld [vmem:[#allocation8 + $0x918] sm:$0xff]  ;;  %v4143_v39 = vpack.c.bf16 %v735_v30, %v725_v29  ;;  %v173_v30 = vld [vmem:[#allocation8 + $0x150] sm:$0xff] }
 0x11e   :  { %4254 = vmatprep.subr.bf16.mxu0 %v4253_v45  ;;  %v755_v45 = vld [vmem:[#allocation8 + $0x1340] sm:$0xff]  ;;  %v4273_v19 = vpack.c.bf16 %v422_v38, %v412_v37  ;;  %v5798_v37 = vld [vmem:[#allocation2 + $0x10] sm:$0xff] }
 0x120   :  { %4128 = vmatpush1.bf16.msra.mxu1 %v4127_v50  ;;  %v432_v50 = vld [vmem:[#allocation8 + $0x968] sm:$0xff] }
 0x121   :  { %4256 = vmatpush1.bf16.msra.mxu0 %v4255_v27  ;;  %4130 = vmatprep.subr.bf16.mxu1 %v4129_v51  ;;  %v442_v27 = vld [vmem:[#allocation8 + $0x9b8] sm:$0xff]  ;;  %v4147_v51 = vpack.c.bf16 %v755_v45, %v745_v44  ;;  %v4291_v45 = vpack.c.bf16 %v183_v36, %v173_v30  ;;  %v273_v36 = vld [vmem:[#allocation8 + $0x470] sm:$0xff] }
 0x122   :  { %4258 = vmatprep.subr.bf16.mxu0 %v4257_v54  ;;  %v775_v54 = vld [vmem:[#allocation8 + $0x13e0] sm:$0xff]  ;;  %v4277_v57 = vpack.c.bf16 %v442_v27, %v432_v50  ;;  %v206_v44 = vld [vmem:[#allocation8 + $0x258] sm:$0xff] }
 0x123   :  { %v195_v50 = vld [vmem:[#allocation8 + $0x200] sm:$0xff] }
 0x124   :  { %4132 = vmatpush1.bf16.msra.mxu1 %v4131_v60  ;;  %v136_v60 = vld [vmem:[#allocation8 + $0x28] sm:$0xff] }
 0x125   :  { %4260 = vmatpush1.bf16.msra.mxu0 %v4259_v61  ;;  %4134 = vmatprep.subr.bf16.mxu1 %v4133_v62  ;;  %v146_v61 = vld [vmem:[#allocation8 + $0x78] sm:$0xff]  ;;  %v4151_v62 = vpack.c.bf16 %v775_v54, %v765_v53  ;;  %v4295_v54 = vpack.c.bf16 %v203_v49, %v193_v46  ;;  %v293_v49 = vld [vmem:[#allocation8 + $0x510] sm:$0xff] }
 0x126   :  { %4262 = vmatprep.subr.bf16.mxu0 %v4261_v2  ;;  %v143_v2 = vld [vmem:[#allocation8 + $0x60] sm:$0xff]  ;;  %v4345_v4 = vpack.c.bf16 %v146_v61, %v136_v60  ;;  %v226_v53 = vld [vmem:[#allocation8 + $0x2f8] sm:$0xff] }
 0x127   :  { %v4283_v11 = vpack.c.bf16 %v143_v2, %v133_v1  ;;  %v234_v61 = vld [vmem:[#allocation8 + $0x338] sm:$0xff] }
 0x128   :  { %4136 = vmatpush1.bf16.msra.mxu1 %v4135_v8  ;;  %v156_v8 = vld [vmem:[#allocation8 + $0xc8] sm:$0xff] }
 0x129   :  { %4264 = vmatpush1.bf16.msra.mxu0 %v4263_v9  ;;  %4138 = vmatprep.subr.bf16.mxu1 %v4137_v10  ;;  %v166_v9 = vld [vmem:[#allocation8 + $0x118] sm:$0xff]  ;;  %v5792_v10 = vld [vmem:[#allocation2] sm:$0xff] }
 0x12a   :  { %4266 = vmatprep.subr.bf16.mxu0 %v4265_v16  ;;  %v153_v16 = vld [vmem:[#allocation8 + $0xb0] sm:$0xff]  ;;  %v4349_v20 = vpack.c.bf16 %v166_v9, %v156_v8  ;;  %v254_v8 = vld [vmem:[#allocation8 + $0x3d8] sm:$0xff]  ;;  %v264_v9 = vld [vmem:[#allocation8 + $0x428] sm:$0xff] }
 0x12b   :  { %v4287_v29 = vpack.c.bf16 %v163_v17, %v153_v16  ;;  %v4305_v16 = vpack.c.bf16 %v264_v9, %v254_v8  ;;  %v253_v17 = vld [vmem:[#allocation8 + $0x3d0] sm:$0xff]  ;;  %v354_v9 = vld [vmem:[#allocation8 + $0x6f8] sm:$0xff] }
 0x12c   :  { %4140 = vmatpush1.bf16.msra.mxu1 %v4139_v23  ;;  %v184_v23 = vld [vmem:[#allocation8 + $0x1a8] sm:$0xff]  ;;  %v345_v8 = vld [vmem:[#allocation8 + $0x6b0] sm:$0xff] }
 0x12d   :  { %4268 = vmatpush1.bf16.msra.mxu0 %v4267_v24  ;;  %4142 = vmatprep.subr.bf16.mxu1 %v4141_v28  ;;  %v176_v24 = vld [vmem:[#allocation8 + $0x168] sm:$0xff]  ;;  %v186_v28 = vld [vmem:[#allocation8 + $0x1b8] sm:$0xff]  ;;  %v4289_v34 = vpack.c.bf16 %v184_v23, %v174_v22  ;;  %v265_v22 = vld [vmem:[#allocation8 + $0x430] sm:$0xff] }
 0x12e   :  { %4270 = vmatprep.subr.bf16.mxu0 %v4269_v33  ;;  %v4351_v33 = vpack.c.bf16 %v165_v21, %v155_v18  ;;  %v4353_v38 = vpack.c.bf16 %v186_v28, %v176_v24  ;;  %v263_v18 = vld [vmem:[#allocation8 + $0x420] sm:$0xff]  ;;  %v274_v23 = vld [vmem:[#allocation8 + $0x478] sm:$0xff]  ;;  %v284_v24 = vld [vmem:[#allocation8 + $0x4c8] sm:$0xff] }
 0x12f   :  { %v276_v28 = vld [vmem:[#allocation8 + $0x488] sm:$0xff]  ;;  %v4307_v30 = vpack.c.bf16 %v263_v18, %v253_v17  ;;  %v353_v18 = vld [vmem:[#allocation8 + $0x6f0] sm:$0xff] }
 0x130   :  { %4144 = vmatpush1.bf16.msra.mxu1 %v4143_v39  ;;  %v194_v39 = vld [vmem:[#allocation8 + $0x1f8] sm:$0xff] }
 0x131   :  { %4272 = vmatpush1.bf16.msra.mxu0 %v4271_v42  ;;  %4146 = vmatprep.subr.bf16.mxu1 %v4145_v43  ;;  %v204_v42 = vld [vmem:[#allocation8 + $0x248] sm:$0xff] }
 0x132   :  { %4274 = vmatprep.subr.bf16.mxu0 %v4273_v19  ;;  %v196_v43 = vld [vmem:[#allocation8 + $0x208] sm:$0xff]  ;;  %v4293_v41 = vpack.c.bf16 %v204_v42, %v194_v39  ;;  %v285_v39 = vld [vmem:[#allocation8 + $0x4d0] sm:$0xff]  ;;  %v294_v42 = vld [vmem:[#allocation8 + $0x518] sm:$0xff] }
 0x133   :  { %v5804_v19 = vld [vmem:[#allocation2 + $0x28] sm:$0xff]  ;;  %v4357_v27 = vpack.c.bf16 %v206_v44, %v196_v43 }
 0x134   :  { %4148 = vmatpush1.bf16.msra.mxu1 %v4147_v51  ;;  %v205_v51 = vld [vmem:[#allocation8 + $0x250] sm:$0xff]  ;;  %v304_v43 = vld [vmem:[#allocation8 + $0x568] sm:$0xff] }
 0x135   :  { %4276 = vmatpush1.bf16.msra.mxu0 %v4275_v13  ;;  %4150 = vmatprep.subr.bf16.mxu1 %v4149_v52  ;;  %v214_v13 = vld [vmem:[#allocation8 + $0x298] sm:$0xff]  ;;  %v216_v52 = vld [vmem:[#allocation8 + $0x2a8] sm:$0xff]  ;;  %v4359_v56 = vpack.c.bf16 %v205_v51, %v195_v50  ;;  %v303_v50 = vld [vmem:[#allocation8 + $0x560] sm:$0xff] }
 0x136   :  { %4278 = vmatprep.subr.bf16.mxu0 %v4277_v57  ;;  %v4361_v60 = vpack.c.bf16 %v226_v53, %v216_v52  ;;  %v296_v44 = vld [vmem:[#allocation8 + $0x528] sm:$0xff] }
 0x137   :  { %v324_v52 = vld [vmem:[#allocation8 + $0x608] sm:$0xff] }
 0x138   :  { %4152 = vmatpush1.bf16.msra.mxu1 %v4151_v62  ;;  %v244_v62 = vld [vmem:[#allocation8 + $0x388] sm:$0xff] }
 0x139   :  { %4280 = vmatpush1.bf16.msra.mxu0 %v4279_v63  ;;  %4282 = vmatprep.subr.bf16.mxu1 %v4281_v0  ;;  %v236_v63 = vld [vmem:[#allocation8 + $0x348] sm:$0xff]  ;;  %v4299_v0 = vpack.c.bf16 %v223_v58, %v213_v55  ;;  %v4301_v2 = vpack.c.bf16 %v244_v62, %v234_v61  ;;  %v313_v58 = vld [vmem:[#allocation8 + $0x5b0] sm:$0xff]  ;;  %v334_v62 = vld [vmem:[#allocation8 + $0x658] sm:$0xff] }
 0x13a   :  { %4346 = vmatprep.subr.bf16.mxu0 %v4345_v4  ;;  %v243_v4 = vld [vmem:[#allocation8 + $0x380] sm:$0xff]  ;;  %v316_v53 = vld [vmem:[#allocation8 + $0x5c8] sm:$0xff]  ;;  %v325_v61 = vld [vmem:[#allocation8 + $0x610] sm:$0xff] }
 0x13b   :  { %1122 = vmatmul.mubr.f32.vlgmr.msra.gmra.mrb[12].mxu1 %v5732_v26  ;;  %v185_v26 = vld [vmem:[#allocation8 + $0x1b0] sm:$0xff] }
 0x13c   :  { %1288 = vmatmul.mubr.f32.vlgmr.msra.gmra.mrb[12].mxu0 %v5792_v10  ;;  %4284 = vmatpush1.bf16.msra.mxu1 %v4283_v11  ;;  %v4355_v48 = vpack.c.bf16 %v185_v26, %v175_v35  ;;  %v256_v11 = vld [vmem:[#allocation8 + $0x3e8] sm:$0xff]  ;;  %v283_v35 = vld [vmem:[#allocation8 + $0x4c0] sm:$0xff] }
 0x13d   :  { %4348 = vmatpush1.bf16.msra.mxu0 %v4347_v14  ;;  %4286 = vmatprep.subr.bf16.mxu1 %v4285_v15  ;;  %v266_v14 = vld [vmem:[#allocation8 + $0x438] sm:$0xff]  ;;  %v4303_v15 = vpack.c.bf16 %v243_v4, %v233_v3  ;;  %v4311_v46 = vpack.c.bf16 %v283_v35, %v273_v36  ;;  %v333_v4 = vld [vmem:[#allocation8 + $0x650] sm:$0xff] }
 0x13e   :  { %4350 = vmatprep.subr.bf16.mxu0 %v4349_v20  ;;  %1127 = vmatprep.mubr.f32.mxu1 %v5749_v40  ;;  %v5806_v40 = vld [vmem:[#allocation2 + $0x20] sm:$0xff]  ;;  %v4369_v21 = vpack.c.bf16 %v266_v14, %v256_v11  ;;  %v364_v11 = vld [vmem:[#allocation8 + $0x748] sm:$0xff]  ;;  %v373_v35 = vld [vmem:[#allocation8 + $0x790] sm:$0xff] }
 0x13f   :  { %1293 = vmatprep.mubr.f32.mxu0 %v5796_v31  ;;  %1128 = vmatmul.mubr.f32.gmra.mrb[14].mxu1 %v5757_v47  ;;  %v224_v47 = vld [vmem:[#allocation8 + $0x2e8] sm:$0xff]  ;;  %v255_v20 = vld [vmem:[#allocation8 + $0x3e0] sm:$0xff]  ;;  %v4325_v17 = vpack.c.bf16 %v364_v11, %v354_v9  ;;  %v445_v9 = vld [vmem:[#allocation8 + $0x9d0] sm:$0xff] }
 0x140   :  { %4288 = vmatpush1.bf16.msra.mxu1 %v4287_v29  ;;  %1294 = vmatmul.mubr.f32.gmra.mrb[14].mxu0 %v5798_v37  ;;  %v4297_v57 = vpack.c.bf16 %v224_v47, %v214_v13  ;;  %v286_v29 = vld [vmem:[#allocation8 + $0x4d8] sm:$0xff]  ;;  %v305_v13 = vld [vmem:[#allocation8 + $0x570] sm:$0xff]  ;;  %v356_v14 = vld [vmem:[#allocation8 + $0x708] sm:$0xff] }
 0x141   :  { %4352 = vmatpush1.bf16.msra.mxu0 %v4351_v33  ;;  %4290 = vmatprep.subr.bf16.mxu1 %v4289_v34  ;;  %v4371_v33 = vpack.c.bf16 %v265_v22, %v255_v20  ;;  %v4309_v34 = vpack.c.bf16 %v284_v24, %v274_v23  ;;  %v4373_v26 = vpack.c.bf16 %v286_v29, %v276_v28  ;;  %v314_v47 = vld [vmem:[#allocation8 + $0x5b8] sm:$0xff]  ;;  %v363_v20 = vld [vmem:[#allocation8 + $0x740] sm:$0xff]  ;;  %v365_v23 = vld [vmem:[#allocation8 + $0x750] sm:$0xff] }
 0x142   :  { %4354 = vmatprep.subr.bf16.mxu0 %v4353_v38  ;;  %1133 = vmatprep.mubr.f32.mxu1 %v5765_v12  ;;  %v225_v12 = vld [vmem:[#allocation8 + $0x2f0] sm:$0xff]  ;;  %v275_v38 = vld [vmem:[#allocation8 + $0x480] sm:$0xff]  ;;  %v4317_v55 = vpack.c.bf16 %v324_v52, %v314_v47  ;;  %v374_v24 = vld [vmem:[#allocation8 + $0x798] sm:$0xff] }
 0x143   :  { %1299 = vmatprep.mubr.f32.mxu0 %v5804_v19  ;;  %1134 = vmatmul.mubr.f32.gmra.mrb[16].mxu1 %v5771_v25  ;;  %v246_v25 = vld [vmem:[#allocation8 + $0x398] sm:$0xff]  ;;  %v4363_v1 = vpack.c.bf16 %v225_v12, %v215_v59  ;;  %v323_v59 = vld [vmem:[#allocation8 + $0x600] sm:$0xff]  ;;  %v384_v28 = vld [vmem:[#allocation8 + $0x7e8] sm:$0xff] }
 0x144   :  { %4292 = vmatpush1.bf16.msra.mxu1 %v4291_v45  ;;  %1300 = vmatmul.mubr.f32.gmra.mrb[16].mxu0 %v5806_v40  ;;  %v4365_v6 = vpack.c.bf16 %v246_v25, %v236_v63  ;;  %v306_v45 = vld [vmem:[#allocation8 + $0x578] sm:$0xff]  ;;  %v344_v63 = vld [vmem:[#allocation8 + $0x6a8] sm:$0xff]  ;;  %v4329_v36 = vpack.c.bf16 %v384_v28, %v374_v24  ;;  %v405_v47 = vld [vmem:[#allocation8 + $0x890] sm:$0xff] }
 0x145   :  { %4356 = vmatpush1.bf16.msra.mxu0 %v4355_v48  ;;  %4294 = vmatprep.subr.bf16.mxu1 %v4293_v41  ;;  %v4375_v48 = vpack.c.bf16 %v285_v39, %v275_v38  ;;  %v4313_v41 = vpack.c.bf16 %v304_v43, %v294_v42  ;;  %v4377_v51 = vpack.c.bf16 %v306_v45, %v296_v44  ;;  %v336_v25 = vld [vmem:[#allocation8 + $0x668] sm:$0xff]  ;;  %v383_v38 = vld [vmem:[#allocation8 + $0x7e0] sm:$0xff]  ;;  %v385_v42 = vld [vmem:[#allocation8 + $0x7f0] sm:$0xff] }
 0x146   :  { %4358 = vmatprep.subr.bf16.mxu0 %v4357_v27  ;;  %1370 = vmatprep.mubr.f32.mxu1 %v5788_v32  ;;  %v295_v27 = vld [vmem:[#allocation8 + $0x520] sm:$0xff]  ;;  %v4321_v3 = vpack.c.bf16 %v344_v63, %v334_v62  ;;  %v376_v29 = vld [vmem:[#allocation8 + $0x7a8] sm:$0xff]  ;;  %v394_v43 = vld [vmem:[#allocation8 + $0x838] sm:$0xff] }
 0x147   :  { %1453 = vmatprep.mubr.f32.mxu0 %v5788_v32  ;;  %v4367_v32 = vpack.c.bf16 %v245_v7, %v235_v5  ;;  %v343_v5 = vld [vmem:[#allocation8 + $0x6a0] sm:$0xff]  ;;  %v404_v44 = vld [vmem:[#allocation8 + $0x888] sm:$0xff]  ;;  %v414_v52 = vld [vmem:[#allocation8 + $0x8d8] sm:$0xff] }
 0x148   :  { %4296 = vmatpush1.bf16.msra.mxu1 %v4295_v54  ;;  %v326_v54 = vld [vmem:[#allocation8 + $0x618] sm:$0xff]  ;;  %v396_v45 = vld [vmem:[#allocation8 + $0x848] sm:$0xff]  ;;  %v425_v62 = vld [vmem:[#allocation8 + $0x930] sm:$0xff] }
 0x149   :  { %4360 = vmatpush1.bf16.msra.mxu0 %v4359_v56  ;;  %4298 = vmatprep.subr.bf16.mxu1 %v4297_v57  ;;  %v4315_v56 = vpack.c.bf16 %v303_v50, %v293_v49  ;;  %v4379_v57 = vpack.c.bf16 %v305_v13, %v295_v27  ;;  %v4381_v12 = vpack.c.bf16 %v326_v54, %v316_v53  ;;  %v393_v50 = vld [vmem:[#allocation8 + $0x830] sm:$0xff]  ;;  %v403_v27 = vld [vmem:[#allocation8 + $0x880] sm:$0xff]  ;;  %v424_v53 = vld [vmem:[#allocation8 + $0x928] sm:$0xff] }
 0x14a   :  { %4362 = vmatprep.subr.bf16.mxu0 %v4361_v60  ;;  %v315_v60 = vld [vmem:[#allocation8 + $0x5c0] sm:$0xff]  ;;  %v4333_v49 = vpack.c.bf16 %v404_v44, %v394_v43  ;;  %v416_v54 = vld [vmem:[#allocation8 + $0x8e8] sm:$0xff]  ;;  %v434_v63 = vld [vmem:[#allocation8 + $0x978] sm:$0xff] }
 0x14b   :  { %v138_v11 = vld [vmem:[#allocation8 + $0x38] sm:$0xff]  ;;  %v149_v24 = vld [vmem:[#allocation8 + $0x90] sm:$0xff] }
 0x14c   :  { %4300 = vmatpush1.bf16.msra.mxu1 %v4299_v0  ;;  %v346_v0 = vld [vmem:[#allocation8 + $0x6b8] sm:$0xff]  ;;  %v169_v43 = vld [vmem:[#allocation8 + $0x130] sm:$0xff] }
 0x14d   :  { %4364 = vmatpush1.bf16.msra.mxu0 %v4363_v1  ;;  %4302 = vmatprep.subr.bf16.mxu1 %v4301_v2  ;;  %v4319_v1 = vpack.c.bf16 %v323_v59, %v313_v58  ;;  %v4383_v2 = vpack.c.bf16 %v325_v61, %v315_v60  ;;  %v4385_v7 = vpack.c.bf16 %v346_v0, %v336_v25  ;;  %v413_v59 = vld [vmem:[#allocation8 + $0x8d0] sm:$0xff]  ;;  %v423_v60 = vld [vmem:[#allocation8 + $0x920] sm:$0xff]  ;;  %v444_v25 = vld [vmem:[#allocation8 + $0x9c8] sm:$0xff] }
 0x14e   :  { %4366 = vmatprep.subr.bf16.mxu0 %v4365_v6  ;;  %v335_v6 = vld [vmem:[#allocation8 + $0x660] sm:$0xff]  ;;  %v4337_v58 = vpack.c.bf16 %v424_v53, %v414_v52  ;;  %v436_v0 = vld [vmem:[#allocation8 + $0x988] sm:$0xff]  ;;  %v158_v28 = vld [vmem:[#allocation8 + $0xd8] sm:$0xff] }
 0x14f   :  { %v178_v44 = vld [vmem:[#allocation8 + $0x178] sm:$0xff]  ;;  %v189_v52 = vld [vmem:[#allocation8 + $0x1d0] sm:$0xff] }
 0x150   :  { %4304 = vmatpush1.bf16.msra.mxu1 %v4303_v15  ;;  %v366_v15 = vld [vmem:[#allocation8 + $0x758] sm:$0xff] }
 0x151   :  { %4368 = vmatpush1.bf16.msra.mxu0 %v4367_v32  ;;  %4306 = vmatprep.subr.bf16.mxu1 %v4305_v16  ;;  %v4323_v32 = vpack.c.bf16 %v343_v5, %v333_v4  ;;  %v4387_v16 = vpack.c.bf16 %v345_v8, %v335_v6  ;;  %v4389_v22 = vpack.c.bf16 %v366_v15, %v356_v14  ;;  %v433_v5 = vld [vmem:[#allocation8 + $0x970] sm:$0xff]  ;;  %v443_v6 = vld [vmem:[#allocation8 + $0x9c0] sm:$0xff]  ;;  %v148_v14 = vld [vmem:[#allocation8 + $0x88] sm:$0xff] }
 0x152   :  { %4370 = vmatprep.subr.bf16.mxu0 %v4369_v21  ;;  %v355_v21 = vld [vmem:[#allocation8 + $0x700] sm:$0xff]  ;;  %v4341_v4 = vpack.c.bf16 %v444_v25, %v434_v63  ;;  %v140_v15 = vld [vmem:[#allocation8 + $0x48] sm:$0xff]  ;;  %v198_v53 = vld [vmem:[#allocation8 + $0x218] sm:$0xff] }
 0x153   :  { %v218_v63 = vld [vmem:[#allocation8 + $0x2b8] sm:$0xff]  ;;  %v228_v25 = vld [vmem:[#allocation8 + $0x308] sm:$0xff] }
 0x154   :  { %4308 = vmatpush1.bf16.msra.mxu1 %v4307_v30  ;;  %v386_v30 = vld [vmem:[#allocation8 + $0x7f8] sm:$0xff] }
 0x155   :  { %4372 = vmatpush1.bf16.msra.mxu0 %v4371_v33  ;;  %4310 = vmatprep.subr.bf16.mxu1 %v4309_v34  ;;  %v4327_v33 = vpack.c.bf16 %v363_v20, %v353_v18  ;;  %v4391_v34 = vpack.c.bf16 %v365_v23, %v355_v21  ;;  %v4393_v39 = vpack.c.bf16 %v386_v30, %v376_v29  ;;  %v137_v20 = vld [vmem:[#allocation8 + $0x30] sm:$0xff]  ;;  %v147_v21 = vld [vmem:[#allocation8 + $0x80] sm:$0xff]  ;;  %v168_v29 = vld [vmem:[#allocation8 + $0x128] sm:$0xff] }
 0x156   :  { %4374 = vmatprep.subr.bf16.mxu0 %v4373_v26  ;;  %v375_v26 = vld [vmem:[#allocation8 + $0x7a0] sm:$0xff]  ;;  %v4409_v18 = vpack.c.bf16 %v148_v14, %v138_v11  ;;  %v160_v30 = vld [vmem:[#allocation8 + $0xe8] sm:$0xff]  ;;  %v250_v14 = vld [vmem:[#allocation8 + $0x3b8] sm:$0xff] }
 0x157   :  { %v5407_v11 = vld [vmem:[#allocation2 + $0x8] sm:$0xff] }
 0x158   :  { %4312 = vmatpush1.bf16.msra.mxu1 %v4311_v46  ;;  %v406_v46 = vld [vmem:[#allocation8 + $0x898] sm:$0xff] }
 0x159   :  { %4376 = vmatpush1.bf16.msra.mxu0 %v4375_v48  ;;  %4314 = vmatprep.subr.bf16.mxu1 %v4313_v41  ;;  %v4331_v48 = vpack.c.bf16 %v383_v38, %v373_v35  ;;  %v4395_v41 = vpack.c.bf16 %v385_v42, %v375_v26  ;;  %v4397_v13 = vpack.c.bf16 %v406_v46, %v396_v45  ;;  %v157_v38 = vld [vmem:[#allocation8 + $0xd0] sm:$0xff]  ;;  %v167_v26 = vld [vmem:[#allocation8 + $0x120] sm:$0xff]  ;;  %v188_v45 = vld [vmem:[#allocation8 + $0x1c8] sm:$0xff] }
 0x15a   :  { %4378 = vmatprep.subr.bf16.mxu0 %v4377_v51  ;;  %v395_v51 = vld [vmem:[#allocation8 + $0x840] sm:$0xff]  ;;  %v4413_v35 = vpack.c.bf16 %v168_v29, %v158_v28  ;;  %v180_v46 = vld [vmem:[#allocation8 + $0x188] sm:$0xff]  ;;  %v270_v28 = vld [vmem:[#allocation8 + $0x458] sm:$0xff] }
 0x15c   :  { %4316 = vmatpush1.bf16.msra.mxu1 %v4315_v56  ;;  %v426_v56 = vld [vmem:[#allocation8 + $0x938] sm:$0xff] }
 0x15d   :  { %4380 = vmatpush1.bf16.msra.mxu0 %v4379_v57  ;;  %4318 = vmatprep.subr.bf16.mxu1 %v4317_v55  ;;  %v4335_v57 = vpack.c.bf16 %v403_v27, %v393_v50  ;;  %v4399_v55 = vpack.c.bf16 %v405_v47, %v395_v51  ;;  %v4401_v61 = vpack.c.bf16 %v426_v56, %v416_v54  ;;  %v177_v27 = vld [vmem:[#allocation8 + $0x170] sm:$0xff]  ;;  %v187_v51 = vld [vmem:[#allocation8 + $0x1c0] sm:$0xff]  ;;  %v208_v54 = vld [vmem:[#allocation8 + $0x268] sm:$0xff] }
 0x15e   :  { %4382 = vmatprep.subr.bf16.mxu0 %v4381_v12  ;;  %v415_v12 = vld [vmem:[#allocation8 + $0x8e0] sm:$0xff]  ;;  %v4417_v50 = vpack.c.bf16 %v188_v45, %v178_v44  ;;  %v200_v56 = vld [vmem:[#allocation8 + $0x228] sm:$0xff]  ;;  %v290_v45 = vld [vmem:[#allocation8 + $0x4f8] sm:$0xff] }
 0x15f   :  { %v280_v44 = vld [vmem:[#allocation8 + $0x4a8] sm:$0xff] }
 0x160   :  { %4320 = vmatpush1.bf16.msra.mxu1 %v4319_v1  ;;  %v446_v1 = vld [vmem:[#allocation8 + $0x9d8] sm:$0xff] }
 0x161   :  { %4384 = vmatpush1.bf16.msra.mxu0 %v4383_v2  ;;  %4322 = vmatprep.subr.bf16.mxu1 %v4321_v3  ;;  %v4339_v2 = vpack.c.bf16 %v423_v60, %v413_v59  ;;  %v4403_v3 = vpack.c.bf16 %v425_v62, %v415_v12  ;;  %v4405_v8 = vpack.c.bf16 %v446_v1, %v436_v0  ;;  %v197_v59 = vld [vmem:[#allocation8 + $0x210] sm:$0xff]  ;;  %v207_v60 = vld [vmem:[#allocation8 + $0x260] sm:$0xff]  ;;  %v230_v0 = vld [vmem:[#allocation8 + $0x318] sm:$0xff] }
 0x162   :  { %4386 = vmatprep.subr.bf16.mxu0 %v4385_v7  ;;  %v435_v7 = vld [vmem:[#allocation8 + $0x980] sm:$0xff]  ;;  %v209_v62 = vld [vmem:[#allocation8 + $0x270] sm:$0xff] }
 0x163   :  { %v199_v12 = vld [vmem:[#allocation8 + $0x220] sm:$0xff] }
 0x164   :  { %4324 = vmatpush1.bf16.msra.mxu1 %v4323_v32  ;;  %v150_v32 = vld [vmem:[#allocation8 + $0x98] sm:$0xff]  ;;  %v4487_v1 = vpack.c.bf16 %v209_v62, %v199_v12 }
 0x165   :  { %4388 = vmatpush1.bf16.msra.mxu0 %v4387_v16  ;;  %4326 = vmatprep.subr.bf16.mxu1 %v4325_v17  ;;  %v4343_v16 = vpack.c.bf16 %v443_v6, %v433_v5  ;;  %v4407_v17 = vpack.c.bf16 %v445_v9, %v435_v7  ;;  %v4473_v23 = vpack.c.bf16 %v150_v32, %v140_v15  ;;  %v219_v5 = vld [vmem:[#allocation8 + $0x2c0] sm:$0xff]  ;;  %v229_v7 = vld [vmem:[#allocation8 + $0x310] sm:$0xff]  ;;  %v248_v9 = vld [vmem:[#allocation8 + $0x3a8] sm:$0xff] }
 0x166   :  { %4390 = vmatprep.subr.bf16.mxu0 %v4389_v22  ;;  %v139_v22 = vld [vmem:[#allocation8 + $0x40] sm:$0xff]  ;;  %v318_v62 = vld [vmem:[#allocation8 + $0x5d8] sm:$0xff] }
 0x168   :  { %4328 = vmatpush1.bf16.msra.mxu1 %v4327_v33  ;;  %v170_v33 = vld [vmem:[#allocation8 + $0x138] sm:$0xff] }
 0x169   :  { %4392 = vmatpush1.bf16.msra.mxu0 %v4391_v34  ;;  %4330 = vmatprep.subr.bf16.mxu1 %v4329_v36  ;;  %v4411_v34 = vpack.c.bf16 %v147_v21, %v137_v20  ;;  %v4475_v36 = vpack.c.bf16 %v149_v24, %v139_v22  ;;  %v4477_v42 = vpack.c.bf16 %v170_v33, %v160_v30  ;;  %v249_v21 = vld [vmem:[#allocation8 + $0x3b0] sm:$0xff]  ;;  %v258_v22 = vld [vmem:[#allocation8 + $0x3f8] sm:$0xff]  ;;  %v260_v24 = vld [vmem:[#allocation8 + $0x408] sm:$0xff] }
 0x16a   :  { %4394 = vmatprep.subr.bf16.mxu0 %v4393_v39  ;;  %v159_v39 = vld [vmem:[#allocation8 + $0xe0] sm:$0xff] }
 0x16c   :  { %4332 = vmatpush1.bf16.msra.mxu1 %v4331_v48  ;;  %v190_v48 = vld [vmem:[#allocation8 + $0x1d8] sm:$0xff] }
 0x16d   :  { %4396 = vmatpush1.bf16.msra.mxu0 %v4395_v41  ;;  %4334 = vmatprep.subr.bf16.mxu1 %v4333_v49  ;;  %v4415_v41 = vpack.c.bf16 %v167_v26, %v157_v38  ;;  %v4479_v49 = vpack.c.bf16 %v169_v43, %v159_v39  ;;  %v4481_v47 = vpack.c.bf16 %v190_v48, %v180_v46  ;;  %v269_v26 = vld [vmem:[#allocation8 + $0x450] sm:$0xff]  ;;  %v278_v39 = vld [vmem:[#allocation8 + $0x498] sm:$0xff] }
 0x16e   :  { %4398 = vmatprep.subr.bf16.mxu0 %v4397_v13  ;;  %v179_v13 = vld [vmem:[#allocation8 + $0x180] sm:$0xff]  ;;  %v4497_v38 = vpack.c.bf16 %v270_v28, %v260_v24 }
 0x170   :  { %4336 = vmatpush1.bf16.msra.mxu1 %v4335_v57  ;;  %v210_v57 = vld [vmem:[#allocation8 + $0x278] sm:$0xff] }
 0x171   :  { %4400 = vmatpush1.bf16.msra.mxu0 %v4399_v55  ;;  %4338 = vmatprep.subr.bf16.mxu1 %v4337_v58  ;;  %v4483_v55 = vpack.c.bf16 %v189_v52, %v179_v13  ;;  %v4421_v58 = vpack.c.bf16 %v208_v54, %v198_v53  ;;  %v4501_v13 = vpack.c.bf16 %v290_v45, %v280_v44  ;;  %v298_v52 = vld [vmem:[#allocation8 + $0x538] sm:$0xff]  ;;  %v308_v53 = vld [vmem:[#allocation8 + $0x588] sm:$0xff] }
 0x172   :  { %4402 = vmatprep.subr.bf16.mxu0 %v4401_v61  ;;  %v4485_v61 = vpack.c.bf16 %v210_v57, %v200_v56  ;;  %v300_v54 = vld [vmem:[#allocation8 + $0x548] sm:$0xff]  ;;  %v310_v56 = vld [vmem:[#allocation8 + $0x598] sm:$0xff] }
 0x173   :  { %v4505_v12 = vpack.c.bf16 %v310_v56, %v300_v54  ;;  %v400_v54 = vld [vmem:[#allocation8 + $0x868] sm:$0xff]  ;;  %v410_v56 = vld [vmem:[#allocation8 + $0x8b8] sm:$0xff] }
 0x174   :  { %4340 = vmatpush1.bf16.msra.mxu1 %v4339_v2  ;;  %v4425_v2 = vpack.c.bf16 %v228_v25, %v218_v63  ;;  %v328_v63 = vld [vmem:[#allocation8 + $0x628] sm:$0xff] }
 0x175   :  { %4404 = vmatpush1.bf16.msra.mxu0 %v4403_v3  ;;  %4342 = vmatprep.subr.bf16.mxu1 %v4341_v4  ;;  %v217_v3 = vld [vmem:[#allocation8 + $0x2b0] sm:$0xff]  ;;  %v227_v4 = vld [vmem:[#allocation8 + $0x300] sm:$0xff]  ;;  %v320_v25 = vld [vmem:[#allocation8 + $0x5e8] sm:$0xff] }
 0x176   :  { %4406 = vmatprep.subr.bf16.mxu0 %v4405_v8  ;;  %v238_v8 = vld [vmem:[#allocation8 + $0x358] sm:$0xff]  ;;  %v4427_v15 = vpack.c.bf16 %v227_v4, %v217_v3  ;;  %v327_v3 = vld [vmem:[#allocation8 + $0x620] sm:$0xff] }
 0x177   :  { %v4429_v32 = vpack.c.bf16 %v248_v9, %v238_v8  ;;  %v319_v4 = vld [vmem:[#allocation8 + $0x5e0] sm:$0xff]  ;;  %v348_v8 = vld [vmem:[#allocation8 + $0x6c8] sm:$0xff] }
 0x178   :  { %4344 = vmatpush1.bf16.msra.mxu1 %v4343_v16  ;;  %v237_v16 = vld [vmem:[#allocation8 + $0x350] sm:$0xff]  ;;  %v340_v9 = vld [vmem:[#allocation8 + $0x688] sm:$0xff] }
 0x179   :  { %4408 = vmatpush1.bf16.msra.mxu0 %v4407_v17  ;;  %4410 = vmatprep.subr.bf16.mxu1 %v4409_v18  ;;  %v247_v17 = vld [vmem:[#allocation8 + $0x3a0] sm:$0xff] }
 0x17a   :  { %4474 = vmatprep.subr.bf16.mxu0 %v4473_v23  ;;  %v239_v18 = vld [vmem:[#allocation8 + $0x360] sm:$0xff]  ;;  %v268_v23 = vld [vmem:[#allocation8 + $0x448] sm:$0xff]  ;;  %v4431_v29 = vpack.c.bf16 %v247_v17, %v237_v16 }
 0x17b   :  { %1371 = vmatmul.mubr.f32.vlgmr.msra.gmra.mrb[6].mxu1 %v5792_v10  ;;  %v4495_v30 = vpack.c.bf16 %v249_v21, %v239_v18  ;;  %v4433_v33 = vpack.c.bf16 %v268_v23, %v258_v22  ;;  %v339_v16 = vld [vmem:[#allocation8 + $0x680] sm:$0xff]  ;;  %v349_v18 = vld [vmem:[#allocation8 + $0x6d0] sm:$0xff]  ;;  %v368_v21 = vld [vmem:[#allocation8 + $0x768] sm:$0xff] }
 0x17c   :  { %1454 = vmatmul.mubr.f32.vlgmr.msra.gmra.mrb[0].mxu0 %v5792_v10  ;;  %4412 = vmatpush1.bf16.msra.mxu1 %v4411_v34  ;;  %v4419_v10 = vpack.c.bf16 %v187_v51, %v177_v27  ;;  %v257_v34 = vld [vmem:[#allocation8 + $0x3f0] sm:$0xff]  ;;  %v287_v27 = vld [vmem:[#allocation8 + $0x4e0] sm:$0xff]  ;;  %v360_v22 = vld [vmem:[#allocation8 + $0x728] sm:$0xff]  ;;  %v4515_v28 = vpack.c.bf16 %v349_v18, %v339_v16 }
 0x17d   :  { %4476 = vmatpush1.bf16.msra.mxu0 %v4475_v36  ;;  %4414 = vmatprep.subr.bf16.mxu1 %v4413_v35  ;;  %v267_v36 = vld [vmem:[#allocation8 + $0x440] sm:$0xff]  ;;  %v370_v23 = vld [vmem:[#allocation8 + $0x778] sm:$0xff]  ;;  %v437_v16 = vld [vmem:[#allocation8 + $0x990] sm:$0xff] }
 0x17e   :  { %4478 = vmatprep.subr.bf16.mxu0 %v4477_v42  ;;  %1376 = vmatprep.mubr.f32.mxu1 %v5796_v31  ;;  %v259_v35 = vld [vmem:[#allocation8 + $0x400] sm:$0xff]  ;;  %v288_v42 = vld [vmem:[#allocation8 + $0x4e8] sm:$0xff]  ;;  %v4435_v48 = vpack.c.bf16 %v267_v36, %v257_v34  ;;  %v4517_v36 = vpack.c.bf16 %v370_v23, %v360_v22  ;;  %v1645_v22 = vld [vmem:[#allocation8 + $0x1418] sm:$0xff] }
 0x17f   :  { %1459 = vmatprep.mubr.f32.mxu0 %v5796_v31  ;;  %1377 = vmatmul.mubr.f32.gmra.mrb[8].mxu1 %v5798_v37  ;;  %v220_v31 = vld [vmem:[#allocation8 + $0x2c8] sm:$0xff]  ;;  %v279_v51 = vld [vmem:[#allocation8 + $0x4a0] sm:$0xff] }
 0x180   :  { %4416 = vmatpush1.bf16.msra.mxu1 %v4415_v41  ;;  %1460 = vmatmul.mubr.f32.gmra.mrb[2].mxu0 %v5798_v37  ;;  %v4423_v37 = vpack.c.bf16 %v207_v60, %v197_v59  ;;  %v4489_v6 = vpack.c.bf16 %v230_v0, %v220_v31  ;;  %v4499_v41 = vpack.c.bf16 %v269_v26, %v259_v35  ;;  %v307_v59 = vld [vmem:[#allocation8 + $0x580] sm:$0xff]  ;;  %v330_v31 = vld [vmem:[#allocation8 + $0x638] sm:$0xff]  ;;  %v369_v35 = vld [vmem:[#allocation8 + $0x770] sm:$0xff] }
 0x181   :  { %4480 = vmatpush1.bf16.msra.mxu0 %v4479_v49  ;;  %4418 = vmatprep.subr.bf16.mxu1 %v4417_v50  ;;  %v4437_v49 = vpack.c.bf16 %v288_v42, %v278_v39  ;;  %v277_v50 = vld [vmem:[#allocation8 + $0x490] sm:$0xff]  ;;  %v299_v60 = vld [vmem:[#allocation8 + $0x540] sm:$0xff]  ;;  %v388_v26 = vld [vmem:[#allocation8 + $0x808] sm:$0xff] }
 0x182   :  { %4482 = vmatprep.subr.bf16.mxu0 %v4481_v47  ;;  %1382 = vmatprep.mubr.f32.mxu1 %v5804_v19  ;;  %v289_v47 = vld [vmem:[#allocation8 + $0x4f0] sm:$0xff]  ;;  %v4439_v57 = vpack.c.bf16 %v287_v27, %v277_v50  ;;  %v359_v34 = vld [vmem:[#allocation8 + $0x720] sm:$0xff]  ;;  %v380_v39 = vld [vmem:[#allocation8 + $0x7c8] sm:$0xff] }
 0x183   :  { %1465 = vmatprep.mubr.f32.mxu0 %v5804_v19  ;;  %1383 = vmatmul.mubr.f32.gmra.mrb[10].mxu1 %v5806_v40  ;;  %v240_v19 = vld [vmem:[#allocation8 + $0x368] sm:$0xff]  ;;  %v390_v42 = vld [vmem:[#allocation8 + $0x818] sm:$0xff]  ;;  %v4519_v45 = vpack.c.bf16 %v369_v35, %v359_v34  ;;  %v379_v50 = vld [vmem:[#allocation8 + $0x7c0] sm:$0xff] }
 0x184   :  { %4420 = vmatpush1.bf16.msra.mxu1 %v4419_v10  ;;  %1466 = vmatmul.mubr.f32.gmra.mrb[4].mxu0 %v5806_v40  ;;  %v4491_v40 = vpack.c.bf16 %v229_v7, %v219_v5  ;;  %v4493_v20 = vpack.c.bf16 %v250_v14, %v240_v19  ;;  %v4503_v10 = vpack.c.bf16 %v289_v47, %v279_v51  ;;  %v338_v7 = vld [vmem:[#allocation8 + $0x678] sm:$0xff]  ;;  %v439_v18 = vld [vmem:[#allocation8 + $0x9a0] sm:$0xff]  ;;  %v1655_v23 = vld [vmem:[#allocation8 + $0x1468] sm:$0xff] }
 0x185   :  { %4484 = vmatpush1.bf16.msra.mxu0 %v4483_v55  ;;  %4422 = vmatprep.subr.bf16.mxu1 %v4421_v58  ;;  %v4441_v55 = vpack.c.bf16 %v308_v53, %v298_v52  ;;  %v297_v58 = vld [vmem:[#allocation8 + $0x530] sm:$0xff]  ;;  %v4509_v5 = vpack.c.bf16 %v330_v31, %v320_v25  ;;  %v4521_v51 = vpack.c.bf16 %v390_v42, %v380_v39  ;;  %v398_v47 = vld [vmem:[#allocation8 + $0x858] sm:$0xff]  ;;  %v408_v52 = vld [vmem:[#allocation8 + $0x8a8] sm:$0xff] }
 0x186   :  { %4486 = vmatprep.subr.bf16.mxu0 %v4485_v61  ;;  %1536 = vmatprep.mubr.f32.mxu1 %v5407_v11  ;;  %v309_v61 = vld [vmem:[#allocation8 + $0x590] sm:$0xff]  ;;  %v4443_v0 = vpack.c.bf16 %v307_v59, %v297_v58  ;;  %v407_v59 = vld [vmem:[#allocation8 + $0x8a0] sm:$0xff]  ;;  %v420_v25 = vld [vmem:[#allocation8 + $0x908] sm:$0xff] }
 0x187   :  { %1619 = vmatprep.mubr.f32.mxu0 %v5407_v11  ;;  %v350_v11 = vld [vmem:[#allocation8 + $0x6d8] sm:$0xff]  ;;  %v397_v58 = vld [vmem:[#allocation8 + $0x850] sm:$0xff]  ;;  %v1642_v34 = vld [vmem:[#allocation8 + $0x1400] sm:$0xff] }
 0x188   :  { %4424 = vmatpush1.bf16.msra.mxu1 %v4423_v37  ;;  %v4507_v37 = vpack.c.bf16 %v309_v61, %v299_v60  ;;  %v4513_v17 = vpack.c.bf16 %v350_v11, %v340_v9  ;;  %v399_v60 = vld [vmem:[#allocation8 + $0x860] sm:$0xff]  ;;  %v409_v61 = vld [vmem:[#allocation8 + $0x8b0] sm:$0xff]  ;;  %v430_v31 = vld [vmem:[#allocation8 + $0x958] sm:$0xff] }
 0x189   :  { %4488 = vmatpush1.bf16.msra.mxu0 %v4487_v1  ;;  %4426 = vmatprep.subr.bf16.mxu1 %v4425_v2  ;;  %v4445_v1 = vpack.c.bf16 %v328_v63, %v318_v62  ;;  %v317_v2 = vld [vmem:[#allocation8 + $0x5d0] sm:$0xff]  ;;  %v418_v62 = vld [vmem:[#allocation8 + $0x8f8] sm:$0xff]  ;;  %v428_v63 = vld [vmem:[#allocation8 + $0x948] sm:$0xff] }
 0x18a   :  { %4490 = vmatprep.subr.bf16.mxu0 %v4489_v6  ;;  %v329_v6 = vld [vmem:[#allocation8 + $0x630] sm:$0xff]  ;;  %v4447_v19 = vpack.c.bf16 %v327_v3, %v317_v2  ;;  %v427_v3 = vld [vmem:[#allocation8 + $0x940] sm:$0xff]  ;;  %v440_v11 = vld [vmem:[#allocation8 + $0x9a8] sm:$0xff] }
 0x18b   :  { %v4511_v14 = vpack.c.bf16 %v329_v6, %v319_v4  ;;  %v417_v2 = vld [vmem:[#allocation8 + $0x8f0] sm:$0xff]  ;;  %v419_v4 = vld [vmem:[#allocation8 + $0x900] sm:$0xff]  ;;  %v1665_v39 = vld [vmem:[#allocation8 + $0x14b8] sm:$0xff] }
 0x18c   :  { %4428 = vmatpush1.bf16.msra.mxu1 %v4427_v15  ;;  %v4449_v15 = vpack.c.bf16 %v348_v8, %v338_v7  ;;  %v429_v6 = vld [vmem:[#allocation8 + $0x950] sm:$0xff]  ;;  %v438_v7 = vld [vmem:[#allocation8 + $0x998] sm:$0xff]  ;;  %v448_v8 = vld [vmem:[#allocation8 + $0x9e8] sm:$0xff] }
 0x18d   :  { %4492 = vmatpush1.bf16.msra.mxu0 %v4491_v40  ;;  %4430 = vmatprep.subr.bf16.mxu1 %v4429_v32  ;;  %v337_v40 = vld [vmem:[#allocation8 + $0x670] sm:$0xff]  ;;  %v347_v32 = vld [vmem:[#allocation8 + $0x6c0] sm:$0xff]  ;;  %v1675_v42 = vld [vmem:[#allocation8 + $0x1508] sm:$0xff] }
 0x18e   :  { %4494 = vmatprep.subr.bf16.mxu0 %v4493_v20  ;;  %v5824_v43 = vpop.f32.mrb[0].mxu1  ;;  %v358_v20 = vld [vmem:[#allocation8 + $0x718] sm:$0xff]  ;;  %v4451_v24 = vpack.c.bf16 %v347_v32, %v337_v40  ;;  %v4531_v40 = vpack.c.bf16 %v429_v6, %v419_v4  ;;  %v4469_v32 = vpack.c.bf16 %v448_v8, %v438_v7  ;;  %v1654_v35 = vld [vmem:[#allocation8 + $0x1460] sm:$0xff]  ;;  %v5410_v4 = vld [vmem:[#allocation2 + $0x10] sm:$0xff] }
 0x18f   :  { %v5826_v46 = vpop.f32.mrb[1].mxu1  ;;  %v5836_v6 = vld [vmem:[#allocation2 + $0x18] sm:$0xff] }
 0x190   :  { %4432 = vmatpush1.bf16.msra.mxu1 %v4431_v29  ;;  %v4453_v29 = vpack.c.bf16 %v368_v21, %v358_v20  ;;  %v449_v21 = vld [vmem:[#allocation8 + $0x9f0] sm:$0xff]  ;;  %v1971_v7 = vrot.slane %v5836_v6, 2 }
 0x191   :  { %4496 = vmatpush1.bf16.msra.mxu0 %v4495_v30  ;;  %4434 = vmatprep.subr.bf16.mxu1 %v4433_v33  ;;  %v357_v30 = vld [vmem:[#allocation8 + $0x710] sm:$0xff]  ;;  %v367_v33 = vld [vmem:[#allocation8 + $0x760] sm:$0xff] }
 0x192   :  { %4498 = vmatprep.subr.bf16.mxu0 %v4497_v38  ;;  %v378_v38 = vld [vmem:[#allocation8 + $0x7b8] sm:$0xff]  ;;  %v4455_v44 = vpack.c.bf16 %v367_v33, %v357_v30  ;;  %v4535_v30 = vpack.c.bf16 %v449_v21, %v439_v18  ;;  %v4601_v33 = vpack.c.bf16 %v1655_v23, %v1645_v22  ;;  %v5412_v21 = vld [vmem:[#allocation2 + $0x28] sm:$0xff] }
 0x193   :  { %v1725_v18 = vld [vmem:[#allocation8 + $0x1698] sm:$0xff]  ;;  %v1723_v22 = vld [vmem:[#allocation8 + $0x1688] sm:$0xff] }
 0x194   :  { %4436 = vmatpush1.bf16.msra.mxu1 %v4435_v48  ;;  %v4457_v48 = vpack.c.bf16 %v388_v26, %v378_v38  ;;  %v1652_v26 = vld [vmem:[#allocation8 + $0x1450] sm:$0xff]  ;;  %v1733_v23 = vld [vmem:[#allocation8 + $0x16d8] sm:$0xff] }
 0x195   :  { %4500 = vmatpush1.bf16.msra.mxu0 %v4499_v41  ;;  %4438 = vmatprep.subr.bf16.mxu1 %v4437_v49  ;;  %v377_v41 = vld [vmem:[#allocation8 + $0x7b0] sm:$0xff]  ;;  %v387_v49 = vld [vmem:[#allocation8 + $0x800] sm:$0xff] }
 0x196   :  { %4502 = vmatprep.subr.bf16.mxu0 %v4501_v13  ;;  %v5828_v27 = vpop.f32.mrb[2].mxu1  ;;  %v389_v13 = vld [vmem:[#allocation8 + $0x810] sm:$0xff] }
 0x197   :  { %v5830_v53 = vpop.f32.mrb[3].mxu1 }
 0x198   :  { %4440 = vmatpush1.bf16.msra.mxu1 %v4439_v57  ;;  %v4459_v57 = vpack.c.bf16 %v387_v49, %v377_v41  ;;  %v4539_v41 = vpack.c.bf16 %v1652_v26, %v1642_v34  ;;  %v4605_v49 = vpack.c.bf16 %v1675_v42, %v1665_v39  ;;  %v1722_v34 = vld [vmem:[#allocation8 + $0x1680] sm:$0xff]  ;;  %v1732_v26 = vld [vmem:[#allocation8 + $0x16d0] sm:$0xff]  ;;  %v1745_v39 = vld [vmem:[#allocation8 + $0x1738] sm:$0xff] }
 0x199   :  { %4504 = vmatpush1.bf16.msra.mxu0 %v4503_v10  ;;  %4442 = vmatprep.subr.bf16.mxu1 %v4441_v55  ;;  %v4523_v10 = vpack.c.bf16 %v389_v13, %v379_v50  ;;  %v4461_v55 = vpack.c.bf16 %v408_v52, %v398_v47  ;;  %v1662_v50 = vld [vmem:[#allocation8 + $0x14a0] sm:$0xff]  ;;  %v1672_v52 = vld [vmem:[#allocation8 + $0x14f0] sm:$0xff]  ;;  %v1755_v42 = vld [vmem:[#allocation8 + $0x1788] sm:$0xff] }
 0x19a   :  { %4506 = vmatprep.subr.bf16.mxu0 %v4505_v12  ;;  %v4525_v12 = vpack.c.bf16 %v410_v56, %v400_v54  ;;  %v1674_v13 = vld [vmem:[#allocation8 + $0x1500] sm:$0xff]  ;;  %v1685_v54 = vld [vmem:[#allocation8 + $0x1558] sm:$0xff]  ;;  %v1695_v56 = vld [vmem:[#allocation8 + $0x15a8] sm:$0xff] }
 0x19c   :  { %4444 = vmatpush1.bf16.msra.mxu1 %v4443_v0  ;;  %v4463_v0 = vpack.c.bf16 %v407_v59, %v397_v58  ;;  %v1639_v59 = vld [vmem:[#allocation2 + $0x8] sm:$0xfc] }
 0x19d   :  { %4508 = vmatpush1.bf16.msra.mxu0 %v4507_v37  ;;  %4446 = vmatprep.subr.bf16.mxu1 %v4445_v1  ;;  %v4527_v37 = vpack.c.bf16 %v409_v61, %v399_v60  ;;  %v4465_v1 = vpack.c.bf16 %v428_v63, %v418_v62  ;;  %v4543_v60 = vpack.c.bf16 %v1672_v52, %v1662_v50  ;;  %v1682_v61 = vld [vmem:[#allocation8 + $0x1540] sm:$0xff]  ;;  %v1684_v62 = vld [vmem:[#allocation8 + $0x1550] sm:$0xff] }
 0x19e   :  { %4510 = vmatprep.subr.bf16.mxu0 %v4509_v5  ;;  %v4529_v5 = vpack.c.bf16 %v430_v31, %v420_v25  ;;  %v1694_v63 = vld [vmem:[#allocation8 + $0x15a0] sm:$0xff]  ;;  %v1692_v31 = vld [vmem:[#allocation8 + $0x1590] sm:$0xff] }
 0x19f   :  { %v4611_v8 = vpack.c.bf16 %v1694_v63, %v1684_v62  ;;  %v1742_v50 = vld [vmem:[#allocation8 + $0x1720] sm:$0xff]  ;;  %v1752_v52 = vld [vmem:[#allocation8 + $0x1770] sm:$0xff] }
 0x1a0   :  { %4448 = vmatpush1.bf16.msra.mxu1 %v4447_v19  ;;  %v450_v19 = vld [vmem:[#allocation8 + $0x9f8] sm:$0xff]  ;;  %v1772_v63 = vld [vmem:[#allocation8 + $0x1810] sm:$0xff] }
 0x1a1   :  { %4512 = vmatpush1.bf16.msra.mxu0 %v4511_v14  ;;  %4450 = vmatprep.subr.bf16.mxu1 %v4449_v15  ;;  %v4467_v15 = vpack.c.bf16 %v427_v3, %v417_v2  ;;  %v4533_v20 = vpack.c.bf16 %v450_v19, %v440_v11  ;;  %v1703_v2 = vld [vmem:[#allocation8 + $0x15e8] sm:$0xff]  ;;  %v1713_v3 = vld [vmem:[#allocation8 + $0x1638] sm:$0xff]  ;;  %v4547_v11 = vpack.c.bf16 %v1692_v31, %v1682_v61  ;;  %v1774_v61 = vld [vmem:[#allocation8 + $0x1820] sm:$0xff] }
 0x1a2   :  { %4514 = vmatprep.subr.bf16.mxu0 %v4513_v17  ;;  %v5832_v9 = vpop.f32.mrb[4].mxu1  ;;  %v447_v17 = vld [vmem:[#allocation8 + $0x9e0] sm:$0xff]  ;;  %v1795_v31 = vld [vmem:[#allocation8 + $0x18c8] sm:$0xff] }
 0x1a3   :  { %v5834_v14 = vpop.f32.mrb[5].mxu1 }
 0x1a4   :  { %4452 = vmatpush1.bf16.msra.mxu1 %v4451_v24  ;;  %v1643_v24 = vld [vmem:[#allocation8 + $0x1408] sm:$0xff] }
 0x1a5   :  { %4516 = vmatpush1.bf16.msra.mxu0 %v4515_v28  ;;  %4454 = vmatprep.subr.bf16.mxu1 %v4453_v29  ;;  %v1653_v28 = vld [vmem:[#allocation8 + $0x1458] sm:$0xff]  ;;  %v4471_v29 = vpack.c.bf16 %v447_v17, %v437_v16  ;;  %v4549_v16 = vpack.c.bf16 %v1713_v3, %v1703_v2  ;;  %v1712_v17 = vld [vmem:[#allocation8 + $0x1630] sm:$0xff] }
 0x1a6   :  { %4518 = vmatprep.subr.bf16.mxu0 %v4517_v36  ;;  %v1644_v36 = vld [vmem:[#allocation8 + $0x1410] sm:$0xff]  ;;  %v4537_v38 = vpack.c.bf16 %v1653_v28, %v1643_v24  ;;  %v5413_v24 = vld [vmem:[#allocation2 + $0x20] sm:$0xff] }
 0x1a8   :  { %4456 = vmatpush1.bf16.msra.mxu1 %v4455_v44  ;;  %v1663_v44 = vld [vmem:[#allocation8 + $0x14a8] sm:$0xff] }
 0x1a9   :  { %4520 = vmatpush1.bf16.msra.mxu0 %v4519_v45  ;;  %4458 = vmatprep.subr.bf16.mxu1 %v4457_v48  ;;  %v1673_v45 = vld [vmem:[#allocation8 + $0x14f8] sm:$0xff]  ;;  %v4603_v48 = vpack.c.bf16 %v1654_v35, %v1644_v36  ;;  %v1724_v36 = vld [vmem:[#allocation8 + $0x1690] sm:$0xff]  ;;  %v1734_v35 = vld [vmem:[#allocation8 + $0x16e0] sm:$0xff] }
 0x1aa   :  { %4522 = vmatprep.subr.bf16.mxu0 %v4521_v51  ;;  %v1664_v51 = vld [vmem:[#allocation8 + $0x14b0] sm:$0xff]  ;;  %v4541_v47 = vpack.c.bf16 %v1673_v45, %v1663_v44  ;;  %v1743_v44 = vld [vmem:[#allocation8 + $0x1728] sm:$0xff]  ;;  %v1753_v45 = vld [vmem:[#allocation8 + $0x1778] sm:$0xff] }
 0x1ab   :  { %v4607_v58 = vpack.c.bf16 %v1674_v13, %v1664_v51  ;;  %v1744_v51 = vld [vmem:[#allocation8 + $0x1730] sm:$0xff]  ;;  %v1754_v13 = vld [vmem:[#allocation8 + $0x1780] sm:$0xff] }
 0x1ac   :  { %4460 = vmatpush1.bf16.msra.mxu1 %v4459_v57  ;;  %v5408_v57 = vld [vmem:[#allocation2] sm:$0xff] }
 0x1ad   :  { %4524 = vmatpush1.bf16.msra.mxu0 %v4523_v10  ;;  %4462 = vmatprep.subr.bf16.mxu1 %v4461_v55  ;;  %v1683_v10 = vld [vmem:[#allocation8 + $0x1548] sm:$0xff]  ;;  %v1693_v55 = vld [vmem:[#allocation8 + $0x1598] sm:$0xff] }
 0x1ae   :  { %4526 = vmatprep.subr.bf16.mxu0 %v4525_v12  ;;  %v4609_v12 = vpack.c.bf16 %v1695_v56, %v1685_v54  ;;  %v4545_v25 = vpack.c.bf16 %v1693_v55, %v1683_v10  ;;  %v1765_v54 = vld [vmem:[#allocation8 + $0x17d8] sm:$0xff]  ;;  %v1775_v56 = vld [vmem:[#allocation8 + $0x1828] sm:$0xff]  ;;  %v4623_v55 = vpack.c.bf16 %v1754_v13, %v1744_v51 }
 0x1af   :  { %v1773_v10 = vld [vmem:[#allocation8 + $0x1818] sm:$0xff] }
 0x1b0   :  { %4464 = vmatpush1.bf16.msra.mxu1 %v4463_v0  ;;  %v1705_v0 = vld [vmem:[#allocation8 + $0x15f8] sm:$0xff] }
 0x1b1   :  { %4528 = vmatpush1.bf16.msra.mxu0 %v4527_v37  ;;  %4466 = vmatprep.subr.bf16.mxu1 %v4465_v1  ;;  %v1715_v37 = vld [vmem:[#allocation8 + $0x1648] sm:$0xff]  ;;  %v5409_v1 = vld [vmem:[#allocation2 + $0x18] sm:$0xff] }
 0x1b2   :  { %4530 = vmatprep.subr.bf16.mxu0 %v4529_v5  ;;  %v1970_v5 = vrot.slane %v1639_v59, 2  ;;  %v4613_v19 = vpack.c.bf16 %v1715_v37, %v1705_v0  ;;  %v4625_v59 = vpack.c.bf16 %v1775_v56, %v1765_v54  ;;  %v1783_v0 = vld [vmem:[#allocation8 + $0x1868] sm:$0xff]  ;;  %v1793_v37 = vld [vmem:[#allocation8 + $0x18b8] sm:$0xff]  ;;  %v1842_v54 = vld [vmem:[#allocation8 + $0x1a40] sm:$0xff] }
 0x1b3   :  { %v1853_v51 = vld [vmem:[#allocation8 + $0x1a98] sm:$0xff]  ;;  %v1844_v56 = vld [vmem:[#allocation8 + $0x1a50] sm:$0xff] }
 0x1b4   :  { %4468 = vmatpush1.bf16.msra.mxu1 %v4467_v15  ;;  %v1702_v15 = vld [vmem:[#allocation8 + $0x15e0] sm:$0xff]  ;;  %v5842_v28 = vsel %vm1966_vm1, %v1970_v5, %v1971_v7  ;;  %v1784_v5 = vld [vmem:[#allocation8 + $0x1870] sm:$0xff] }
 0x1b5   :  { %4532 = vmatpush1.bf16.msra.mxu0 %v4531_v40  ;;  %4470 = vmatprep.subr.bf16.mxu1 %v4469_v32  ;;  %v1704_v40 = vld [vmem:[#allocation8 + $0x15f0] sm:$0xff]  ;;  %v1714_v32 = vld [vmem:[#allocation8 + $0x1640] sm:$0xff] }
 0x1b6   :  { %4534 = vmatprep.subr.bf16.mxu0 %v4533_v20  ;;  %v1735_v20 = vld [vmem:[#allocation8 + $0x16e8] sm:$0xff] }
 0x1b8   :  { %4472 = vmatpush1.bf16.msra.mxu1 %v4471_v29  ;;  %v4615_v29 = vpack.c.bf16 %v1714_v32, %v1704_v40  ;;  %v1815_v40 = vld [vmem:[#allocation8 + $0x1968] sm:$0xff] }
 0x1b9   :  { %4536 = vmatpush1.bf16.msra.mxu0 %v4535_v30  ;;  %4602 = vmatprep.subr.bf16.mxu1 %v4601_v33  ;;  %v4551_v30 = vpack.c.bf16 %v1712_v17, %v1702_v15  ;;  %v4617_v33 = vpack.c.bf16 %v1735_v20, %v1725_v18  ;;  %v1805_v15 = vld [vmem:[#allocation8 + $0x1918] sm:$0xff]  ;;  %v1803_v32 = vld [vmem:[#allocation8 + $0x1908] sm:$0xff] }
 0x1ba   :  { %4538 = vmatprep.subr.bf16.mxu0 %v4537_v38  ;;  %v4553_v38 = vpack.c.bf16 %v1733_v23, %v1723_v22  ;;  %v4633_v20 = vpack.c.bf16 %v1815_v40, %v1805_v15  ;;  %v1804_v22 = vld [vmem:[#allocation8 + $0x1910] sm:$0xff]  ;;  %v1814_v23 = vld [vmem:[#allocation8 + $0x1960] sm:$0xff] }
 0x1bb   :  { %1537 = vmatmul.mubr.f32.vlgmr.msra.gmra.mrb[12].mxu1 %v5408_v57  ;;  %v1882_v15 = vld [vmem:[#allocation8 + $0x1b80] sm:$0xff]  ;;  %v1884_v40 = vld [vmem:[#allocation8 + $0x1b90] sm:$0xff] }
 0x1bc   :  { %1620 = vmatmul.mubr.f32.vlgmr.msra.gmra.mrb[6].mxu0 %v5408_v57  ;;  %4604 = vmatpush1.bf16.msra.mxu1 %v4603_v48  ;;  %v4619_v48 = vpack.c.bf16 %v1734_v35, %v1724_v36  ;;  %v1763_v57 = vld [vmem:[#allocation8 + $0x17c8] sm:$0xff]  ;;  %v1833_v36 = vld [vmem:[#allocation8 + $0x19f8] sm:$0xff]  ;;  %v4635_v35 = vpack.c.bf16 %v1814_v23, %v1804_v22 }
 0x1bd   :  { %4540 = vmatpush1.bf16.msra.mxu0 %v4539_v41  ;;  %4606 = vmatprep.subr.bf16.mxu1 %v4605_v49  ;;  %v4555_v41 = vpack.c.bf16 %v1732_v26, %v1722_v34  ;;  %v4621_v49 = vpack.c.bf16 %v1755_v42, %v1745_v39  ;;  %v4561_v62 = vpack.c.bf16 %v1773_v10, %v1763_v57  ;;  %v1823_v34 = vld [vmem:[#allocation8 + $0x19a8] sm:$0xff]  ;;  %v1822_v39 = vld [vmem:[#allocation8 + $0x19a0] sm:$0xff]  ;;  %v1824_v42 = vld [vmem:[#allocation8 + $0x19b0] sm:$0xff] }
 0x1be   :  { %4542 = vmatprep.subr.bf16.mxu0 %v4541_v47  ;;  %1542 = vmatprep.mubr.f32.mxu1 %v5409_v1  ;;  %v4557_v47 = vpack.c.bf16 %v1753_v45, %v1743_v44  ;;  %v1834_v44 = vld [vmem:[#allocation8 + $0x1a00] sm:$0xff]  ;;  %v4573_v45 = vpack.c.bf16 %v1833_v36, %v1823_v34  ;;  %v1913_v22 = vld [vmem:[#allocation8 + $0x1c78] sm:$0xff] }
 0x1bf   :  { %1625 = vmatprep.mubr.f32.mxu0 %v5409_v1  ;;  %1543 = vmatmul.mubr.f32.gmra.mrb[14].mxu1 %v5410_v4  ;;  %v4639_v13 = vpack.c.bf16 %v1834_v44, %v1824_v42  ;;  %v1854_v57 = vld [vmem:[#allocation8 + $0x1aa0] sm:$0xff]  ;;  %v1933_v42 = vld [vmem:[#allocation8 + $0x1d18] sm:$0xff] }
 0x1c0   :  { %4608 = vmatpush1.bf16.msra.mxu1 %v4607_v58  ;;  %1626 = vmatmul.mubr.f32.gmra.mrb[8].mxu0 %v5410_v4  ;;  %v4559_v58 = vpack.c.bf16 %v1752_v52, %v1742_v50  ;;  %v1782_v4 = vld [vmem:[#allocation8 + $0x1860] sm:$0xff]  ;;  %v1843_v50 = vld [vmem:[#allocation8 + $0x1a48] sm:$0xff] }
 0x1c1   :  { %4544 = vmatpush1.bf16.msra.mxu0 %v4543_v60  ;;  %4610 = vmatprep.subr.bf16.mxu1 %v4609_v12  ;;  %v1762_v60 = vld [vmem:[#allocation8 + $0x17c0] sm:$0xff]  ;;  %v1764_v12 = vld [vmem:[#allocation8 + $0x17d0] sm:$0xff]  ;;  %v4577_v10 = vpack.c.bf16 %v1853_v51, %v1843_v50 }
 0x1c2   :  { %4546 = vmatprep.subr.bf16.mxu0 %v4545_v25  ;;  %1548 = vmatprep.mubr.f32.mxu1 %v5412_v21  ;;  %v1785_v25 = vld [vmem:[#allocation8 + $0x1878] sm:$0xff]  ;;  %v4627_v1 = vpack.c.bf16 %v1774_v61, %v1764_v12  ;;  %v4563_v2 = vpack.c.bf16 %v1772_v63, %v1762_v60  ;;  %v1863_v60 = vld [vmem:[#allocation8 + $0x1ae8] sm:$0xff]  ;;  %v4643_v61 = vpack.c.bf16 %v1854_v57, %v1844_v56  ;;  %v1914_v34 = vld [vmem:[#allocation8 + $0x1c80] sm:$0xff] }
 0x1c3   :  { %1631 = vmatprep.mubr.f32.mxu0 %v5412_v21  ;;  %1549 = vmatmul.mubr.f32.gmra.mrb[16].mxu1 %v5413_v24  ;;  %v4629_v3 = vpack.c.bf16 %v1795_v31, %v1785_v25  ;;  %v1802_v21 = vld [vmem:[#allocation8 + $0x1900] sm:$0xff]  ;;  %v1873_v12 = vld [vmem:[#allocation8 + $0x1b38] sm:$0xff]  ;;  %v1864_v31 = vld [vmem:[#allocation8 + $0x1af0] sm:$0xff] }
 0x1c4   :  { %4612 = vmatpush1.bf16.msra.mxu1 %v4611_v8  ;;  %1632 = vmatmul.mubr.f32.gmra.mrb[10].mxu0 %v5413_v24  ;;  %v1794_v8 = vld [vmem:[#allocation8 + $0x18c0] sm:$0xff]  ;;  %v1953_v56 = vld [vmem:[#allocation8 + $0x1db8] sm:$0xff] }
 0x1c5   :  { %4548 = vmatpush1.bf16.msra.mxu0 %v4547_v11  ;;  %4614 = vmatprep.subr.bf16.mxu1 %v4613_v19  ;;  %v4565_v11 = vpack.c.bf16 %v1793_v37, %v1783_v0  ;;  %v1792_v19 = vld [vmem:[#allocation8 + $0x18b0] sm:$0xff]  ;;  %v4631_v17 = vpack.c.bf16 %v1794_v8, %v1784_v5  ;;  %v1862_v25 = vld [vmem:[#allocation8 + $0x1ae0] sm:$0xff]  ;;  %v4581_v37 = vpack.c.bf16 %v1873_v12, %v1863_v60  ;;  %v1893_v5 = vld [vmem:[#allocation8 + $0x1bd8] sm:$0xff] }
 0x1c6   :  { %4550 = vmatprep.subr.bf16.mxu0 %v4549_v16  ;;  %2051 = vmatprep.mubr.f32.mxu0 %v5842_v28  ;;  %v1813_v16 = vld [vmem:[#allocation8 + $0x1958] sm:$0xff]  ;;  %v4567_v18 = vpack.c.bf16 %v1792_v19, %v1782_v4  ;;  %v1874_v0 = vld [vmem:[#allocation8 + $0x1b40] sm:$0xff]  ;;  %v1883_v4 = vld [vmem:[#allocation8 + $0x1b88] sm:$0xff] }
 0x1c7   :  { %2134 = vmatprep.mubr.f32.mxu1 %v5842_v28  ;;  %v4569_v24 = vpack.c.bf16 %v1813_v16, %v1803_v32  ;;  %v4647_v8 = vpack.c.bf16 %v1874_v0, %v1864_v31  ;;  %v1894_v32 = vld [vmem:[#allocation8 + $0x1be0] sm:$0xff]  ;;  %v4585_v16 = vpack.c.bf16 %v1893_v5, %v1883_v4  ;;  %v1647_v31 = vld [vmem:[#allocation8 + $0x1428] sm:$0xff]  ;;  %v1657_v0 = vld [vmem:[#allocation8 + $0x1478] sm:$0xff] }
 0x1c8   :  { %4616 = vmatpush1.bf16.msra.mxu1 %v4615_v29  ;;  %v1812_v29 = vld [vmem:[#allocation8 + $0x1950] sm:$0xff]  ;;  %v4651_v23 = vpack.c.bf16 %v1894_v32, %v1884_v40  ;;  %v1934_v50 = vld [vmem:[#allocation8 + $0x1d20] sm:$0xff]  ;;  %v1669_v32 = vld [vmem:[#allocation8 + $0x14d8] sm:$0xff] }
 0x1c9   :  { %4552 = vmatpush1.bf16.msra.mxu0 %v4551_v30  ;;  %4618 = vmatprep.subr.bf16.mxu1 %v4617_v33  ;;  %v1825_v30 = vld [vmem:[#allocation8 + $0x19b8] sm:$0xff]  ;;  %v1835_v33 = vld [vmem:[#allocation8 + $0x1a08] sm:$0xff]  ;;  %v1954_v60 = vld [vmem:[#allocation8 + $0x1dc0] sm:$0xff] }
 0x1ca   :  { %4554 = vmatprep.subr.bf16.mxu0 %v4553_v38  ;;  %v4571_v38 = vpack.c.bf16 %v1812_v29, %v1802_v21  ;;  %v4637_v26 = vpack.c.bf16 %v1835_v33, %v1825_v30  ;;  %v1903_v21 = vld [vmem:[#allocation8 + $0x1c28] sm:$0xff]  ;;  %v1902_v30 = vld [vmem:[#allocation8 + $0x1c20] sm:$0xff]  ;;  %v1904_v33 = vld [vmem:[#allocation8 + $0x1c30] sm:$0xff] }
 0x1cb   :  { %v4589_v36 = vpack.c.bf16 %v1913_v22, %v1903_v21  ;;  %v4655_v44 = vpack.c.bf16 %v1914_v34, %v1904_v33  ;;  %v1638_v12 = vld [vmem:[#allocation2] sm:$0xfc]  ;;  %v1656_v40 = vld [vmem:[#allocation8 + $0x1470] sm:$0xff] }
 0x1cc   :  { %4620 = vmatpush1.bf16.msra.mxu1 %v4619_v48  ;;  %v1832_v48 = vld [vmem:[#allocation8 + $0x19f0] sm:$0xff] }
 0x1cd   :  { %4556 = vmatpush1.bf16.msra.mxu0 %v4555_v41  ;;  %4622 = vmatprep.subr.bf16.mxu1 %v4621_v49  ;;  %v1845_v41 = vld [vmem:[#allocation8 + $0x1a58] sm:$0xff]  ;;  %v1855_v49 = vld [vmem:[#allocation8 + $0x1aa8] sm:$0xff]  ;;  %v1668_v34 = vld [vmem:[#allocation8 + $0x14d0] sm:$0xff] }
 0x1ce   :  { %4558 = vmatprep.subr.bf16.mxu0 %v4557_v47  ;;  %v4575_v47 = vpack.c.bf16 %v1832_v48, %v1822_v39  ;;  %v4641_v52 = vpack.c.bf16 %v1855_v49, %v1845_v41  ;;  %v1923_v39 = vld [vmem:[#allocation8 + $0x1cc8] sm:$0xff]  ;;  %v1922_v41 = vld [vmem:[#allocation8 + $0x1cc0] sm:$0xff]  ;;  %v1924_v49 = vld [vmem:[#allocation8 + $0x1cd0] sm:$0xff] }
 0x1cf   :  { %v4593_v51 = vpack.c.bf16 %v1933_v42, %v1923_v39  ;;  %v4659_v57 = vpack.c.bf16 %v1934_v50, %v1924_v49  ;;  %v1689_v42 = vld [vmem:[#allocation8 + $0x1578] sm:$0xff] }
 0x1d0   :  { %4624 = vmatpush1.bf16.msra.mxu1 %v4623_v55  ;;  %v1852_v55 = vld [vmem:[#allocation8 + $0x1a90] sm:$0xff] }
 0x1d1   :  { %4560 = vmatpush1.bf16.msra.mxu0 %v4559_v58  ;;  %4626 = vmatprep.subr.bf16.mxu1 %v4625_v59  ;;  %v1865_v58 = vld [vmem:[#allocation8 + $0x1af8] sm:$0xff]  ;;  %v1875_v59 = vld [vmem:[#allocation8 + $0x1b48] sm:$0xff] }
 0x1d2   :  { %4562 = vmatprep.subr.bf16.mxu0 %v4561_v62  ;;  %v4579_v62 = vpack.c.bf16 %v1852_v55, %v1842_v54  ;;  %v4645_v63 = vpack.c.bf16 %v1875_v59, %v1865_v58  ;;  %v1943_v54 = vld [vmem:[#allocation8 + $0x1d68] sm:$0xff]  ;;  %v1944_v59 = vld [vmem:[#allocation8 + $0x1d70] sm:$0xff] }
 0x1d4   :  { %4628 = vmatpush1.bf16.msra.mxu1 %v4627_v1  ;;  %v1872_v1 = vld [vmem:[#allocation8 + $0x1b30] sm:$0xff] }
 0x1d5   :  { %4564 = vmatpush1.bf16.msra.mxu0 %v4563_v2  ;;  %4630 = vmatprep.subr.bf16.mxu1 %v4629_v3  ;;  %v1885_v2 = vld [vmem:[#allocation8 + $0x1b98] sm:$0xff]  ;;  %v1895_v3 = vld [vmem:[#allocation8 + $0x1be8] sm:$0xff] }
 0x1d6   :  { %4566 = vmatprep.subr.bf16.mxu0 %v4565_v11  ;;  %v4583_v11 = vpack.c.bf16 %v1872_v1, %v1862_v25  ;;  %v4649_v19 = vpack.c.bf16 %v1895_v3, %v1885_v2  ;;  %v1659_v25 = vld [vmem:[#allocation8 + $0x1488] sm:$0xff]  ;;  %v1967_v1 = vrot.slane %v1638_v12, 2  ;;  %v5414_v2 = vld [vmem:[#allocation2 + $0x10] sm:$0xff] }
 0x1d7   :  { %v1968_v3 = vrot.slane %v5414_v2, 2  ;;  %v1716_v2 = vld [vmem:[#allocation8 + $0x1650] sm:$0xff] }
 0x1d8   :  { %4632 = vmatpush1.bf16.msra.mxu1 %v4631_v17  ;;  %v1892_v17 = vld [vmem:[#allocation8 + $0x1bd0] sm:$0xff] }
 0x1d9   :  { %4568 = vmatpush1.bf16.msra.mxu0 %v4567_v18  ;;  %4634 = vmatprep.subr.bf16.mxu1 %v4633_v20  ;;  %v1905_v18 = vld [vmem:[#allocation8 + $0x1c38] sm:$0xff]  ;;  %v1915_v20 = vld [vmem:[#allocation8 + $0x1c88] sm:$0xff]  ;;  %v5847_v22 = vsel %vm1966_vm1, %v1967_v1, %v1968_v3 }
 0x1da   :  { %4570 = vmatprep.subr.bf16.mxu0 %v4569_v24  ;;  %v4587_v24 = vpack.c.bf16 %v1892_v17, %v1882_v15  ;;  %v4653_v29 = vpack.c.bf16 %v1915_v20, %v1905_v18  ;;  %v4665_v15 = vpack.c.bf16 %v1657_v0, %v1647_v31  ;;  %v1667_v17 = vld [vmem:[#allocation8 + $0x14c8] sm:$0xff]  ;;  %v1677_v18 = vld [vmem:[#allocation8 + $0x1518] sm:$0xff]  ;;  %v1708_v31 = vld [vmem:[#allocation8 + $0x1610] sm:$0xff] }
 0x1db   :  { %v5415_v20 = vld [vmem:[#allocation2 + $0x28] sm:$0xff]  ;;  %v4669_v39 = vpack.c.bf16 %v1677_v18, %v1667_v17  ;;  %v1718_v0 = vld [vmem:[#allocation8 + $0x1660] sm:$0xff]  ;;  %v1736_v18 = vld [vmem:[#allocation8 + $0x16f0] sm:$0xff] }
 0x1dc   :  { %4636 = vmatpush1.bf16.msra.mxu1 %v4635_v35  ;;  %v1912_v35 = vld [vmem:[#allocation8 + $0x1c70] sm:$0xff]  ;;  %v1975_v21 = vrot.slane %v5415_v20, 2  ;;  %v1749_v20 = vld [vmem:[#allocation8 + $0x1758] sm:$0xff] }
 0x1dd   :  { %4572 = vmatpush1.bf16.msra.mxu0 %v4571_v38  ;;  %4638 = vmatprep.subr.bf16.mxu1 %v4637_v26  ;;  %v1925_v38 = vld [vmem:[#allocation8 + $0x1cd8] sm:$0xff]  ;;  %v1935_v26 = vld [vmem:[#allocation8 + $0x1d28] sm:$0xff] }
 0x1de   :  { %4574 = vmatprep.subr.bf16.mxu0 %v4573_v45  ;;  %v4591_v45 = vpack.c.bf16 %v1912_v35, %v1902_v30  ;;  %v4657_v48 = vpack.c.bf16 %v1935_v26, %v1925_v38  ;;  %v5416_v35 = vld [vmem:[#allocation2 + $0x20] sm:$0xff]  ;;  %v1641_v26 = vld [vmem:[#allocation2 + $0x38] sm:$0x3]  ;;  %v5853_v49 = vsel %vm1966_vm1, %v1971_v7, %v1975_v21  ;;  %v1696_v7 = vld [vmem:[#allocation8 + $0x15b0] sm:$0xff] }
 0x1df   :  { %v1973_v38 = vrot.slane %v5416_v35, 2  ;;  %v1758_v35 = vld [vmem:[#allocation8 + $0x17a0] sm:$0xff] }
 0x1e0   :  { %4640 = vmatpush1.bf16.msra.mxu1 %v4639_v13  ;;  %v1932_v13 = vld [vmem:[#allocation8 + $0x1d10] sm:$0xff] }
 0x1e1   :  { %4576 = vmatpush1.bf16.msra.mxu0 %v4575_v47  ;;  %4642 = vmatprep.subr.bf16.mxu1 %v4641_v52  ;;  %v1945_v47 = vld [vmem:[#allocation8 + $0x1d78] sm:$0xff]  ;;  %v1955_v52 = vld [vmem:[#allocation8 + $0x1dc8] sm:$0xff]  ;;  %v4595_v55 = vpack.c.bf16 %v1932_v13, %v1922_v41 }
 0x1e2   :  { %4578 = vmatprep.subr.bf16.mxu0 %v4577_v10  ;;  %v1942_v10 = vld [vmem:[#allocation8 + $0x1d60] sm:$0xff]  ;;  %v4661_v58 = vpack.c.bf16 %v1955_v52, %v1945_v47  ;;  %v1697_v41 = vld [vmem:[#allocation8 + $0x15b8] sm:$0xff] }
 0x1e3   :  { %v1686_v52 = vld [vmem:[#allocation8 + $0x1560] sm:$0xff] }
 0x1e4   :  { %4644 = vmatpush1.bf16.msra.mxu1 %v4643_v61  ;;  %v4597_v61 = vpack.c.bf16 %v1953_v56, %v1943_v54  ;;  %v1688_v54 = vld [vmem:[#allocation8 + $0x1570] sm:$0xff]  ;;  %v1698_v56 = vld [vmem:[#allocation8 + $0x15c0] sm:$0xff] }
 0x1e5   :  { %4580 = vmatpush1.bf16.msra.mxu0 %v4579_v62  ;;  %4646 = vmatprep.subr.bf16.mxu1 %v4645_v63  ;;  %v1952_v62 = vld [vmem:[#allocation8 + $0x1db0] sm:$0xff]  ;;  %v1649_v63 = vld [vmem:[#allocation8 + $0x1438] sm:$0xff]  ;;  %v4739_v12 = vpack.c.bf16 %v1698_v56, %v1688_v54 }
 0x1e6   :  { %4582 = vmatprep.subr.bf16.mxu0 %v4581_v37  ;;  %v4663_v37 = vpack.c.bf16 %v1954_v60, %v1944_v59  ;;  %v4599_v4 = vpack.c.bf16 %v1952_v62, %v1942_v10  ;;  %v4729_v5 = vpack.c.bf16 %v1659_v25, %v1649_v63  ;;  %v1707_v59 = vld [vmem:[#allocation8 + $0x1608] sm:$0xff]  ;;  %v1717_v60 = vld [vmem:[#allocation8 + $0x1658] sm:$0xff]  ;;  %v4675_v62 = vpack.c.bf16 %v1696_v7, %v1686_v52  ;;  %v1706_v25 = vld [vmem:[#allocation8 + $0x1600] sm:$0xff] }
 0x1e7   :  { %v4677_v1 = vpack.c.bf16 %v1717_v60, %v1707_v59  ;;  %v1776_v54 = vld [vmem:[#allocation8 + $0x1830] sm:$0xff]  ;;  %v1789_v56 = vld [vmem:[#allocation8 + $0x1898] sm:$0xff]  ;;  %v1786_v60 = vld [vmem:[#allocation8 + $0x1880] sm:$0xff] }
 0x1e8   :  { %4648 = vmatpush1.bf16.msra.mxu1 %v4647_v8  ;;  %v1646_v8 = vld [vmem:[#allocation8 + $0x1420] sm:$0xff]  ;;  %v1797_v7 = vld [vmem:[#allocation8 + $0x18d8] sm:$0xff] }
 0x1e9   :  { %4584 = vmatpush1.bf16.msra.mxu0 %v4583_v11  ;;  %4650 = vmatprep.subr.bf16.mxu1 %v4649_v19  ;;  %v1648_v11 = vld [vmem:[#allocation8 + $0x1430] sm:$0xff]  ;;  %v1658_v19 = vld [vmem:[#allocation8 + $0x1480] sm:$0xff]  ;;  %v4667_v30 = vpack.c.bf16 %v1656_v40, %v1646_v8  ;;  %v1737_v8 = vld [vmem:[#allocation8 + $0x16f8] sm:$0xff] }
 0x1ea   :  { %4586 = vmatprep.subr.bf16.mxu0 %v4585_v16  ;;  %v1679_v16 = vld [vmem:[#allocation8 + $0x1528] sm:$0xff]  ;;  %v1726_v40 = vld [vmem:[#allocation8 + $0x16a0] sm:$0xff] }
 0x1eb   :  { %v4733_v33 = vpack.c.bf16 %v1679_v16, %v1669_v32  ;;  %v1728_v32 = vld [vmem:[#allocation8 + $0x16b0] sm:$0xff]  ;;  %v1738_v16 = vld [vmem:[#allocation8 + $0x1700] sm:$0xff] }
 0x1ec   :  { %4652 = vmatpush1.bf16.msra.mxu1 %v4651_v23  ;;  %v4731_v23 = vpack.c.bf16 %v1658_v19, %v1648_v11  ;;  %v4743_v11 = vpack.c.bf16 %v1718_v0, %v1708_v31  ;;  %v4679_v19 = vpack.c.bf16 %v1716_v2, %v1706_v25  ;;  %v1796_v25 = vld [vmem:[#allocation8 + $0x18d0] sm:$0xff]  ;;  %v1809_v31 = vld [vmem:[#allocation8 + $0x1938] sm:$0xff]  ;;  %v1819_v0 = vld [vmem:[#allocation8 + $0x1988] sm:$0xff] }
 0x1ed   :  { %4588 = vmatpush1.bf16.msra.mxu0 %v4587_v24  ;;  %4654 = vmatprep.subr.bf16.mxu1 %v4653_v29  ;;  %v1666_v24 = vld [vmem:[#allocation8 + $0x14c0] sm:$0xff]  ;;  %v1676_v29 = vld [vmem:[#allocation8 + $0x1510] sm:$0xff]  ;;  %v1817_v2 = vld [vmem:[#allocation8 + $0x1978] sm:$0xff] }
 0x1ee   :  { %4590 = vmatprep.subr.bf16.mxu0 %v4589_v36  ;;  %v1678_v36 = vld [vmem:[#allocation8 + $0x1520] sm:$0xff]  ;;  %v4671_v13 = vpack.c.bf16 %v1676_v29, %v1666_v24  ;;  %v1757_v24 = vld [vmem:[#allocation8 + $0x1798] sm:$0xff]  ;;  %v4747_v29 = vpack.c.bf16 %v1738_v16, %v1728_v32  ;;  %v1839_v16 = vld [vmem:[#allocation8 + $0x1a28] sm:$0xff] }
 0x1ef   :  { %v4735_v50 = vpack.c.bf16 %v1678_v36, %v1668_v34  ;;  %v1746_v34 = vld [vmem:[#allocation8 + $0x1740] sm:$0xff]  ;;  %v1748_v36 = vld [vmem:[#allocation8 + $0x1750] sm:$0xff]  ;;  %v1829_v32 = vld [vmem:[#allocation8 + $0x19d8] sm:$0xff] }
 0x1f0   :  { %4656 = vmatpush1.bf16.msra.mxu1 %v4655_v44  ;;  %v1699_v44 = vld [vmem:[#allocation8 + $0x15c8] sm:$0xff] }
 0x1f1   :  { %4592 = vmatpush1.bf16.msra.mxu0 %v4591_v45  ;;  %4658 = vmatprep.subr.bf16.mxu1 %v4657_v48  ;;  %v1640_v45 = vld [vmem:[#allocation2 + $0x30] sm:$0x3]  ;;  %v1687_v48 = vld [vmem:[#allocation8 + $0x1568] sm:$0xff]  ;;  %v4737_v47 = vpack.c.bf16 %v1699_v44, %v1689_v42 }
 0x1f2   :  { %4594 = vmatprep.subr.bf16.mxu0 %v4593_v51  ;;  %v1979_v51 = vrot.slane %v1641_v26, 2  ;;  %v1977_v10 = vrot.slane %v1640_v45, 2  ;;  %v4673_v6 = vpack.c.bf16 %v1697_v41, %v1687_v48  ;;  %v1756_v26 = vld [vmem:[#allocation8 + $0x1790] sm:$0xff]  ;;  %v1779_v42 = vld [vmem:[#allocation8 + $0x1848] sm:$0xff]  ;;  %v1777_v45 = vld [vmem:[#allocation8 + $0x1838] sm:$0xff]  ;;  %v4751_v48 = vpack.c.bf16 %v1758_v35, %v1748_v36 }
 0x1f3   :  { %v1767_v44 = vld [vmem:[#allocation8 + $0x17e8] sm:$0xff]  ;;  %v4687_v41 = vpack.c.bf16 %v1756_v26, %v1746_v34  ;;  %v1836_v34 = vld [vmem:[#allocation8 + $0x1a10] sm:$0xff]  ;;  %v1849_v36 = vld [vmem:[#allocation8 + $0x1a78] sm:$0xff] }
 0x1f4   :  { %4660 = vmatpush1.bf16.msra.mxu1 %v4659_v57  ;;  %v5857_v57 = vsel %vm1966_vm1, %v1968_v3, %v1973_v38  ;;  %v1729_v3 = vld [vmem:[#allocation8 + $0x16b8] sm:$0xff]  ;;  %v4689_v52 = vpack.c.bf16 %v1777_v45, %v1767_v44  ;;  %v1859_v35 = vld [vmem:[#allocation8 + $0x1ac8] sm:$0xff]  ;;  %v1846_v45 = vld [vmem:[#allocation8 + $0x1a60] sm:$0xff] }
 0x1f5   :  { %4596 = vmatpush1.bf16.msra.mxu0 %v4595_v55  ;;  %4662 = vmatprep.subr.bf16.mxu1 %v4661_v58  ;;  %v1709_v55 = vld [vmem:[#allocation8 + $0x1618] sm:$0xff]  ;;  %v1719_v58 = vld [vmem:[#allocation8 + $0x1668] sm:$0xff]  ;;  %v4769_v44 = vpack.c.bf16 %v1859_v35, %v1849_v36 }
 0x1f6   :  { %4598 = vmatprep.subr.bf16.mxu0 %v4597_v61  ;;  %v5863_v61 = vsel %vm1966_vm1, %v1975_v21, %v1979_v51  ;;  %v4741_v63 = vpack.c.bf16 %v1719_v58, %v1709_v55  ;;  %v1759_v21 = vld [vmem:[#allocation8 + $0x17a8] sm:$0xff]  ;;  %v1766_v51 = vld [vmem:[#allocation8 + $0x17e0] sm:$0xff]  ;;  %v1857_v26 = vld [vmem:[#allocation8 + $0x1ab8] sm:$0xff] }
 0x1f7   :  { %v4691_v58 = vpack.c.bf16 %v1776_v54, %v1766_v51  ;;  %v1856_v51 = vld [vmem:[#allocation8 + $0x1ab0] sm:$0xff]  ;;  %v1877_v54 = vld [vmem:[#allocation8 + $0x1b58] sm:$0xff] }
 0x1f8   :  { %4664 = vmatpush1.bf16.msra.mxu1 %v4663_v37  ;;  %v5866_v37 = vsel %vm1966_vm1, %v1973_v38, %v1977_v10  ;;  %v1799_v10 = vld [vmem:[#allocation8 + $0x18e8] sm:$0xff] }
 0x1f9   :  { %4600 = vmatpush1.bf16.msra.mxu0 %v4599_v4  ;;  %4730 = vmatprep.subr.bf16.mxu1 %v4729_v5  ;;  %v1739_v4 = vld [vmem:[#allocation8 + $0x1708] sm:$0xff]  ;;  %v4757_v59 = vpack.c.bf16 %v1799_v10, %v1789_v56  ;;  %v4707_v10 = vpack.c.bf16 %v1856_v51, %v1846_v45  ;;  %v1936_v45 = vld [vmem:[#allocation8 + $0x1d30] sm:$0xff]  ;;  %v1957_v51 = vld [vmem:[#allocation8 + $0x1dd8] sm:$0xff] }
 0x1fa   :  { %4666 = vmatprep.subr.bf16.mxu0 %v4665_v15  ;;  %v1727_v5 = vld [vmem:[#allocation8 + $0x16a8] sm:$0xff]  ;;  %v4745_v15 = vpack.c.bf16 %v1739_v4, %v1729_v3  ;;  %v4695_v4 = vpack.c.bf16 %v1796_v25, %v1786_v60  ;;  %v1876_v60 = vld [vmem:[#allocation8 + $0x1b50] sm:$0xff]  ;;  %v1897_v25 = vld [vmem:[#allocation8 + $0x1bf8] sm:$0xff] }
 0x1fb   :  { %2135 = vmatmul.mubr.f32.vlgmr.msra.gmra.mrb[6].mxu1 %v5847_v22  ;;  %v4681_v17 = vpack.c.bf16 %v1737_v8, %v1727_v5  ;;  %v4761_v5 = vpack.c.bf16 %v1819_v0, %v1809_v31  ;;  %v1806_v8 = vld [vmem:[#allocation8 + $0x1920] sm:$0xff] }
 0x1fc   :  { %2052 = vmatmul.mubr.f32.vlgmr.msra.gmra.mrb[12].mxu0 %v5847_v22  ;;  %4732 = vmatpush1.bf16.msra.mxu1 %v4731_v23  ;;  %v1747_v23 = vld [vmem:[#allocation8 + $0x1748] sm:$0xff] }
 0x1fd   :  { %4668 = vmatpush1.bf16.msra.mxu0 %v4667_v30  ;;  %4734 = vmatprep.subr.bf16.mxu1 %v4733_v33  ;;  %v4683_v30 = vpack.c.bf16 %v1736_v18, %v1726_v40  ;;  %v4749_v33 = vpack.c.bf16 %v1759_v21, %v1749_v20  ;;  %v4685_v38 = vpack.c.bf16 %v1757_v24, %v1747_v23  ;;  %v1816_v40 = vld [vmem:[#allocation8 + $0x1970] sm:$0xff]  ;;  %v1837_v18 = vld [vmem:[#allocation8 + $0x1a18] sm:$0xff]  ;;  %v1826_v24 = vld [vmem:[#allocation8 + $0x19c0] sm:$0xff] }
 0x1fe   :  { %4670 = vmatprep.subr.bf16.mxu0 %v4669_v39  ;;  %2057 = vmatprep.mubr.f32.mxu0 %v5853_v49  ;;  %v1769_v39 = vld [vmem:[#allocation8 + $0x17f8] sm:$0xff]  ;;  %v4699_v21 = vpack.c.bf16 %v1816_v40, %v1806_v8  ;;  %v4765_v23 = vpack.c.bf16 %v1839_v16, %v1829_v32  ;;  %v1896_v8 = vld [vmem:[#allocation8 + $0x1bf0] sm:$0xff] }
 0x1ff   :  { %2140 = vmatprep.mubr.f32.mxu1 %v5853_v49  ;;  %v1917_v40 = vld [vmem:[#allocation8 + $0x1c98] sm:$0xff] }
 0x200   :  { %4736 = vmatpush1.bf16.msra.mxu1 %v4735_v50  ;;  %2058 = vmatmul.mubr.f32.gmra.mrb[14].mxu0 %v5857_v57  ;;  %v4753_v50 = vpack.c.bf16 %v1779_v42, %v1769_v39  ;;  %v4703_v42 = vpack.c.bf16 %v1836_v34, %v1826_v24  ;;  %v1916_v24 = vld [vmem:[#allocation8 + $0x1c90] sm:$0xff]  ;;  %v1937_v34 = vld [vmem:[#allocation8 + $0x1d38] sm:$0xff] }
 0x201   :  { %4672 = vmatpush1.bf16.msra.mxu0 %v4671_v13  ;;  %4738 = vmatprep.subr.bf16.mxu1 %v4737_v47  ;;  %v1768_v13 = vld [vmem:[#allocation8 + $0x17f0] sm:$0xff]  ;;  %v1778_v47 = vld [vmem:[#allocation8 + $0x1840] sm:$0xff] }
 0x202   :  { %4674 = vmatprep.subr.bf16.mxu0 %v4673_v6  ;;  %2141 = vmatmul.mubr.f32.gmra.mrb[8].mxu1 %v5857_v57  ;;  %v1787_v6 = vld [vmem:[#allocation8 + $0x1888] sm:$0xff]  ;;  %v4755_v55 = vpack.c.bf16 %v1778_v47, %v1768_v13  ;;  %v1869_v13 = vld [vmem:[#allocation8 + $0x1b18] sm:$0xff] }
 0x203   :  { %2063 = vmatprep.mubr.f32.mxu0 %v5863_v61  ;;  %2146 = vmatprep.mubr.f32.mxu1 %v5863_v61  ;;  %v1879_v47 = vld [vmem:[#allocation8 + $0x1b68] sm:$0xff] }
 0x204   :  { %4740 = vmatpush1.bf16.msra.mxu1 %v4739_v12  ;;  %2064 = vmatmul.mubr.f32.gmra.mrb[16].mxu0 %v5866_v37  ;;  %v1788_v12 = vld [vmem:[#allocation8 + $0x1890] sm:$0xff] }
 0x205   :  { %4676 = vmatpush1.bf16.msra.mxu0 %v4675_v62  ;;  %4742 = vmatprep.subr.bf16.mxu1 %v4741_v63  ;;  %v1798_v62 = vld [vmem:[#allocation8 + $0x18e0] sm:$0xff]  ;;  %v4693_v63 = vpack.c.bf16 %v1797_v7, %v1787_v6  ;;  %v4773_v6 = vpack.c.bf16 %v1879_v47, %v1869_v13 }
 0x206   :  { %4678 = vmatprep.subr.bf16.mxu0 %v4677_v1  ;;  %2147 = vmatmul.mubr.f32.gmra.mrb[10].mxu1 %v5866_v37  ;;  %v1807_v1 = vld [vmem:[#allocation8 + $0x1928] sm:$0xff]  ;;  %v4759_v3 = vpack.c.bf16 %v1798_v62, %v1788_v12  ;;  %v1866_v7 = vld [vmem:[#allocation8 + $0x1b00] sm:$0xff]  ;;  %v1889_v12 = vld [vmem:[#allocation8 + $0x1bb8] sm:$0xff] }
 0x207   :  { %2217 = vmatprep.mubr.f32.mxu0 %v5842_v28  ;;  %2300 = vmatprep.mubr.f32.mxu1 %v5842_v28  ;;  %v1899_v62 = vld [vmem:[#allocation8 + $0x1c08] sm:$0xff]  ;;  %v4711_v0 = vpack.c.bf16 %v1876_v60, %v1866_v7  ;;  %v1956_v7 = vld [vmem:[#allocation8 + $0x1dd0] sm:$0xff]  ;;  %v1661_v60 = vld [vmem:[#allocation8 + $0x1498] sm:$0xff] }
 0x208   :  { %4744 = vmatpush1.bf16.msra.mxu1 %v4743_v11  ;;  %v1808_v11 = vld [vmem:[#allocation8 + $0x1930] sm:$0xff] }
 0x209   :  { %4680 = vmatpush1.bf16.msra.mxu0 %v4679_v19  ;;  %4746 = vmatprep.subr.bf16.mxu1 %v4745_v15  ;;  %v1818_v19 = vld [vmem:[#allocation8 + $0x1980] sm:$0xff]  ;;  %v4697_v15 = vpack.c.bf16 %v1817_v2, %v1807_v1  ;;  %v4777_v1 = vpack.c.bf16 %v1899_v62, %v1889_v12 }
 0x20a   :  { %4682 = vmatprep.subr.bf16.mxu0 %v4681_v17  ;;  %v1827_v17 = vld [vmem:[#allocation8 + $0x19c8] sm:$0xff]  ;;  %v4763_v20 = vpack.c.bf16 %v1818_v19, %v1808_v11  ;;  %v1886_v2 = vld [vmem:[#allocation8 + $0x1ba0] sm:$0xff]  ;;  %v1909_v11 = vld [vmem:[#allocation8 + $0x1c58] sm:$0xff] }
 0x20b   :  { %v1919_v19 = vld [vmem:[#allocation8 + $0x1ca8] sm:$0xff]  ;;  %v4715_v16 = vpack.c.bf16 %v1896_v8, %v1886_v2  ;;  %v1660_v2 = vld [vmem:[#allocation8 + $0x1490] sm:$0xff]  ;;  %v1681_v8 = vld [vmem:[#allocation8 + $0x1538] sm:$0xff] }
 0x20c   :  { %4748 = vmatpush1.bf16.msra.mxu1 %v4747_v29  ;;  %v1828_v29 = vld [vmem:[#allocation8 + $0x19d0] sm:$0xff] }
 0x20d   :  { %4684 = vmatpush1.bf16.msra.mxu0 %v4683_v30  ;;  %4750 = vmatprep.subr.bf16.mxu1 %v4749_v33  ;;  %v1838_v30 = vld [vmem:[#allocation8 + $0x1a20] sm:$0xff]  ;;  %v4701_v33 = vpack.c.bf16 %v1837_v18, %v1827_v17  ;;  %v4781_v17 = vpack.c.bf16 %v1919_v19, %v1909_v11 }
 0x20e   :  { %4686 = vmatprep.subr.bf16.mxu0 %v4685_v38  ;;  %v1847_v38 = vld [vmem:[#allocation8 + $0x1a68] sm:$0xff]  ;;  %v4767_v39 = vpack.c.bf16 %v1838_v30, %v1828_v29  ;;  %v1906_v18 = vld [vmem:[#allocation8 + $0x1c40] sm:$0xff]  ;;  %v1929_v29 = vld [vmem:[#allocation8 + $0x1cf8] sm:$0xff] }
 0x20f   :  { %v1939_v30 = vld [vmem:[#allocation8 + $0x1d48] sm:$0xff]  ;;  %v4719_v35 = vpack.c.bf16 %v1916_v24, %v1906_v18  ;;  %v1680_v18 = vld [vmem:[#allocation8 + $0x1530] sm:$0xff]  ;;  %v1701_v24 = vld [vmem:[#allocation8 + $0x15d8] sm:$0xff] }
 0x210   :  { %4752 = vmatpush1.bf16.msra.mxu1 %v4751_v48  ;;  %v1848_v48 = vld [vmem:[#allocation8 + $0x1a70] sm:$0xff] }
 0x211   :  { %4688 = vmatpush1.bf16.msra.mxu0 %v4687_v41  ;;  %4754 = vmatprep.subr.bf16.mxu1 %v4753_v50  ;;  %v1858_v41 = vld [vmem:[#allocation8 + $0x1ac0] sm:$0xff]  ;;  %v4705_v50 = vpack.c.bf16 %v1857_v26, %v1847_v38  ;;  %v4785_v38 = vpack.c.bf16 %v1939_v30, %v1929_v29  ;;  %v2433_v30 = vld [vmem:[#allocation2 + $0x8] sm:$0xf8] }
 0x212   :  { %4690 = vmatprep.subr.bf16.mxu0 %v4689_v52  ;;  %v1867_v52 = vld [vmem:[#allocation8 + $0x1b08] sm:$0xff]  ;;  %v4771_v56 = vpack.c.bf16 %v1858_v41, %v1848_v48  ;;  %v1926_v26 = vld [vmem:[#allocation8 + $0x1ce0] sm:$0xff]  ;;  %v1949_v48 = vld [vmem:[#allocation8 + $0x1d98] sm:$0xff] }
 0x213   :  { %v1959_v41 = vld [vmem:[#allocation8 + $0x1de8] sm:$0xff]  ;;  %v4723_v47 = vpack.c.bf16 %v1936_v45, %v1926_v26 }
 0x214   :  { %4756 = vmatpush1.bf16.msra.mxu1 %v4755_v55  ;;  %v1868_v55 = vld [vmem:[#allocation8 + $0x1b10] sm:$0xff]  ;;  %v1711_v45 = vld [vmem:[#allocation8 + $0x1628] sm:$0xff] }
 0x215   :  { %4692 = vmatpush1.bf16.msra.mxu0 %v4691_v58  ;;  %4758 = vmatprep.subr.bf16.mxu1 %v4757_v59  ;;  %v1878_v58 = vld [vmem:[#allocation8 + $0x1b60] sm:$0xff]  ;;  %v4709_v59 = vpack.c.bf16 %v1877_v54, %v1867_v52  ;;  %v4789_v52 = vpack.c.bf16 %v1959_v41, %v1949_v48  ;;  %v1721_v48 = vld [vmem:[#allocation8 + $0x1678] sm:$0xff]  ;;  %v2764_v41 = vrot.slane %v2433_v30, 3 }
 0x216   :  { %4694 = vmatprep.subr.bf16.mxu0 %v4693_v63  ;;  %v1887_v63 = vld [vmem:[#allocation8 + $0x1ba8] sm:$0xff]  ;;  %v4775_v31 = vpack.c.bf16 %v1878_v58, %v1868_v55  ;;  %v1946_v54 = vld [vmem:[#allocation8 + $0x1d80] sm:$0xff]  ;;  %v2439_v55 = vld [vmem:[#allocation8 + $0x1e18] sm:$0xff] }
 0x217   :  { %v2449_v58 = vld [vmem:[#allocation8 + $0x1e68] sm:$0xff]  ;;  %v4727_v62 = vpack.c.bf16 %v1956_v7, %v1946_v54  ;;  %v1710_v54 = vld [vmem:[#allocation8 + $0x1620] sm:$0xff]  ;;  %v1720_v7 = vld [vmem:[#allocation8 + $0x1670] sm:$0xff] }
 0x218   :  { %4760 = vmatpush1.bf16.msra.mxu1 %v4759_v3  ;;  %v1888_v3 = vld [vmem:[#allocation8 + $0x1bb0] sm:$0xff] }
 0x219   :  { %4696 = vmatpush1.bf16.msra.mxu0 %v4695_v4  ;;  %4762 = vmatprep.subr.bf16.mxu1 %v4761_v5  ;;  %v1898_v4 = vld [vmem:[#allocation8 + $0x1c00] sm:$0xff]  ;;  %v4713_v5 = vpack.c.bf16 %v1897_v25, %v1887_v63  ;;  %v4921_v63 = vpack.c.bf16 %v2449_v58, %v2439_v55  ;;  %v2519_v55 = vld [vmem:[#allocation8 + $0x2098] sm:$0xff]  ;;  %v2529_v58 = vld [vmem:[#allocation8 + $0x20e8] sm:$0xff] }
 0x21a   :  { %4698 = vmatprep.subr.bf16.mxu0 %v4697_v15  ;;  %v1907_v15 = vld [vmem:[#allocation8 + $0x1c48] sm:$0xff]  ;;  %v4779_v32 = vpack.c.bf16 %v1898_v4, %v1888_v3  ;;  %v1650_v25 = vld [vmem:[#allocation8 + $0x1440] sm:$0xff]  ;;  %v2459_v3 = vld [vmem:[#allocation8 + $0x1eb8] sm:$0xff] }
 0x21b   :  { %v2469_v4 = vld [vmem:[#allocation8 + $0x1f08] sm:$0xff]  ;;  %v4795_v19 = vpack.c.bf16 %v1660_v2, %v1650_v25  ;;  %v4937_v25 = vpack.c.bf16 %v2529_v58, %v2519_v55  ;;  %v1821_v58 = vld [vmem:[#allocation8 + $0x1998] sm:$0xff] }
 0x21c   :  { %4764 = vmatpush1.bf16.msra.mxu1 %v4763_v20  ;;  %v1908_v20 = vld [vmem:[#allocation8 + $0x1c50] sm:$0xff]  ;;  %v1811_v55 = vld [vmem:[#allocation8 + $0x1948] sm:$0xff] }
 0x21d   :  { %4700 = vmatpush1.bf16.msra.mxu0 %v4699_v21  ;;  %4766 = vmatprep.subr.bf16.mxu1 %v4765_v23  ;;  %v1918_v21 = vld [vmem:[#allocation8 + $0x1ca0] sm:$0xff]  ;;  %v4717_v23 = vpack.c.bf16 %v1917_v40, %v1907_v15  ;;  %v4925_v15 = vpack.c.bf16 %v2469_v4, %v2459_v3  ;;  %v1740_v3 = vld [vmem:[#allocation8 + $0x1710] sm:$0xff]  ;;  %v2539_v4 = vld [vmem:[#allocation8 + $0x2138] sm:$0xff] }
 0x21e   :  { %4702 = vmatprep.subr.bf16.mxu0 %v4701_v33  ;;  %v1927_v33 = vld [vmem:[#allocation8 + $0x1ce8] sm:$0xff]  ;;  %v4783_v36 = vpack.c.bf16 %v1918_v21, %v1908_v20  ;;  %v1670_v40 = vld [vmem:[#allocation8 + $0x14e0] sm:$0xff]  ;;  %v2479_v20 = vld [vmem:[#allocation8 + $0x1f58] sm:$0xff] }
 0x21f   :  { %v2489_v21 = vld [vmem:[#allocation8 + $0x1fa8] sm:$0xff] }
 0x220   :  { %4768 = vmatpush1.bf16.msra.mxu1 %v4767_v39  ;;  %v1928_v39 = vld [vmem:[#allocation8 + $0x1cf0] sm:$0xff] }
 0x221   :  { %4704 = vmatpush1.bf16.msra.mxu0 %v4703_v42  ;;  %4770 = vmatprep.subr.bf16.mxu1 %v4769_v44  ;;  %v1938_v42 = vld [vmem:[#allocation8 + $0x1d40] sm:$0xff]  ;;  %v4721_v44 = vpack.c.bf16 %v1937_v34, %v1927_v33  ;;  %v4799_v33 = vpack.c.bf16 %v1680_v18, %v1670_v40  ;;  %v4929_v34 = vpack.c.bf16 %v2489_v21, %v2479_v20  ;;  %v1760_v20 = vld [vmem:[#allocation8 + $0x17b0] sm:$0xff]  ;;  %v2559_v21 = vld [vmem:[#allocation8 + $0x21d8] sm:$0xff] }
 0x222   :  { %4706 = vmatprep.subr.bf16.mxu0 %v4705_v50  ;;  %v1947_v50 = vld [vmem:[#allocation8 + $0x1d88] sm:$0xff]  ;;  %v4787_v13 = vpack.c.bf16 %v1938_v42, %v1928_v39  ;;  %v1700_v39 = vld [vmem:[#allocation8 + $0x15d0] sm:$0xff]  ;;  %v2499_v42 = vld [vmem:[#allocation8 + $0x1ff8] sm:$0xff] }
 0x224   :  { %4772 = vmatpush1.bf16.msra.mxu1 %v4771_v56  ;;  %v1948_v56 = vld [vmem:[#allocation8 + $0x1d90] sm:$0xff] }
 0x225   :  { %4708 = vmatpush1.bf16.msra.mxu0 %v4707_v10  ;;  %4774 = vmatprep.subr.bf16.mxu1 %v4773_v6  ;;  %v1958_v10 = vld [vmem:[#allocation8 + $0x1de0] sm:$0xff]  ;;  %v4725_v6 = vpack.c.bf16 %v1957_v51, %v1947_v50  ;;  %v5880_v50 = vld [vmem:[#allocation2 + $0x18] sm:$0xff] }
 0x226   :  { %4710 = vmatprep.subr.bf16.mxu0 %v4709_v59  ;;  %v1651_v59 = vld [vmem:[#allocation8 + $0x1448] sm:$0xff]  ;;  %v4791_v12 = vpack.c.bf16 %v1958_v10, %v1948_v56  ;;  %v2765_v51 = vrot.slane %v5880_v50, 3  ;;  %v2498_v56 = vld [vmem:[#allocation8 + $0x1ff0] sm:$0xff]  ;;  %v2508_v10 = vld [vmem:[#allocation8 + $0x2040] sm:$0xff] }
 0x228   :  { %4776 = vmatpush1.bf16.msra.mxu1 %v4775_v31  ;;  %v2438_v31 = vld [vmem:[#allocation8 + $0x1e10] sm:$0xff] }
 0x229   :  { %4712 = vmatpush1.bf16.msra.mxu0 %v4711_v0  ;;  %4778 = vmatprep.subr.bf16.mxu1 %v4777_v1  ;;  %v2448_v0 = vld [vmem:[#allocation8 + $0x1e60] sm:$0xff]  ;;  %v4793_v1 = vpack.c.bf16 %v1661_v60, %v1651_v59  ;;  %v1731_v59 = vld [vmem:[#allocation8 + $0x16c8] sm:$0xff]  ;;  %v1741_v60 = vld [vmem:[#allocation8 + $0x1718] sm:$0xff] }
 0x22a   :  { %4714 = vmatprep.subr.bf16.mxu0 %v4713_v5  ;;  %v1671_v5 = vld [vmem:[#allocation8 + $0x14e8] sm:$0xff]  ;;  %v4923_v11 = vpack.c.bf16 %v2448_v0, %v2438_v31  ;;  %v1730_v31 = vld [vmem:[#allocation8 + $0x16c0] sm:$0xff]  ;;  %v2518_v0 = vld [vmem:[#allocation8 + $0x2090] sm:$0xff]  ;;  %v4809_v2 = vpack.c.bf16 %v1741_v60, %v1731_v59 }
 0x22c   :  { %4780 = vmatpush1.bf16.msra.mxu1 %v4779_v32  ;;  %v2458_v32 = vld [vmem:[#allocation8 + $0x1eb0] sm:$0xff] }
 0x22d   :  { %4716 = vmatpush1.bf16.msra.mxu0 %v4715_v16  ;;  %4782 = vmatprep.subr.bf16.mxu1 %v4781_v17  ;;  %v2468_v16 = vld [vmem:[#allocation8 + $0x1f00] sm:$0xff]  ;;  %v4797_v17 = vpack.c.bf16 %v1681_v8, %v1671_v5  ;;  %v2549_v5 = vld [vmem:[#allocation8 + $0x2188] sm:$0xff] }
 0x22e   :  { %4718 = vmatprep.subr.bf16.mxu0 %v4717_v23  ;;  %v1691_v23 = vld [vmem:[#allocation8 + $0x1588] sm:$0xff]  ;;  %v4927_v29 = vpack.c.bf16 %v2468_v16, %v2458_v32  ;;  %v4941_v40 = vpack.c.bf16 %v2549_v5, %v2539_v4  ;;  %v1750_v32 = vld [vmem:[#allocation8 + $0x1760] sm:$0xff]  ;;  %v2538_v16 = vld [vmem:[#allocation8 + $0x2130] sm:$0xff] }
 0x22f   :  { %v4801_v26 = vpack.c.bf16 %v1701_v24, %v1691_v23  ;;  %v1751_v8 = vld [vmem:[#allocation8 + $0x1768] sm:$0xff]  ;;  %v1841_v5 = vld [vmem:[#allocation8 + $0x1a38] sm:$0xff] }
 0x230   :  { %4784 = vmatpush1.bf16.msra.mxu1 %v4783_v36  ;;  %v1690_v36 = vld [vmem:[#allocation8 + $0x1580] sm:$0xff]  ;;  %v2569_v23 = vld [vmem:[#allocation8 + $0x2228] sm:$0xff] }
 0x231   :  { %4720 = vmatpush1.bf16.msra.mxu0 %v4719_v35  ;;  %4786 = vmatprep.subr.bf16.mxu1 %v4785_v38  ;;  %v2478_v35 = vld [vmem:[#allocation8 + $0x1f50] sm:$0xff]  ;;  %v2488_v38 = vld [vmem:[#allocation8 + $0x1fa0] sm:$0xff]  ;;  %v1771_v24 = vld [vmem:[#allocation8 + $0x1808] sm:$0xff] }
 0x232   :  { %4722 = vmatprep.subr.bf16.mxu0 %v4721_v44  ;;  %v2509_v44 = vld [vmem:[#allocation8 + $0x2048] sm:$0xff] }
 0x233   :  { %v1831_v4 = vld [vmem:[#allocation8 + $0x19e8] sm:$0xff] }
 0x234   :  { %4788 = vmatpush1.bf16.msra.mxu1 %v4787_v13  ;;  %v4931_v13 = vpack.c.bf16 %v2488_v38, %v2478_v35  ;;  %v2568_v35 = vld [vmem:[#allocation8 + $0x2220] sm:$0xff] }
 0x235   :  { %4724 = vmatpush1.bf16.msra.mxu0 %v4723_v47  ;;  %4790 = vmatprep.subr.bf16.mxu1 %v4789_v52  ;;  %v4803_v47 = vpack.c.bf16 %v1700_v39, %v1690_v36  ;;  %v4933_v52 = vpack.c.bf16 %v2509_v44, %v2499_v42  ;;  %v2558_v36 = vld [vmem:[#allocation8 + $0x21d0] sm:$0xff]  ;;  %v2579_v39 = vld [vmem:[#allocation8 + $0x2278] sm:$0xff]  ;;  %v2589_v42 = vld [vmem:[#allocation8 + $0x22c8] sm:$0xff] }
 0x236   :  { %4726 = vmatprep.subr.bf16.mxu0 %v4725_v6  ;;  %v4805_v6 = vpack.c.bf16 %v1721_v48, %v1711_v45  ;;  %v1791_v44 = vld [vmem:[#allocation8 + $0x18a8] sm:$0xff]  ;;  %v1801_v45 = vld [vmem:[#allocation8 + $0x18f8] sm:$0xff]  ;;  %v4947_v48 = vpack.c.bf16 %v2568_v35, %v2558_v36  ;;  %v1860_v35 = vld [vmem:[#allocation8 + $0x1ad0] sm:$0xff] }
 0x238   :  { %4792 = vmatpush1.bf16.msra.mxu1 %v4791_v12  ;;  %v5890_v12 = vsel %vm2760_vm2, %v2764_v41, %v2765_v51 }
 0x239   :  { %4728 = vmatpush1.bf16.msra.mxu0 %v4727_v62  ;;  %4922 = vmatprep.subr.bf16.mxu1 %v4921_v63  ;;  %v4935_v62 = vpack.c.bf16 %v2508_v10, %v2498_v56  ;;  %v4807_v63 = vpack.c.bf16 %v1720_v7, %v1710_v54  ;;  %v2588_v54 = vld [vmem:[#allocation8 + $0x22c0] sm:$0xff]  ;;  %v4821_v56 = vpack.c.bf16 %v1801_v45, %v1791_v44  ;;  %v1800_v10 = vld [vmem:[#allocation8 + $0x18f0] sm:$0xff]  ;;  %v2609_v7 = vld [vmem:[#allocation8 + $0x2368] sm:$0xff] }
 0x23a   :  { %4794 = vmatprep.subr.bf16.mxu0 %v4793_v1  ;;  %v2528_v1 = vld [vmem:[#allocation8 + $0x20e0] sm:$0xff] }
 0x23b   :  { %2301 = vmatmul.mubr.f32.vlgmr.msra.gmra.mrb[12].mxu1 %v5847_v22 }
 0x23c   :  { %2218 = vmatmul.mubr.f32.vlgmr.msra.gmra.mrb[0].mxu0 %v5847_v22  ;;  %4924 = vmatpush1.bf16.msra.mxu1 %v4923_v11  ;;  %v1761_v11 = vld [vmem:[#allocation8 + $0x17b8] sm:$0xff] }
 0x23d   :  { %4796 = vmatpush1.bf16.msra.mxu0 %v4795_v19  ;;  %4926 = vmatprep.subr.bf16.mxu1 %v4925_v15  ;;  %v4939_v19 = vpack.c.bf16 %v2528_v1, %v2518_v0  ;;  %v4811_v15 = vpack.c.bf16 %v1740_v3, %v1730_v31  ;;  %v4813_v18 = vpack.c.bf16 %v1761_v11, %v1751_v8  ;;  %v2608_v31 = vld [vmem:[#allocation8 + $0x2360] sm:$0xff]  ;;  %v1820_v1 = vld [vmem:[#allocation8 + $0x1990] sm:$0xff]  ;;  %v2629_v3 = vld [vmem:[#allocation8 + $0x2408] sm:$0xff] }
 0x23e   :  { %4798 = vmatprep.subr.bf16.mxu0 %v4797_v17  ;;  %2306 = vmatprep.mubr.f32.mxu1 %v5853_v49  ;;  %v2548_v17 = vld [vmem:[#allocation8 + $0x2180] sm:$0xff]  ;;  %v4825_v0 = vpack.c.bf16 %v1821_v58, %v1811_v55 }
 0x23f   :  { %2223 = vmatprep.mubr.f32.mxu0 %v5853_v49  ;;  %2307 = vmatmul.mubr.f32.gmra.mrb[14].mxu1 %v5857_v57  ;;  %v4943_v30 = vpack.c.bf16 %v2548_v17, %v2538_v16  ;;  %v4829_v16 = vpack.c.bf16 %v1841_v5, %v1831_v4  ;;  %v1840_v17 = vld [vmem:[#allocation8 + $0x1a30] sm:$0xff] }
 0x240   :  { %4928 = vmatpush1.bf16.msra.mxu1 %v4927_v29  ;;  %2224 = vmatmul.mubr.f32.gmra.mrb[2].mxu0 %v5857_v57  ;;  %v1781_v29 = vld [vmem:[#allocation8 + $0x1858] sm:$0xff] }
 0x241   :  { %4800 = vmatpush1.bf16.msra.mxu0 %v4799_v33  ;;  %4930 = vmatprep.subr.bf16.mxu1 %v4929_v34  ;;  %v4945_v33 = vpack.c.bf16 %v2569_v23, %v2559_v21  ;;  %v1770_v34 = vld [vmem:[#allocation8 + $0x1800] sm:$0xff]  ;;  %v4817_v38 = vpack.c.bf16 %v1781_v29, %v1771_v24  ;;  %v1851_v21 = vld [vmem:[#allocation8 + $0x1a88] sm:$0xff]  ;;  %v1861_v23 = vld [vmem:[#allocation8 + $0x1ad8] sm:$0xff] }
 0x242   :  { %4802 = vmatprep.subr.bf16.mxu0 %v4801_v26  ;;  %2312 = vmatprep.mubr.f32.mxu1 %v5863_v61  ;;  %v1780_v26 = vld [vmem:[#allocation8 + $0x1850] sm:$0xff]  ;;  %v4833_v36 = vpack.c.bf16 %v1861_v23, %v1851_v21 }
 0x243   :  { %2229 = vmatprep.mubr.f32.mxu0 %v5863_v61  ;;  %2313 = vmatmul.mubr.f32.gmra.mrb[16].mxu1 %v5866_v37  ;;  %v4819_v41 = vpack.c.bf16 %v1780_v26, %v1770_v34  ;;  %v2648_v34 = vld [vmem:[#allocation8 + $0x24a0] sm:$0xff]  ;;  %v2669_v26 = vld [vmem:[#allocation8 + $0x2548] sm:$0xff] }
 0x244   :  { %4932 = vmatpush1.bf16.msra.mxu1 %v4931_v13  ;;  %2230 = vmatmul.mubr.f32.gmra.mrb[4].mxu0 %v5866_v37  ;;  %v4949_v13 = vpack.c.bf16 %v2589_v42, %v2579_v39  ;;  %v1871_v39 = vld [vmem:[#allocation8 + $0x1b28] sm:$0xff]  ;;  %v1881_v42 = vld [vmem:[#allocation8 + $0x1b78] sm:$0xff] }
 0x245   :  { %4804 = vmatpush1.bf16.msra.mxu0 %v4803_v47  ;;  %4934 = vmatprep.subr.bf16.mxu1 %v4933_v52  ;;  %v1790_v47 = vld [vmem:[#allocation8 + $0x18a0] sm:$0xff]  ;;  %v2578_v52 = vld [vmem:[#allocation8 + $0x2270] sm:$0xff] }
 0x246   :  { %4806 = vmatprep.subr.bf16.mxu0 %v4805_v6  ;;  %2928 = vmatprep.mubr.f32.mxu1 %v5890_v12  ;;  %v2599_v6 = vld [vmem:[#allocation8 + $0x2318] sm:$0xff]  ;;  %v4951_v59 = vpack.c.bf16 %v2588_v54, %v2578_v52  ;;  %v4823_v60 = vpack.c.bf16 %v1800_v10, %v1790_v47  ;;  %v2668_v47 = vld [vmem:[#allocation8 + $0x2540] sm:$0xff]  ;;  %v4837_v52 = vpack.c.bf16 %v1881_v42, %v1871_v39  ;;  %v1880_v54 = vld [vmem:[#allocation8 + $0x1b70] sm:$0xff] }
 0x247   :  { %2383 = vmatprep.mubr.f32.mxu0 %v5842_v28  ;;  %v4815_v28 = vpack.c.bf16 %v1760_v20, %v1750_v32  ;;  %v2628_v32 = vld [vmem:[#allocation8 + $0x2400] sm:$0xff]  ;;  %v2649_v20 = vld [vmem:[#allocation8 + $0x24a8] sm:$0xff] }
 0x248   :  { %4936 = vmatpush1.bf16.msra.mxu1 %v4935_v62  ;;  %v4953_v62 = vpack.c.bf16 %v2609_v7, %v2599_v6  ;;  %v2689_v10 = vld [vmem:[#allocation8 + $0x25e8] sm:$0xff]  ;;  %v1901_v7 = vld [vmem:[#allocation8 + $0x1c18] sm:$0xff]  ;;  %v1950_v42 = vld [vmem:[#allocation8 + $0x1da0] sm:$0xff] }
 0x249   :  { %4808 = vmatpush1.bf16.msra.mxu0 %v4807_v63  ;;  %4938 = vmatprep.subr.bf16.mxu1 %v4937_v25  ;;  %v1810_v63 = vld [vmem:[#allocation8 + $0x1940] sm:$0xff]  ;;  %v2598_v25 = vld [vmem:[#allocation8 + $0x2310] sm:$0xff]  ;;  %v1891_v6 = vld [vmem:[#allocation8 + $0x1bc8] sm:$0xff] }
 0x24a   :  { %4810 = vmatprep.subr.bf16.mxu0 %v4809_v2  ;;  %v2619_v2 = vld [vmem:[#allocation8 + $0x23b8] sm:$0xff]  ;;  %v4955_v8 = vpack.c.bf16 %v2608_v31, %v2598_v25  ;;  %v4827_v11 = vpack.c.bf16 %v1820_v1, %v1810_v63  ;;  %v2688_v63 = vld [vmem:[#allocation8 + $0x25e0] sm:$0xff]  ;;  %v4841_v25 = vpack.c.bf16 %v1901_v7, %v1891_v6  ;;  %v1900_v31 = vld [vmem:[#allocation8 + $0x1c10] sm:$0xff] }
 0x24b   :  { %v2709_v1 = vld [vmem:[#allocation8 + $0x2688] sm:$0xff]  ;;  %v2447_v6 = vld [vmem:[#allocation8 + $0x1e58] sm:$0xff] }
 0x24c   :  { %4940 = vmatpush1.bf16.msra.mxu1 %v4939_v19  ;;  %v4957_v19 = vpack.c.bf16 %v2629_v3, %v2619_v2  ;;  %v1911_v2 = vld [vmem:[#allocation8 + $0x1c68] sm:$0xff]  ;;  %v1921_v3 = vld [vmem:[#allocation8 + $0x1cb8] sm:$0xff] }
 0x24d   :  { %4812 = vmatpush1.bf16.msra.mxu0 %v4811_v15  ;;  %4942 = vmatprep.subr.bf16.mxu1 %v4941_v40  ;;  %v1830_v15 = vld [vmem:[#allocation8 + $0x19e0] sm:$0xff]  ;;  %v2618_v40 = vld [vmem:[#allocation8 + $0x23b0] sm:$0xff] }
 0x24e   :  { %4814 = vmatprep.subr.bf16.mxu0 %v4813_v18  ;;  %v2639_v18 = vld [vmem:[#allocation8 + $0x2458] sm:$0xff]  ;;  %v4959_v24 = vpack.c.bf16 %v2628_v32, %v2618_v40  ;;  %v4831_v29 = vpack.c.bf16 %v1840_v17, %v1830_v15  ;;  %v2708_v15 = vld [vmem:[#allocation8 + $0x2680] sm:$0xff]  ;;  %v4845_v40 = vpack.c.bf16 %v1921_v3, %v1911_v2  ;;  %v1920_v32 = vld [vmem:[#allocation8 + $0x1cb0] sm:$0xff] }
 0x24f   :  { %v2729_v17 = vld [vmem:[#allocation8 + $0x2728] sm:$0xff] }
 0x250   :  { %4944 = vmatpush1.bf16.msra.mxu1 %v4943_v30  ;;  %v4961_v30 = vpack.c.bf16 %v2649_v20, %v2639_v18  ;;  %v1931_v18 = vld [vmem:[#allocation8 + $0x1d08] sm:$0xff]  ;;  %v1941_v20 = vld [vmem:[#allocation8 + $0x1d58] sm:$0xff] }
 0x251   :  { %4816 = vmatpush1.bf16.msra.mxu0 %v4815_v28  ;;  %4946 = vmatprep.subr.bf16.mxu1 %v4945_v33  ;;  %v1850_v28 = vld [vmem:[#allocation8 + $0x1a80] sm:$0xff]  ;;  %v2638_v33 = vld [vmem:[#allocation8 + $0x2450] sm:$0xff]  ;;  %v5419_v2 = vld [vmem:[#allocation2 + $0x28] sm:$0xff] }
 0x252   :  { %4818 = vmatprep.subr.bf16.mxu0 %v4817_v38  ;;  %v2659_v38 = vld [vmem:[#allocation8 + $0x24f8] sm:$0xff]  ;;  %v4963_v44 = vpack.c.bf16 %v2648_v34, %v2638_v33  ;;  %v4835_v45 = vpack.c.bf16 %v1860_v35, %v1850_v28  ;;  %v2728_v28 = vld [vmem:[#allocation8 + $0x2720] sm:$0xff]  ;;  %v4849_v33 = vpack.c.bf16 %v1941_v20, %v1931_v18  ;;  %v1940_v34 = vld [vmem:[#allocation8 + $0x1d50] sm:$0xff]  ;;  %v2769_v3 = vrot.slane %v5419_v2, 3 }
 0x253   :  { %v2749_v35 = vld [vmem:[#allocation8 + $0x27c8] sm:$0xff]  ;;  %v2462_v20 = vld [vmem:[#allocation8 + $0x1ed0] sm:$0xff] }
 0x254   :  { %4948 = vmatpush1.bf16.msra.mxu1 %v4947_v48  ;;  %v4965_v48 = vpack.c.bf16 %v2669_v26, %v2659_v38  ;;  %v1951_v38 = vld [vmem:[#allocation8 + $0x1da8] sm:$0xff]  ;;  %v1961_v26 = vld [vmem:[#allocation8 + $0x1df8] sm:$0xff] }
 0x255   :  { %4820 = vmatpush1.bf16.msra.mxu0 %v4819_v41  ;;  %4950 = vmatprep.subr.bf16.mxu1 %v4949_v13  ;;  %v1870_v41 = vld [vmem:[#allocation8 + $0x1b20] sm:$0xff]  ;;  %v2658_v13 = vld [vmem:[#allocation8 + $0x24f0] sm:$0xff] }
 0x256   :  { %4822 = vmatprep.subr.bf16.mxu0 %v4821_v56  ;;  %v2679_v56 = vld [vmem:[#allocation8 + $0x2598] sm:$0xff]  ;;  %v4967_v55 = vpack.c.bf16 %v2668_v47, %v2658_v13  ;;  %v4839_v58 = vpack.c.bf16 %v1880_v54, %v1870_v41  ;;  %v2748_v41 = vld [vmem:[#allocation8 + $0x27c0] sm:$0xff]  ;;  %v4853_v47 = vpack.c.bf16 %v1961_v26, %v1951_v38 }
 0x257   :  { %v2432_v13 = vld [vmem:[#allocation2] sm:$0xf8]  ;;  %v2443_v54 = vld [vmem:[#allocation8 + $0x1e38] sm:$0xff] }
 0x258   :  { %4952 = vmatpush1.bf16.msra.mxu1 %v4951_v59  ;;  %v4969_v59 = vpack.c.bf16 %v2689_v10, %v2679_v56  ;;  %v2453_v56 = vld [vmem:[#allocation8 + $0x1e88] sm:$0xff]  ;;  %v2487_v38 = vld [vmem:[#allocation8 + $0x1f98] sm:$0xff] }
 0x259   :  { %4824 = vmatpush1.bf16.msra.mxu0 %v4823_v60  ;;  %4954 = vmatprep.subr.bf16.mxu1 %v4953_v62  ;;  %v1890_v60 = vld [vmem:[#allocation8 + $0x1bc0] sm:$0xff]  ;;  %v2678_v62 = vld [vmem:[#allocation8 + $0x2590] sm:$0xff]  ;;  %v2437_v10 = vld [vmem:[#allocation8 + $0x1e08] sm:$0xff] }
 0x25a   :  { %4826 = vmatprep.subr.bf16.mxu0 %v4825_v0  ;;  %v2699_v0 = vld [vmem:[#allocation8 + $0x2638] sm:$0xff]  ;;  %v4971_v4 = vpack.c.bf16 %v2688_v63, %v2678_v62  ;;  %v4843_v5 = vpack.c.bf16 %v1900_v31, %v1890_v60  ;;  %v5049_v62 = vpack.c.bf16 %v2453_v56, %v2443_v54  ;;  %v2436_v63 = vld [vmem:[#allocation8 + $0x1e00] sm:$0xff]  ;;  %v2497_v54 = vld [vmem:[#allocation8 + $0x1fe8] sm:$0xff] }
 0x25b   :  { %v2452_v31 = vld [vmem:[#allocation8 + $0x1e80] sm:$0xff]  ;;  %v2507_v56 = vld [vmem:[#allocation8 + $0x2038] sm:$0xff] }
 0x25c   :  { %4956 = vmatpush1.bf16.msra.mxu1 %v4955_v8  ;;  %v4973_v8 = vpack.c.bf16 %v2709_v1, %v2699_v0  ;;  %v4857_v0 = vpack.c.bf16 %v2447_v6, %v2437_v10  ;;  %v2446_v1 = vld [vmem:[#allocation8 + $0x1e50] sm:$0xff] }
 0x25d   :  { %4828 = vmatpush1.bf16.msra.mxu0 %v4827_v11  ;;  %4958 = vmatprep.subr.bf16.mxu1 %v4957_v19  ;;  %v1910_v11 = vld [vmem:[#allocation8 + $0x1c60] sm:$0xff]  ;;  %v2698_v19 = vld [vmem:[#allocation8 + $0x2630] sm:$0xff]  ;;  %v4859_v18 = vpack.c.bf16 %v2446_v1, %v2436_v63 }
 0x25e   :  { %4830 = vmatprep.subr.bf16.mxu0 %v4829_v16  ;;  %v2719_v16 = vld [vmem:[#allocation8 + $0x26d8] sm:$0xff]  ;;  %v4975_v21 = vpack.c.bf16 %v2708_v15, %v2698_v19  ;;  %v4847_v23 = vpack.c.bf16 %v1920_v32, %v1910_v11  ;;  %v2473_v19 = vld [vmem:[#allocation8 + $0x1f28] sm:$0xff]  ;;  %v5420_v32 = vld [vmem:[#allocation2 + $0x20] sm:$0xff] }
 0x25f   :  { %v2463_v11 = vld [vmem:[#allocation8 + $0x1ed8] sm:$0xff]  ;;  %v2506_v63 = vld [vmem:[#allocation8 + $0x2030] sm:$0xff] }
 0x260   :  { %4960 = vmatpush1.bf16.msra.mxu1 %v4959_v24  ;;  %v4977_v24 = vpack.c.bf16 %v2729_v17, %v2719_v16  ;;  %v2767_v16 = vrot.slane %v5420_v32, 3  ;;  %v2456_v17 = vld [vmem:[#allocation8 + $0x1ea0] sm:$0xff]  ;;  %v2537_v32 = vld [vmem:[#allocation8 + $0x2128] sm:$0xff] }
 0x261   :  { %4832 = vmatpush1.bf16.msra.mxu0 %v4831_v29  ;;  %4962 = vmatprep.subr.bf16.mxu1 %v4961_v30  ;;  %v1930_v29 = vld [vmem:[#allocation8 + $0x1d00] sm:$0xff]  ;;  %v2718_v30 = vld [vmem:[#allocation8 + $0x26d0] sm:$0xff] }
 0x262   :  { %4834 = vmatprep.subr.bf16.mxu0 %v4833_v36  ;;  %v2739_v36 = vld [vmem:[#allocation8 + $0x2778] sm:$0xff]  ;;  %v4979_v39 = vpack.c.bf16 %v2728_v28, %v2718_v30  ;;  %v5053_v28 = vpack.c.bf16 %v2473_v19, %v2463_v11 }
 0x263   :  { %v2543_v19 = vld [vmem:[#allocation8 + $0x2158] sm:$0xff] }
 0x264   :  { %4964 = vmatpush1.bf16.msra.mxu1 %v4963_v44  ;;  %v4851_v44 = vpack.c.bf16 %v1940_v34, %v1930_v29  ;;  %v5901_v29 = vsel %vm2760_vm2, %v2765_v51, %v2769_v3  ;;  %v2483_v34 = vld [vmem:[#allocation8 + $0x1f78] sm:$0xff] }
 0x265   :  { %4836 = vmatpush1.bf16.msra.mxu0 %v4835_v45  ;;  %4966 = vmatprep.subr.bf16.mxu1 %v4965_v48  ;;  %v4981_v45 = vpack.c.bf16 %v2749_v35, %v2739_v36  ;;  %v2738_v48 = vld [vmem:[#allocation8 + $0x2770] sm:$0xff]  ;;  %v2493_v36 = vld [vmem:[#allocation8 + $0x1fc8] sm:$0xff] }
 0x266   :  { %4838 = vmatprep.subr.bf16.mxu0 %v4837_v52  ;;  %v1960_v52 = vld [vmem:[#allocation8 + $0x1df0] sm:$0xff]  ;;  %v4983_v7 = vpack.c.bf16 %v2748_v41, %v2738_v48  ;;  %v2477_v35 = vld [vmem:[#allocation8 + $0x1f48] sm:$0xff]  ;;  %v2492_v41 = vld [vmem:[#allocation8 + $0x1fc0] sm:$0xff] }
 0x267   :  { %v4855_v60 = vpack.c.bf16 %v1960_v52, %v1950_v42  ;;  %v2482_v48 = vld [vmem:[#allocation8 + $0x1f70] sm:$0xff]  ;;  %v2513_v52 = vld [vmem:[#allocation8 + $0x2068] sm:$0xff] }
 0x268   :  { %4968 = vmatpush1.bf16.msra.mxu1 %v4967_v55  ;;  %v2761_v55 = vrot.slane %v2432_v13, 3  ;;  %v2486_v13 = vld [vmem:[#allocation8 + $0x1f90] sm:$0xff]  ;;  %v5059_v6 = vpack.c.bf16 %v2492_v41, %v2482_v48  ;;  %v2583_v48 = vld [vmem:[#allocation8 + $0x2298] sm:$0xff]  ;;  %v2593_v41 = vld [vmem:[#allocation8 + $0x22e8] sm:$0xff] }
 0x269   :  { %4840 = vmatpush1.bf16.msra.mxu0 %v4839_v58  ;;  %4970 = vmatprep.subr.bf16.mxu1 %v4969_v59  ;;  %v5418_v58 = vld [vmem:[#allocation2 + $0x10] sm:$0xff] }
 0x26a   :  { %4842 = vmatprep.subr.bf16.mxu0 %v4841_v25  ;;  %v2762_v59 = vrot.slane %v5418_v58, 3  ;;  %v2442_v25 = vld [vmem:[#allocation8 + $0x1e30] sm:$0xff]  ;;  %v2496_v58 = vld [vmem:[#allocation8 + $0x1fe0] sm:$0xff] }
 0x26b   :  { %v4871_v2 = vpack.c.bf16 %v2506_v63, %v2496_v58  ;;  %v2586_v58 = vld [vmem:[#allocation8 + $0x22b0] sm:$0xff]  ;;  %v2607_v63 = vld [vmem:[#allocation8 + $0x2358] sm:$0xff] }
 0x26c   :  { %4972 = vmatpush1.bf16.msra.mxu1 %v4971_v4  ;;  %v2457_v4 = vld [vmem:[#allocation8 + $0x1ea8] sm:$0xff]  ;;  %v5896_v15 = vsel %vm2760_vm2, %v2761_v55, %v2762_v59  ;;  %v5906_v26 = vsel %vm2760_vm2, %v2762_v59, %v2767_v16  ;;  %v2502_v59 = vld [vmem:[#allocation8 + $0x2010] sm:$0xff] }
 0x26d   :  { %4844 = vmatpush1.bf16.msra.mxu0 %v4843_v5  ;;  %4974 = vmatprep.subr.bf16.mxu1 %v4973_v8  ;;  %v2435_v5 = vld [vmem:[#allocation2 + $0x38] sm:$0x7] }
 0x26e   :  { %4846 = vmatprep.subr.bf16.mxu0 %v4845_v40  ;;  %v2467_v8 = vld [vmem:[#allocation8 + $0x1ef8] sm:$0xff]  ;;  %v5051_v40 = vpack.c.bf16 %v2452_v31, %v2442_v25  ;;  %v2533_v31 = vld [vmem:[#allocation8 + $0x2108] sm:$0xff] }
 0x26f   :  { %v4861_v30 = vpack.c.bf16 %v2467_v8, %v2457_v4  ;;  %v2523_v25 = vld [vmem:[#allocation8 + $0x20b8] sm:$0xff]  ;;  %v2516_v4 = vld [vmem:[#allocation8 + $0x2080] sm:$0xff] }
 0x270   :  { %4976 = vmatpush1.bf16.msra.mxu1 %v4975_v21  ;;  %v2472_v21 = vld [vmem:[#allocation8 + $0x1f20] sm:$0xff] }
 0x271   :  { %4848 = vmatpush1.bf16.msra.mxu0 %v4847_v23  ;;  %4978 = vmatprep.subr.bf16.mxu1 %v4977_v24  ;;  %v2773_v23 = vrot.slane %v2435_v5, 3  ;;  %v2434_v24 = vld [vmem:[#allocation2 + $0x30] sm:$0x7]  ;;  %v2532_v8 = vld [vmem:[#allocation8 + $0x2100] sm:$0xff] }
 0x272   :  { %4850 = vmatprep.subr.bf16.mxu0 %v4849_v33  ;;  %v2466_v33 = vld [vmem:[#allocation8 + $0x1ef0] sm:$0xff]  ;;  %v2771_v50 = vrot.slane %v2434_v24, 3 }
 0x273   :  { %v4863_v51 = vpack.c.bf16 %v2466_v33, %v2456_v17  ;;  %v5910_v42 = vsel %vm2760_vm2, %v2769_v3, %v2773_v23  ;;  %v5065_v3 = vpack.c.bf16 %v2533_v31, %v2523_v25  ;;  %v2522_v5 = vld [vmem:[#allocation8 + $0x20b0] sm:$0xff]  ;;  %v2552_v23 = vld [vmem:[#allocation8 + $0x21a0] sm:$0xff]  ;;  %v2573_v33 = vld [vmem:[#allocation8 + $0x2248] sm:$0xff] }
 0x274   :  { %4980 = vmatpush1.bf16.msra.mxu1 %v4979_v39  ;;  %v5055_v39 = vpack.c.bf16 %v2472_v21, %v2462_v20  ;;  %v5916_v10 = vsel %vm2760_vm2, %v2767_v16, %v2771_v50  ;;  %v5067_v16 = vpack.c.bf16 %v2532_v8, %v2522_v5  ;;  %v2536_v20 = vld [vmem:[#allocation8 + $0x2120] sm:$0xff]  ;;  %v2542_v21 = vld [vmem:[#allocation8 + $0x2150] sm:$0xff]  ;;  %v2623_v5 = vld [vmem:[#allocation8 + $0x23d8] sm:$0xff] }
 0x275   :  { %4852 = vmatpush1.bf16.msra.mxu0 %v4851_v44  ;;  %4982 = vmatprep.subr.bf16.mxu1 %v4981_v45  ;;  %v5057_v44 = vpack.c.bf16 %v2493_v36, %v2483_v34  ;;  %v2476_v45 = vld [vmem:[#allocation8 + $0x1f40] sm:$0xff]  ;;  %v2557_v34 = vld [vmem:[#allocation8 + $0x21c8] sm:$0xff]  ;;  %v5071_v36 = vpack.c.bf16 %v2552_v23, %v2542_v21  ;;  %v2562_v50 = vld [vmem:[#allocation8 + $0x21f0] sm:$0xff] }
 0x276   :  { %4854 = vmatprep.subr.bf16.mxu0 %v4853_v47  ;;  %v2503_v47 = vld [vmem:[#allocation8 + $0x2018] sm:$0xff]  ;;  %v2633_v8 = vld [vmem:[#allocation8 + $0x2428] sm:$0xff] }
 0x277   :  { %v5061_v55 = vpack.c.bf16 %v2513_v52, %v2503_v47  ;;  %v2643_v21 = vld [vmem:[#allocation8 + $0x2478] sm:$0xff]  ;;  %v2653_v23 = vld [vmem:[#allocation8 + $0x24c8] sm:$0xff] }
 0x278   :  { %4984 = vmatpush1.bf16.msra.mxu1 %v4983_v7  ;;  %v4867_v7 = vpack.c.bf16 %v2486_v13, %v2476_v45  ;;  %v2566_v45 = vld [vmem:[#allocation8 + $0x2210] sm:$0xff]  ;;  %v2587_v13 = vld [vmem:[#allocation8 + $0x22b8] sm:$0xff] }
 0x279   :  { %4856 = vmatpush1.bf16.msra.mxu0 %v4855_v60  ;;  %5050 = vmatprep.subr.bf16.mxu1 %v5049_v62  ;;  %v2512_v60 = vld [vmem:[#allocation8 + $0x2060] sm:$0xff]  ;;  %v4869_v62 = vpack.c.bf16 %v2507_v56, %v2497_v54  ;;  %v5077_v54 = vpack.c.bf16 %v2593_v41, %v2583_v48 }
 0x27a   :  { %4858 = vmatprep.subr.bf16.mxu0 %v4857_v0  ;;  %v2527_v0 = vld [vmem:[#allocation8 + $0x20d8] sm:$0xff]  ;;  %v5063_v1 = vpack.c.bf16 %v2512_v60, %v2502_v59  ;;  %v2576_v56 = vld [vmem:[#allocation8 + $0x2260] sm:$0xff]  ;;  %v2613_v60 = vld [vmem:[#allocation8 + $0x2388] sm:$0xff] }
 0x27b   :  { %2929 = vmatmul.mubr.f32.vlgmr.msra.gmra.mrb[6].mxu1 %v5896_v15  ;;  %v2603_v59 = vld [vmem:[#allocation8 + $0x2338] sm:$0xff]  ;;  %v4887_v31 = vpack.c.bf16 %v2586_v58, %v2576_v56  ;;  %v2666_v56 = vld [vmem:[#allocation8 + $0x2530] sm:$0xff] }
 0x27c   :  { %2384 = vmatmul.mubr.f32.vlgmr.msra.gmra.mrb[6].mxu0 %v5847_v22  ;;  %5052 = vmatpush1.bf16.msra.mxu1 %v5051_v40  ;;  %v4865_v22 = vpack.c.bf16 %v2487_v38, %v2477_v35  ;;  %v2553_v40 = vld [vmem:[#allocation8 + $0x21a8] sm:$0xff]  ;;  %v2687_v58 = vld [vmem:[#allocation8 + $0x25d8] sm:$0xff] }
 0x27d   :  { %4860 = vmatpush1.bf16.msra.mxu0 %v4859_v18  ;;  %2934 = vmatprep.mubr.f32.mxu1 %v5901_v29  ;;  %v5069_v18 = vpack.c.bf16 %v2553_v40, %v2543_v19 }
 0x27e   :  { %4862 = vmatprep.subr.bf16.mxu0 %v4861_v30  ;;  %5054 = vmatprep.subr.bf16.mxu1 %v5053_v28  ;;  %v2546_v30 = vld [vmem:[#allocation8 + $0x2170] sm:$0xff]  ;;  %v2563_v28 = vld [vmem:[#allocation8 + $0x21f8] sm:$0xff] }
 0x27f   :  { %2935 = vmatmul.mubr.f32.gmra.mrb[8].mxu1 %v5906_v26  ;;  %2389 = vmatprep.mubr.f32.mxu0 %v5853_v49  ;;  %v2517_v49 = vld [vmem:[#allocation8 + $0x2088] sm:$0xff]  ;;  %v4879_v35 = vpack.c.bf16 %v2546_v30, %v2536_v20  ;;  %v5073_v38 = vpack.c.bf16 %v2573_v33, %v2563_v28  ;;  %v2626_v20 = vld [vmem:[#allocation8 + $0x23f0] sm:$0xff]  ;;  %v2647_v30 = vld [vmem:[#allocation8 + $0x2498] sm:$0xff] }
 0x280   :  { %5056 = vmatpush1.bf16.msra.mxu1 %v5055_v39  ;;  %2940 = vmatprep.mubr.f32.mxu1 %v5910_v42  ;;  %v4873_v11 = vpack.c.bf16 %v2527_v0, %v2517_v49  ;;  %v2556_v39 = vld [vmem:[#allocation8 + $0x21c0] sm:$0xff]  ;;  %v5081_v49 = vpack.c.bf16 %v2613_v60, %v2603_v59 }
 0x281   :  { %4864 = vmatpush1.bf16.msra.mxu0 %v4863_v51  ;;  %5058 = vmatprep.subr.bf16.mxu1 %v5057_v44  ;;  %v2572_v51 = vld [vmem:[#allocation8 + $0x2240] sm:$0xff]  ;;  %v4883_v52 = vpack.c.bf16 %v2566_v45, %v2556_v39  ;;  %v2646_v39 = vld [vmem:[#allocation8 + $0x2490] sm:$0xff]  ;;  %v2667_v45 = vld [vmem:[#allocation8 + $0x2538] sm:$0xff] }
 0x282   :  { %4866 = vmatprep.subr.bf16.mxu0 %v4865_v22  ;;  %2390 = vmatmul.mubr.f32.gmra.mrb[8].mxu0 %v5857_v57  ;;  %v2526_v57 = vld [vmem:[#allocation8 + $0x20d0] sm:$0xff]  ;;  %v2577_v22 = vld [vmem:[#allocation8 + $0x2268] sm:$0xff]  ;;  %v5075_v47 = vpack.c.bf16 %v2572_v51, %v2562_v50  ;;  %v2596_v0 = vld [vmem:[#allocation8 + $0x2300] sm:$0xff] }
 0x283   :  { %2941 = vmatmul.mubr.f32.gmra.mrb[10].mxu1 %v5916_v10  ;;  %2395 = vmatprep.mubr.f32.mxu0 %v5863_v61  ;;  %v2547_v61 = vld [vmem:[#allocation8 + $0x2178] sm:$0xff]  ;;  %v4875_v17 = vpack.c.bf16 %v2526_v57, %v2516_v4  ;;  %v2606_v4 = vld [vmem:[#allocation8 + $0x2350] sm:$0xff]  ;;  %v2673_v51 = vld [vmem:[#allocation8 + $0x2568] sm:$0xff] }
 0x284   :  { %5060 = vmatpush1.bf16.msra.mxu1 %v5059_v6  ;;  %3094 = vmatprep.mubr.f32.mxu1 %v5890_v12  ;;  %v4877_v24 = vpack.c.bf16 %v2547_v61, %v2537_v32  ;;  %v2582_v6 = vld [vmem:[#allocation8 + $0x2290] sm:$0xff]  ;;  %v2627_v57 = vld [vmem:[#allocation8 + $0x23f8] sm:$0xff]  ;;  %v4891_v40 = vpack.c.bf16 %v2606_v4, %v2596_v0  ;;  %v5085_v32 = vpack.c.bf16 %v2633_v8, %v2623_v5  ;;  %v2616_v61 = vld [vmem:[#allocation8 + $0x23a0] sm:$0xff] }
 0x285   :  { %4868 = vmatpush1.bf16.msra.mxu0 %v4867_v7  ;;  %5062 = vmatprep.subr.bf16.mxu1 %v5061_v55  ;;  %v2592_v7 = vld [vmem:[#allocation8 + $0x22e0] sm:$0xff]  ;;  %v4885_v55 = vpack.c.bf16 %v2587_v13, %v2577_v22  ;;  %v4895_v33 = vpack.c.bf16 %v2626_v20, %v2616_v61  ;;  %v2663_v50 = vld [vmem:[#allocation8 + $0x2518] sm:$0xff]  ;;  %v2686_v0 = vld [vmem:[#allocation8 + $0x25d0] sm:$0xff] }
 0x286   :  { %4870 = vmatprep.subr.bf16.mxu0 %v4869_v62  ;;  %2396 = vmatmul.mubr.f32.gmra.mrb[10].mxu0 %v5866_v37  ;;  %v2567_v37 = vld [vmem:[#allocation8 + $0x2218] sm:$0xff]  ;;  %v2597_v62 = vld [vmem:[#allocation8 + $0x2308] sm:$0xff]  ;;  %v5079_v25 = vpack.c.bf16 %v2592_v7, %v2582_v6  ;;  %v5093_v22 = vpack.c.bf16 %v2673_v51, %v2663_v50  ;;  %v2656_v13 = vld [vmem:[#allocation8 + $0x24e0] sm:$0xff] }
 0x287   :  { %2845 = vmatprep.mubr.f32.mxu0 %v5890_v12  ;;  %v4881_v44 = vpack.c.bf16 %v2567_v37, %v2557_v34  ;;  %v5089_v34 = vpack.c.bf16 %v2653_v23, %v2643_v21  ;;  %v2636_v37 = vld [vmem:[#allocation8 + $0x2440] sm:$0xff]  ;;  %v2683_v6 = vld [vmem:[#allocation8 + $0x25b8] sm:$0xff]  ;;  %v2693_v7 = vld [vmem:[#allocation8 + $0x2608] sm:$0xff]  ;;  %v4903_v60 = vpack.c.bf16 %v2666_v56, %v2656_v13 }
 0x288   :  { %5064 = vmatpush1.bf16.msra.mxu1 %v5063_v1  ;;  %v2602_v1 = vld [vmem:[#allocation8 + $0x2330] sm:$0xff]  ;;  %v4899_v41 = vpack.c.bf16 %v2646_v39, %v2636_v37  ;;  %v2707_v4 = vld [vmem:[#allocation8 + $0x2678] sm:$0xff] }
 0x289   :  { %4872 = vmatpush1.bf16.msra.mxu0 %v4871_v2  ;;  %5066 = vmatprep.subr.bf16.mxu1 %v5065_v3  ;;  %v2612_v2 = vld [vmem:[#allocation8 + $0x2380] sm:$0xff]  ;;  %v4889_v3 = vpack.c.bf16 %v2607_v63, %v2597_v62  ;;  %v5097_v62 = vpack.c.bf16 %v2693_v7, %v2683_v6  ;;  %v2706_v61 = vld [vmem:[#allocation8 + $0x2670] sm:$0xff]  ;;  %v2727_v20 = vld [vmem:[#allocation8 + $0x2718] sm:$0xff] }
 0x28a   :  { %4874 = vmatprep.subr.bf16.mxu0 %v4873_v11  ;;  %v2617_v11 = vld [vmem:[#allocation8 + $0x23a8] sm:$0xff]  ;;  %v5083_v19 = vpack.c.bf16 %v2612_v2, %v2602_v1  ;;  %v2676_v63 = vld [vmem:[#allocation8 + $0x2580] sm:$0xff]  ;;  %v2703_v1 = vld [vmem:[#allocation8 + $0x2658] sm:$0xff] }
 0x28b   :  { %v2713_v2 = vld [vmem:[#allocation8 + $0x26a8] sm:$0xff]  ;;  %v4907_v8 = vpack.c.bf16 %v2686_v0, %v2676_v63  ;;  %v2726_v37 = vld [vmem:[#allocation8 + $0x2710] sm:$0xff]  ;;  %v2747_v39 = vld [vmem:[#allocation8 + $0x27b8] sm:$0xff] }
 0x28c   :  { %5068 = vmatpush1.bf16.msra.mxu1 %v5067_v16  ;;  %v2622_v16 = vld [vmem:[#allocation8 + $0x23d0] sm:$0xff]  ;;  %v2440_v7 = vld [vmem:[#allocation8 + $0x1e20] sm:$0xff] }
 0x28d   :  { %4876 = vmatpush1.bf16.msra.mxu0 %v4875_v17  ;;  %5070 = vmatprep.subr.bf16.mxu1 %v5069_v18  ;;  %v2632_v17 = vld [vmem:[#allocation8 + $0x2420] sm:$0xff]  ;;  %v4893_v18 = vpack.c.bf16 %v2627_v57, %v2617_v11  ;;  %v5101_v11 = vpack.c.bf16 %v2713_v2, %v2703_v1  ;;  %v2746_v13 = vld [vmem:[#allocation8 + $0x27b0] sm:$0xff] }
 0x28e   :  { %4878 = vmatprep.subr.bf16.mxu0 %v4877_v24  ;;  %v2637_v24 = vld [vmem:[#allocation8 + $0x2448] sm:$0xff]  ;;  %v5087_v28 = vpack.c.bf16 %v2632_v17, %v2622_v16  ;;  %v2696_v57 = vld [vmem:[#allocation8 + $0x2620] sm:$0xff]  ;;  %v2723_v16 = vld [vmem:[#allocation8 + $0x26f8] sm:$0xff] }
 0x28f   :  { %v2733_v17 = vld [vmem:[#allocation8 + $0x2748] sm:$0xff]  ;;  %v4911_v23 = vpack.c.bf16 %v2706_v61, %v2696_v57  ;;  %v2460_v63 = vld [vmem:[#allocation8 + $0x1ec0] sm:$0xff] }
 0x290   :  { %5072 = vmatpush1.bf16.msra.mxu1 %v5071_v36  ;;  %v2642_v36 = vld [vmem:[#allocation8 + $0x2470] sm:$0xff]  ;;  %v2480_v2 = vld [vmem:[#allocation8 + $0x1f60] sm:$0xff] }
 0x291   :  { %4880 = vmatpush1.bf16.msra.mxu0 %v4879_v35  ;;  %5074 = vmatprep.subr.bf16.mxu1 %v5073_v38  ;;  %v2652_v35 = vld [vmem:[#allocation8 + $0x24c0] sm:$0xff]  ;;  %v4897_v38 = vpack.c.bf16 %v2647_v30, %v2637_v24  ;;  %v5105_v24 = vpack.c.bf16 %v2733_v17, %v2723_v16 }
 0x292   :  { %4882 = vmatprep.subr.bf16.mxu0 %v4881_v44  ;;  %v2657_v44 = vld [vmem:[#allocation8 + $0x24e8] sm:$0xff]  ;;  %v5091_v48 = vpack.c.bf16 %v2652_v35, %v2642_v36  ;;  %v2716_v30 = vld [vmem:[#allocation8 + $0x26c0] sm:$0xff]  ;;  %v2743_v36 = vld [vmem:[#allocation8 + $0x2798] sm:$0xff] }
 0x293   :  { %v2753_v35 = vld [vmem:[#allocation8 + $0x27e8] sm:$0xff]  ;;  %v4915_v51 = vpack.c.bf16 %v2726_v37, %v2716_v30  ;;  %v2500_v57 = vld [vmem:[#allocation8 + $0x2000] sm:$0xff] }
 0x294   :  { %5076 = vmatpush1.bf16.msra.mxu1 %v5075_v47  ;;  %v2662_v47 = vld [vmem:[#allocation8 + $0x2510] sm:$0xff]  ;;  %v2520_v17 = vld [vmem:[#allocation8 + $0x20a0] sm:$0xff] }
 0x295   :  { %4884 = vmatpush1.bf16.msra.mxu0 %v4883_v52  ;;  %5078 = vmatprep.subr.bf16.mxu1 %v5077_v54  ;;  %v2672_v52 = vld [vmem:[#allocation8 + $0x2560] sm:$0xff]  ;;  %v4901_v54 = vpack.c.bf16 %v2667_v45, %v2657_v44  ;;  %v5109_v44 = vpack.c.bf16 %v2753_v35, %v2743_v36  ;;  %v2742_v45 = vld [vmem:[#allocation8 + $0x2790] sm:$0xff] }
 0x296   :  { %4886 = vmatprep.subr.bf16.mxu0 %v4885_v55  ;;  %v2677_v55 = vld [vmem:[#allocation8 + $0x2588] sm:$0xff]  ;;  %v5095_v59 = vpack.c.bf16 %v2672_v52, %v2662_v47  ;;  %v2451_v52 = vld [vmem:[#allocation8 + $0x1e78] sm:$0xff]  ;;  %v2540_v30 = vld [vmem:[#allocation8 + $0x2140] sm:$0xff] }
 0x297   :  { %v2441_v47 = vld [vmem:[#allocation8 + $0x1e28] sm:$0xff]  ;;  %v2560_v35 = vld [vmem:[#allocation8 + $0x21e0] sm:$0xff] }
 0x298   :  { %5080 = vmatpush1.bf16.msra.mxu1 %v5079_v25  ;;  %v2682_v25 = vld [vmem:[#allocation8 + $0x25b0] sm:$0xff]  ;;  %v4985_v6 = vpack.c.bf16 %v2451_v52, %v2441_v47  ;;  %v2600_v52 = vld [vmem:[#allocation8 + $0x2320] sm:$0xff] }
 0x299   :  { %4888 = vmatpush1.bf16.msra.mxu0 %v4887_v31  ;;  %5082 = vmatprep.subr.bf16.mxu1 %v5081_v49  ;;  %v2692_v31 = vld [vmem:[#allocation8 + $0x2600] sm:$0xff]  ;;  %v4905_v49 = vpack.c.bf16 %v2687_v58, %v2677_v55  ;;  %v2450_v55 = vld [vmem:[#allocation8 + $0x1e70] sm:$0xff]  ;;  %v2461_v58 = vld [vmem:[#allocation8 + $0x1ec8] sm:$0xff] }
 0x29a   :  { %4890 = vmatprep.subr.bf16.mxu0 %v4889_v3  ;;  %v2697_v3 = vld [vmem:[#allocation8 + $0x2628] sm:$0xff]  ;;  %v5099_v5 = vpack.c.bf16 %v2692_v31, %v2682_v25  ;;  %v2470_v25 = vld [vmem:[#allocation8 + $0x1f10] sm:$0xff] }
 0x29b   :  { %v2481_v31 = vld [vmem:[#allocation8 + $0x1f68] sm:$0xff]  ;;  %v4991_v0 = vpack.c.bf16 %v2470_v25, %v2460_v63 }
 0x29c   :  { %5084 = vmatpush1.bf16.msra.mxu1 %v5083_v19  ;;  %v2702_v19 = vld [vmem:[#allocation8 + $0x2650] sm:$0xff] }
 0x29d   :  { %4892 = vmatpush1.bf16.msra.mxu0 %v4891_v40  ;;  %5086 = vmatprep.subr.bf16.mxu1 %v5085_v32  ;;  %v2712_v40 = vld [vmem:[#allocation8 + $0x26a0] sm:$0xff]  ;;  %v4909_v32 = vpack.c.bf16 %v2707_v4, %v2697_v3  ;;  %v2490_v3 = vld [vmem:[#allocation8 + $0x1fb0] sm:$0xff]  ;;  %v2501_v4 = vld [vmem:[#allocation8 + $0x2008] sm:$0xff] }
 0x29e   :  { %4894 = vmatprep.subr.bf16.mxu0 %v4893_v18  ;;  %v2717_v18 = vld [vmem:[#allocation8 + $0x26c8] sm:$0xff]  ;;  %v5103_v21 = vpack.c.bf16 %v2712_v40, %v2702_v19  ;;  %v2510_v19 = vld [vmem:[#allocation8 + $0x2050] sm:$0xff] }
 0x29f   :  { %v2521_v40 = vld [vmem:[#allocation8 + $0x20a8] sm:$0xff]  ;;  %v4999_v61 = vpack.c.bf16 %v2510_v19, %v2500_v57 }
 0x2a0   :  { %5088 = vmatpush1.bf16.msra.mxu1 %v5087_v28  ;;  %v2722_v28 = vld [vmem:[#allocation8 + $0x26f0] sm:$0xff] }
 0x2a1   :  { %4896 = vmatpush1.bf16.msra.mxu0 %v4895_v33  ;;  %5090 = vmatprep.subr.bf16.mxu1 %v5089_v34  ;;  %v2732_v33 = vld [vmem:[#allocation8 + $0x2740] sm:$0xff]  ;;  %v4913_v34 = vpack.c.bf16 %v2727_v20, %v2717_v18  ;;  %v2530_v18 = vld [vmem:[#allocation8 + $0x20f0] sm:$0xff]  ;;  %v2541_v20 = vld [vmem:[#allocation8 + $0x2148] sm:$0xff] }
 0x2a2   :  { %4898 = vmatprep.subr.bf16.mxu0 %v4897_v38  ;;  %v2737_v38 = vld [vmem:[#allocation8 + $0x2768] sm:$0xff]  ;;  %v5107_v50 = vpack.c.bf16 %v2732_v33, %v2722_v28  ;;  %v2550_v28 = vld [vmem:[#allocation8 + $0x2190] sm:$0xff] }
 0x2a3   :  { %v2561_v33 = vld [vmem:[#allocation8 + $0x21e8] sm:$0xff]  ;;  %v5007_v37 = vpack.c.bf16 %v2550_v28, %v2540_v30 }
 0x2a4   :  { %5092 = vmatpush1.bf16.msra.mxu1 %v5091_v48  ;;  %v2752_v48 = vld [vmem:[#allocation8 + $0x27e0] sm:$0xff] }
 0x2a5   :  { %4900 = vmatpush1.bf16.msra.mxu0 %v4899_v41  ;;  %5094 = vmatprep.subr.bf16.mxu1 %v5093_v22  ;;  %v4917_v41 = vpack.c.bf16 %v2747_v39, %v2737_v38  ;;  %v2736_v22 = vld [vmem:[#allocation8 + $0x2760] sm:$0xff]  ;;  %v2570_v38 = vld [vmem:[#allocation8 + $0x2230] sm:$0xff]  ;;  %v2581_v39 = vld [vmem:[#allocation8 + $0x2288] sm:$0xff] }
 0x2a6   :  { %4902 = vmatprep.subr.bf16.mxu0 %v4901_v54  ;;  %v5111_v54 = vpack.c.bf16 %v2752_v48, %v2742_v45  ;;  %v4919_v56 = vpack.c.bf16 %v2746_v13, %v2736_v22  ;;  %v2580_v45 = vld [vmem:[#allocation8 + $0x2280] sm:$0xff]  ;;  %v2590_v48 = vld [vmem:[#allocation8 + $0x22d0] sm:$0xff]  ;;  %v2611_v22 = vld [vmem:[#allocation8 + $0x2378] sm:$0xff] }
 0x2a7   :  { %v5015_v13 = vpack.c.bf16 %v2590_v48, %v2580_v45 }
 0x2a8   :  { %5096 = vmatpush1.bf16.msra.mxu1 %v5095_v59  ;;  %v2471_v59 = vld [vmem:[#allocation8 + $0x1f18] sm:$0xff] }
 0x2a9   :  { %4904 = vmatpush1.bf16.msra.mxu0 %v4903_v60  ;;  %5098 = vmatprep.subr.bf16.mxu1 %v5097_v62  ;;  %v4987_v60 = vpack.c.bf16 %v2450_v55, %v2440_v7  ;;  %v4989_v62 = vpack.c.bf16 %v2471_v59, %v2461_v58  ;;  %v2620_v58 = vld [vmem:[#allocation8 + $0x23c0] sm:$0xff]  ;;  %v2630_v59 = vld [vmem:[#allocation8 + $0x2410] sm:$0xff] }
 0x2aa   :  { %4906 = vmatprep.subr.bf16.mxu0 %v4905_v49  ;;  %v2491_v49 = vld [vmem:[#allocation8 + $0x1fb8] sm:$0xff]  ;;  %v5023_v63 = vpack.c.bf16 %v2630_v59, %v2620_v58 }
 0x2ab   :  { %v4993_v1 = vpack.c.bf16 %v2491_v49, %v2481_v31  ;;  %v2640_v31 = vld [vmem:[#allocation8 + $0x2460] sm:$0xff]  ;;  %v2650_v49 = vld [vmem:[#allocation8 + $0x24b0] sm:$0xff] }
 0x2ac   :  { %5100 = vmatpush1.bf16.msra.mxu1 %v5099_v5  ;;  %v2511_v5 = vld [vmem:[#allocation8 + $0x2058] sm:$0xff] }
 0x2ad   :  { %4908 = vmatpush1.bf16.msra.mxu0 %v4907_v8  ;;  %5102 = vmatprep.subr.bf16.mxu1 %v5101_v11  ;;  %v4995_v8 = vpack.c.bf16 %v2490_v3, %v2480_v2  ;;  %v4997_v11 = vpack.c.bf16 %v2511_v5, %v2501_v4  ;;  %v5027_v2 = vpack.c.bf16 %v2650_v49, %v2640_v31  ;;  %v2660_v4 = vld [vmem:[#allocation8 + $0x2500] sm:$0xff]  ;;  %v2670_v5 = vld [vmem:[#allocation8 + $0x2550] sm:$0xff] }
 0x2ae   :  { %4910 = vmatprep.subr.bf16.mxu0 %v4909_v32  ;;  %v2531_v32 = vld [vmem:[#allocation8 + $0x20f8] sm:$0xff]  ;;  %v5031_v57 = vpack.c.bf16 %v2670_v5, %v2660_v4 }
 0x2af   :  { %v5001_v16 = vpack.c.bf16 %v2531_v32, %v2521_v40  ;;  %v2680_v40 = vld [vmem:[#allocation8 + $0x25a0] sm:$0xff]  ;;  %v2690_v32 = vld [vmem:[#allocation8 + $0x25f0] sm:$0xff] }
 0x2b0   :  { %5104 = vmatpush1.bf16.msra.mxu1 %v5103_v21  ;;  %v2551_v21 = vld [vmem:[#allocation8 + $0x2198] sm:$0xff] }
 0x2b1   :  { %4912 = vmatpush1.bf16.msra.mxu0 %v4911_v23  ;;  %5106 = vmatprep.subr.bf16.mxu1 %v5105_v24  ;;  %v5003_v23 = vpack.c.bf16 %v2530_v18, %v2520_v17  ;;  %v5005_v24 = vpack.c.bf16 %v2551_v21, %v2541_v20  ;;  %v5035_v17 = vpack.c.bf16 %v2690_v32, %v2680_v40  ;;  %v2700_v20 = vld [vmem:[#allocation8 + $0x2640] sm:$0xff]  ;;  %v2710_v21 = vld [vmem:[#allocation8 + $0x2690] sm:$0xff] }
 0x2b2   :  { %4914 = vmatprep.subr.bf16.mxu0 %v4913_v34  ;;  %v2571_v34 = vld [vmem:[#allocation8 + $0x2238] sm:$0xff]  ;;  %v5039_v30 = vpack.c.bf16 %v2710_v21, %v2700_v20 }
 0x2b3   :  { %v5009_v36 = vpack.c.bf16 %v2571_v34, %v2561_v33  ;;  %v2720_v33 = vld [vmem:[#allocation8 + $0x26e0] sm:$0xff]  ;;  %v2730_v34 = vld [vmem:[#allocation8 + $0x2730] sm:$0xff] }
 0x2b4   :  { %5108 = vmatpush1.bf16.msra.mxu1 %v5107_v50  ;;  %v2591_v50 = vld [vmem:[#allocation8 + $0x22d8] sm:$0xff] }
 0x2b5   :  { %4916 = vmatpush1.bf16.msra.mxu0 %v4915_v51  ;;  %5110 = vmatprep.subr.bf16.mxu1 %v5109_v44  ;;  %v5011_v51 = vpack.c.bf16 %v2570_v38, %v2560_v35  ;;  %v5013_v44 = vpack.c.bf16 %v2591_v50, %v2581_v39  ;;  %v5043_v35 = vpack.c.bf16 %v2730_v34, %v2720_v33  ;;  %v2740_v39 = vld [vmem:[#allocation8 + $0x2780] sm:$0xff]  ;;  %v2750_v50 = vld [vmem:[#allocation8 + $0x27d0] sm:$0xff] }
 0x2b6   :  { %4918 = vmatprep.subr.bf16.mxu0 %v4917_v41  ;;  %v2601_v41 = vld [vmem:[#allocation8 + $0x2328] sm:$0xff]  ;;  %v5047_v45 = vpack.c.bf16 %v2750_v50, %v2740_v39  ;;  %v2584_v34 = vld [vmem:[#allocation8 + $0x22a0] sm:$0xff] }
 0x2b7   :  { %v5017_v47 = vpack.c.bf16 %v2611_v22, %v2601_v41  ;;  %v2444_v41 = vld [vmem:[#allocation8 + $0x1e40] sm:$0xff]  ;;  %v2454_v22 = vld [vmem:[#allocation8 + $0x1e90] sm:$0xff] }
 0x2b8   :  { %5112 = vmatpush1.bf16.msra.mxu1 %v5111_v54  ;;  %v2610_v54 = vld [vmem:[#allocation8 + $0x2370] sm:$0xff]  ;;  %v2604_v50 = vld [vmem:[#allocation8 + $0x2340] sm:$0xff] }
 0x2b9   :  { %4920 = vmatpush1.bf16.msra.mxu0 %v4919_v56  ;;  %v2621_v56 = vld [vmem:[#allocation8 + $0x23c8] sm:$0xff]  ;;  %v5019_v7 = vpack.c.bf16 %v2610_v54, %v2600_v52  ;;  %v5115_v52 = vpack.c.bf16 %v2454_v22, %v2444_v41  ;;  %v2624_v22 = vld [vmem:[#allocation8 + $0x23e0] sm:$0xff] }
 0x2ba   :  { %4986 = vmatprep.subr.bf16.mxu0 %v4985_v6  ;;  %v2631_v6 = vld [vmem:[#allocation8 + $0x2418] sm:$0xff] }
 0x2bb   :  { %3095 = vmatmul.mubr.f32.vlgmr.msra.gmra.mrb[12].mxu1 %v5896_v15  ;;  %v5021_v55 = vpack.c.bf16 %v2631_v6, %v2621_v56  ;;  %v2464_v56 = vld [vmem:[#allocation8 + $0x1ee0] sm:$0xff]  ;;  %v2474_v6 = vld [vmem:[#allocation8 + $0x1f30] sm:$0xff] }
 0x2bc   :  { %2846 = vmatmul.mubr.f32.vlgmr.msra.gmra.mrb[12].mxu0 %v5896_v15  ;;  %3100 = vmatprep.mubr.f32.mxu1 %v5901_v29  ;;  %v5119_v58 = vpack.c.bf16 %v2474_v6, %v2464_v56  ;;  %v2644_v6 = vld [vmem:[#allocation8 + $0x2480] sm:$0xff] }
 0x2bd   :  { %4988 = vmatpush1.bf16.msra.mxu0 %v4987_v60  ;;  %2851 = vmatprep.mubr.f32.mxu0 %v5901_v29  ;;  %v2641_v60 = vld [vmem:[#allocation8 + $0x2468] sm:$0xff] }
 0x2be   :  { %4990 = vmatprep.subr.bf16.mxu0 %v4989_v62  ;;  %v2651_v62 = vld [vmem:[#allocation8 + $0x24b8] sm:$0xff] }
 0x2bf   :  { %3101 = vmatmul.mubr.f32.gmra.mrb[14].mxu1 %v5906_v26  ;;  %v5025_v25 = vpack.c.bf16 %v2651_v62, %v2641_v60  ;;  %v2484_v60 = vld [vmem:[#allocation8 + $0x1f80] sm:$0xff]  ;;  %v2494_v62 = vld [vmem:[#allocation8 + $0x1fd0] sm:$0xff] }
 0x2c0   :  { %2852 = vmatmul.mubr.f32.gmra.mrb[14].mxu0 %v5906_v26  ;;  %3106 = vmatprep.mubr.f32.mxu1 %v5910_v42  ;;  %v5123_v31 = vpack.c.bf16 %v2494_v62, %v2484_v60  ;;  %v2664_v62 = vld [vmem:[#allocation8 + $0x2520] sm:$0xff] }
 0x2c1   :  { %4992 = vmatpush1.bf16.msra.mxu0 %v4991_v0  ;;  %2857 = vmatprep.mubr.f32.mxu0 %v5910_v42  ;;  %v2661_v0 = vld [vmem:[#allocation8 + $0x2508] sm:$0xff] }
 0x2c2   :  { %4994 = vmatprep.subr.bf16.mxu0 %v4993_v1  ;;  %v2671_v1 = vld [vmem:[#allocation8 + $0x2558] sm:$0xff] }
 0x2c3   :  { %3107 = vmatmul.mubr.f32.gmra.mrb[16].mxu1 %v5916_v10  ;;  %v5029_v3 = vpack.c.bf16 %v2671_v1, %v2661_v0  ;;  %v2504_v0 = vld [vmem:[#allocation8 + $0x2020] sm:$0xff]  ;;  %v2514_v1 = vld [vmem:[#allocation8 + $0x2070] sm:$0xff] }
 0x2c4   :  { %2858 = vmatmul.mubr.f32.gmra.mrb[16].mxu0 %v5916_v10  ;;  %v5127_v4 = vpack.c.bf16 %v2514_v1, %v2504_v0  ;;  %v2694_v1 = vld [vmem:[#allocation8 + $0x2610] sm:$0xff] }
 0x2c5   :  { %4996 = vmatpush1.bf16.msra.mxu0 %v4995_v8  ;;  %3011 = vmatprep.mubr.f32.mxu0 %v5890_v12  ;;  %v2681_v8 = vld [vmem:[#allocation8 + $0x25a8] sm:$0xff] }
 0x2c6   :  { %4998 = vmatprep.subr.bf16.mxu0 %v4997_v11  ;;  %v2691_v11 = vld [vmem:[#allocation8 + $0x25f8] sm:$0xff] }
 0x2c7   :  { %v5033_v19 = vpack.c.bf16 %v2691_v11, %v2681_v8  ;;  %v2524_v8 = vld [vmem:[#allocation8 + $0x20c0] sm:$0xff]  ;;  %v2534_v11 = vld [vmem:[#allocation8 + $0x2110] sm:$0xff] }
 0x2c8   :  { %v5131_v40 = vpack.c.bf16 %v2534_v11, %v2524_v8  ;;  %v3393_v8 = vld [vmem:[#allocation9 + $0x88] sm:$0xff]  ;;  %v3376_v11 = vld [vmem:[#allocation9] sm:$0xff] }
 0x2c9   :  { %5000 = vmatpush1.bf16.msra.mxu0 %v4999_v61  ;;  %v2701_v61 = vld [vmem:[#allocation8 + $0x2648] sm:$0xff] }
 0x2ca   :  { %5002 = vmatprep.subr.bf16.mxu0 %v5001_v16  ;;  %v2711_v16 = vld [vmem:[#allocation8 + $0x2698] sm:$0xff] }
 0x2cb   :  { %v5037_v18 = vpack.c.bf16 %v2711_v16, %v2701_v61  ;;  %v2544_v61 = vld [vmem:[#allocation8 + $0x2160] sm:$0xff]  ;;  %v2554_v16 = vld [vmem:[#allocation8 + $0x21b0] sm:$0xff] }
 0x2cc   :  { %v5135_v20 = vpack.c.bf16 %v2554_v16, %v2544_v61 }
 0x2cd   :  { %5004 = vmatpush1.bf16.msra.mxu0 %v5003_v23  ;;  %v2721_v23 = vld [vmem:[#allocation8 + $0x26e8] sm:$0xff] }
 0x2ce   :  { %5006 = vmatprep.subr.bf16.mxu0 %v5005_v24  ;;  %v2731_v24 = vld [vmem:[#allocation8 + $0x2738] sm:$0xff] }
 0x2cf   :  { %v5041_v28 = vpack.c.bf16 %v2731_v24, %v2721_v23  ;;  %v2564_v23 = vld [vmem:[#allocation8 + $0x2200] sm:$0xff]  ;;  %v2585_v24 = vld [vmem:[#allocation8 + $0x22a8] sm:$0xff] }
 0x2d1   :  { %5008 = vmatpush1.bf16.msra.mxu0 %v5007_v37  ;;  %v2741_v37 = vld [vmem:[#allocation8 + $0x2788] sm:$0xff] }
 0x2d2   :  { %5010 = vmatprep.subr.bf16.mxu0 %v5009_v36  ;;  %v2751_v36 = vld [vmem:[#allocation8 + $0x27d8] sm:$0xff] }
 0x2d3   :  { %v5045_v38 = vpack.c.bf16 %v2751_v36, %v2741_v37  ;;  %v2594_v37 = vld [vmem:[#allocation8 + $0x22f0] sm:$0xff]  ;;  %v2605_v36 = vld [vmem:[#allocation8 + $0x2348] sm:$0xff] }
 0x2d5   :  { %5012 = vmatpush1.bf16.msra.mxu0 %v5011_v51  ;;  %v2445_v51 = vld [vmem:[#allocation8 + $0x1e48] sm:$0xff] }
 0x2d6   :  { %5014 = vmatprep.subr.bf16.mxu0 %v5013_v44  ;;  %v2455_v44 = vld [vmem:[#allocation8 + $0x1e98] sm:$0xff] }
 0x2d7   :  { %v5113_v48 = vpack.c.bf16 %v2455_v44, %v2445_v51  ;;  %v2614_v51 = vld [vmem:[#allocation8 + $0x2390] sm:$0xff]  ;;  %v2625_v44 = vld [vmem:[#allocation8 + $0x23e8] sm:$0xff] }
 0x2d9   :  { %5016 = vmatpush1.bf16.msra.mxu0 %v5015_v13  ;;  %v2465_v13 = vld [vmem:[#allocation8 + $0x1ee8] sm:$0xff] }
 0x2da   :  { %5018 = vmatprep.subr.bf16.mxu0 %v5017_v47  ;;  %v2475_v47 = vld [vmem:[#allocation8 + $0x1f38] sm:$0xff] }
 0x2db   :  { %v5117_v54 = vpack.c.bf16 %v2475_v47, %v2465_v13  ;;  %v2634_v13 = vld [vmem:[#allocation8 + $0x2430] sm:$0xff]  ;;  %v2645_v47 = vld [vmem:[#allocation8 + $0x2488] sm:$0xff] }
 0x2dd   :  { %5020 = vmatpush1.bf16.msra.mxu0 %v5019_v7  ;;  %v2485_v7 = vld [vmem:[#allocation8 + $0x1f88] sm:$0xff] }
 0x2de   :  { %5022 = vmatprep.subr.bf16.mxu0 %v5021_v55  ;;  %v2495_v55 = vld [vmem:[#allocation8 + $0x1fd8] sm:$0xff] }
 0x2df   :  { %v5121_v59 = vpack.c.bf16 %v2495_v55, %v2485_v7  ;;  %v2654_v7 = vld [vmem:[#allocation8 + $0x24d0] sm:$0xff]  ;;  %v2665_v55 = vld [vmem:[#allocation8 + $0x2528] sm:$0xff] }
 0x2e1   :  { %5024 = vmatpush1.bf16.msra.mxu0 %v5023_v63  ;;  %v2505_v63 = vld [vmem:[#allocation8 + $0x2028] sm:$0xff] }
 0x2e2   :  { %5026 = vmatprep.subr.bf16.mxu0 %v5025_v25  ;;  %v2515_v25 = vld [vmem:[#allocation8 + $0x2078] sm:$0xff] }
 0x2e3   :  { %v5125_v49 = vpack.c.bf16 %v2515_v25, %v2505_v63  ;;  %v2674_v63 = vld [vmem:[#allocation8 + $0x2570] sm:$0xff]  ;;  %v2685_v25 = vld [vmem:[#allocation8 + $0x25c8] sm:$0xff] }
 0x2e4   :  { %v5159_v0 = vpack.c.bf16 %v2674_v63, %v2664_v62 }
 0x2e5   :  { %5028 = vmatpush1.bf16.msra.mxu0 %v5027_v2  ;;  %v2525_v2 = vld [vmem:[#allocation8 + $0x20c8] sm:$0xff] }
 0x2e6   :  { %5030 = vmatprep.subr.bf16.mxu0 %v5029_v3  ;;  %v2535_v3 = vld [vmem:[#allocation8 + $0x2118] sm:$0xff] }
 0x2e7   :  { %v5129_v5 = vpack.c.bf16 %v2535_v3, %v2525_v2  ;;  %v2705_v2 = vld [vmem:[#allocation8 + $0x2668] sm:$0xff]  ;;  %v2715_v3 = vld [vmem:[#allocation8 + $0x26b8] sm:$0xff] }
 0x2e9   :  { %5032 = vmatpush1.bf16.msra.mxu0 %v5031_v57  ;;  %v2545_v57 = vld [vmem:[#allocation8 + $0x2168] sm:$0xff] }
 0x2ea   :  { %5034 = vmatprep.subr.bf16.mxu0 %v5033_v19  ;;  %v2555_v19 = vld [vmem:[#allocation8 + $0x21b8] sm:$0xff] }
 0x2eb   :  { %v5133_v32 = vpack.c.bf16 %v2555_v19, %v2545_v57  ;;  %v3377_v19 = vld [vmem:[#allocation9 + $0x8] sm:$0xff] }
 0x2ec   :  { %v5179_v61 = vpack.c.bf16 %v3377_v19, %v3376_v11  ;;  %v3405_v11 = vld [vmem:[#allocation9 + $0xe8] sm:$0xff]  ;;  %v3388_v19 = vld [vmem:[#allocation9 + $0x60] sm:$0xff] }
 0x2ed   :  { %5036 = vmatpush1.bf16.msra.mxu0 %v5035_v17  ;;  %v2565_v17 = vld [vmem:[#allocation8 + $0x2208] sm:$0xff] }
 0x2ee   :  { %5038 = vmatprep.subr.bf16.mxu0 %v5037_v18  ;;  %v2575_v18 = vld [vmem:[#allocation8 + $0x2258] sm:$0xff] }
 0x2ef   :  { %v5137_v21 = vpack.c.bf16 %v2575_v18, %v2565_v17  ;;  %v3378_v17 = vld [vmem:[#allocation9 + $0x10] sm:$0xff]  ;;  %v3379_v18 = vld [vmem:[#allocation9 + $0x18] sm:$0xff] }
 0x2f1   :  { %5040 = vmatpush1.bf16.msra.mxu0 %v5039_v30  ;;  %v2595_v30 = vld [vmem:[#allocation8 + $0x22f8] sm:$0xff] }
 0x2f2   :  { %5042 = vmatprep.subr.bf16.mxu0 %v5041_v28  ;;  %v5141_v33 = vpack.c.bf16 %v2595_v30, %v2585_v24  ;;  %v2704_v24 = vld [vmem:[#allocation8 + $0x2660] sm:$0xff]  ;;  %v2714_v30 = vld [vmem:[#allocation8 + $0x26b0] sm:$0xff] }
 0x2f5   :  { %5044 = vmatpush1.bf16.msra.mxu0 %v5043_v35  ;;  %v2615_v35 = vld [vmem:[#allocation8 + $0x2398] sm:$0xff] }
 0x2f6   :  { %5046 = vmatprep.subr.bf16.mxu0 %v5045_v38  ;;  %v5143_v38 = vpack.c.bf16 %v2594_v37, %v2584_v34  ;;  %v5145_v39 = vpack.c.bf16 %v2615_v35, %v2605_v36  ;;  %v2735_v34 = vld [vmem:[#allocation8 + $0x2758] sm:$0xff]  ;;  %v3380_v36 = vld [vmem:[#allocation9 + $0x20] sm:$0xff]  ;;  %v3381_v35 = vld [vmem:[#allocation9 + $0x28] sm:$0xff] }
 0x2f9   :  { %5048 = vmatpush1.bf16.msra.mxu0 %v5047_v45  ;;  %v2635_v45 = vld [vmem:[#allocation8 + $0x2438] sm:$0xff] }
 0x2fa   :  { %5114 = vmatprep.subr.bf16.mxu0 %v5113_v48  ;;  %v5147_v48 = vpack.c.bf16 %v2614_v51, %v2604_v50  ;;  %v5149_v41 = vpack.c.bf16 %v2635_v45, %v2625_v44  ;;  %v2724_v50 = vld [vmem:[#allocation8 + $0x2700] sm:$0xff]  ;;  %v2734_v51 = vld [vmem:[#allocation8 + $0x2750] sm:$0xff]  ;;  %v5187_v44 = vpack.c.bf16 %v3381_v35, %v3380_v36  ;;  %v2745_v45 = vld [vmem:[#allocation8 + $0x27a8] sm:$0xff] }
 0x2fc   :  { %3012 = vmatmul.mubr.f32.vlgmr.msra.gmra.mrb[0].mxu0 %v5896_v15 }
 0x2fd   :  { %5116 = vmatpush1.bf16.msra.mxu0 %v5115_v52  ;;  %3017 = vmatprep.mubr.f32.mxu0 %v5901_v29  ;;  %v2655_v52 = vld [vmem:[#allocation8 + $0x24d8] sm:$0xff] }
 0x2fe   :  { %5118 = vmatprep.subr.bf16.mxu0 %v5117_v54  ;;  %v5151_v54 = vpack.c.bf16 %v2634_v13, %v2624_v22  ;;  %v5153_v56 = vpack.c.bf16 %v2655_v52, %v2645_v47  ;;  %v2744_v13 = vld [vmem:[#allocation8 + $0x27a0] sm:$0xff]  ;;  %v2754_v47 = vld [vmem:[#allocation8 + $0x27f0] sm:$0xff] }
 0x2ff   :  { %v5175_v52 = vpack.c.bf16 %v2754_v47, %v2744_v13 }
 0x300   :  { %3018 = vmatmul.mubr.f32.gmra.mrb[2].mxu0 %v5906_v26 }
 0x301   :  { %5120 = vmatpush1.bf16.msra.mxu0 %v5119_v58  ;;  %3023 = vmatprep.mubr.f32.mxu0 %v5910_v42  ;;  %v2675_v58 = vld [vmem:[#allocation8 + $0x2578] sm:$0xff] }
 0x302   :  { %5122 = vmatprep.subr.bf16.mxu0 %v5121_v59  ;;  %v5155_v59 = vpack.c.bf16 %v2654_v7, %v2644_v6  ;;  %v5157_v60 = vpack.c.bf16 %v2675_v58, %v2665_v55  ;;  %v3399_v6 = vld [vmem:[#allocation9 + $0xb8] sm:$0xff]  ;;  %v3382_v58 = vld [vmem:[#allocation9 + $0x30] sm:$0xff] }
 0x304   :  { %3024 = vmatmul.mubr.f32.gmra.mrb[4].mxu0 %v5916_v10 }
 0x305   :  { %5124 = vmatpush1.bf16.msra.mxu0 %v5123_v31  ;;  %3177 = vmatprep.mubr.f32.mxu0 %v5890_v12  ;;  %v2574_v12 = vld [vmem:[#allocation8 + $0x2250] sm:$0xff]  ;;  %v2695_v31 = vld [vmem:[#allocation8 + $0x2618] sm:$0xff] }
 0x306   :  { %5126 = vmatprep.subr.bf16.mxu0 %v5125_v49  ;;  %v5139_v28 = vpack.c.bf16 %v2574_v12, %v2564_v23  ;;  %v2684_v49 = vld [vmem:[#allocation8 + $0x25c0] sm:$0xff]  ;;  %v3397_v23 = vld [vmem:[#allocation9 + $0xa8] sm:$0xff]  ;;  %v5165_v12 = vpack.c.bf16 %v2715_v3, %v2705_v2  ;;  %v3386_v3 = vld [vmem:[#allocation9 + $0x50] sm:$0xff] }
 0x309   :  { %5128 = vmatpush1.bf16.msra.mxu0 %v5127_v4  ;;  %v5161_v4 = vpack.c.bf16 %v2695_v31, %v2685_v25  ;;  %v3385_v25 = vld [vmem:[#allocation9 + $0x48] sm:$0xff] }
 0x30a   :  { %5130 = vmatprep.subr.bf16.mxu0 %v5129_v5  ;;  %v3392_v5 = vld [vmem:[#allocation9 + $0x80] sm:$0xff] }
 0x30b   :  { %v5177_v57 = vpack.c.bf16 %v3393_v8, %v3392_v5  ;;  %v3404_v8 = vld [vmem:[#allocation9 + $0xe0] sm:$0xff] }
 0x30d   :  { %5132 = vmatpush1.bf16.msra.mxu0 %v5131_v40  ;;  %v3394_v40 = vld [vmem:[#allocation9 + $0x90] sm:$0xff]  ;;  %5178 = vmatprep.subr.bf16.mxu1 %v5177_v57  ;;  %v5201_v57 = vpack.c.bf16 %v3405_v11, %v3404_v8 }
 0x30e   :  { %5134 = vmatprep.subr.bf16.mxu0 %v5133_v32  ;;  %v3395_v32 = vld [vmem:[#allocation9 + $0x98] sm:$0xff]  ;;  %5180 = vmatpush3.bf16.msra.mxu1 %v5179_v61 }
 0x30f   :  { %v5181_v16 = vpack.c.bf16 %v3395_v32, %v3394_v40  ;;  %v3389_v40 = vld [vmem:[#allocation9 + $0x68] sm:$0xff]  ;;  %v3406_v32 = vld [vmem:[#allocation9 + $0xf0] sm:$0xff] }
 0x310   :  { %v5203_v61 = vpack.c.bf16 %v3389_v40, %v3388_v19 }
 0x311   :  { %5136 = vmatpush1.bf16.msra.mxu0 %v5135_v20  ;;  %v3396_v20 = vld [vmem:[#allocation9 + $0xa0] sm:$0xff]  ;;  %5182 = vmatprep.subr.bf16.mxu1 %v5181_v16  ;;  %v3407_v16 = vld [vmem:[#allocation9 + $0xf8] sm:$0xff] }
 0x312   :  { %5138 = vmatprep.subr.bf16.mxu0 %v5137_v21  ;;  %v5163_v21 = vpack.c.bf16 %v2694_v1, %v2684_v49  ;;  %v5185_v37 = vpack.c.bf16 %v3397_v23, %v3396_v20  ;;  %v3402_v49 = vld [vmem:[#allocation9 + $0xd0] sm:$0xff]  ;;  %v5205_v20 = vpack.c.bf16 %v3407_v16, %v3406_v32  ;;  %v3424_v23 = vld [vmem:[#allocation9 + $0x180] sm:$0xff] }
 0x315   :  { %5140 = vmatpush1.bf16.msra.mxu0 %v5139_v28  ;;  %v2725_v28 = vld [vmem:[#allocation8 + $0x2708] sm:$0xff] }
 0x316   :  { %5142 = vmatprep.subr.bf16.mxu0 %v5141_v33  ;;  %v5183_v33 = vpack.c.bf16 %v3379_v18, %v3378_v17  ;;  %v3390_v17 = vld [vmem:[#allocation9 + $0x70] sm:$0xff]  ;;  %v3391_v18 = vld [vmem:[#allocation9 + $0x78] sm:$0xff] }
 0x318   :  { %5184 = vmatpush3.bf16.msra.mxu1 %v5183_v33 }
 0x319   :  { %5144 = vmatpush1.bf16.msra.mxu0 %v5143_v38  ;;  %v5167_v38 = vpack.c.bf16 %v2714_v30, %v2704_v24  ;;  %5186 = vmatprep.subr.bf16.mxu1 %v5185_v37 }
 0x31a   :  { %5146 = vmatprep.subr.bf16.mxu0 %v5145_v39  ;;  %v5169_v39 = vpack.c.bf16 %v2735_v34, %v2725_v28 }
 0x31c   :  { %5188 = vmatpush3.bf16.msra.mxu1 %v5187_v44 }
 0x31d   :  { %5148 = vmatpush1.bf16.msra.mxu0 %v5147_v48  ;;  %v2755_v48 = vld [vmem:[#allocation8 + $0x27f8] sm:$0xff] }
 0x31e   :  { %5150 = vmatprep.subr.bf16.mxu0 %v5149_v41  ;;  %v5171_v41 = vpack.c.bf16 %v2734_v51, %v2724_v50  ;;  %v5173_v22 = vpack.c.bf16 %v2755_v48, %v2745_v45 }
 0x321   :  { %5152 = vmatpush1.bf16.msra.mxu0 %v5151_v54 }
 0x322   :  { %5154 = vmatprep.subr.bf16.mxu0 %v5153_v56  ;;  %v3398_v56 = vld [vmem:[#allocation9 + $0xb0] sm:$0xff] }
 0x323   :  { %v5189_v55 = vpack.c.bf16 %v3399_v6, %v3398_v56 }
 0x325   :  { %5156 = vmatpush1.bf16.msra.mxu0 %v5155_v59  ;;  %v3383_v59 = vld [vmem:[#allocation9 + $0x38] sm:$0xff]  ;;  %5190 = vmatprep.subr.bf16.mxu1 %v5189_v55 }
 0x326   :  { %5158 = vmatprep.subr.bf16.mxu0 %v5157_v60  ;;  %v5191_v60 = vpack.c.bf16 %v3383_v59, %v3382_v58 }
 0x328   :  { %5192 = vmatpush3.bf16.msra.mxu1 %v5191_v60 }
 0x329   :  { %5160 = vmatpush1.bf16.msra.mxu0 %v5159_v0  ;;  %v3403_v0 = vld [vmem:[#allocation9 + $0xd8] sm:$0xff] }
 0x32a   :  { %5162 = vmatprep.subr.bf16.mxu0 %v5161_v4  ;;  %v5197_v2 = vpack.c.bf16 %v3403_v0, %v3402_v49  ;;  %v3387_v4 = vld [vmem:[#allocation9 + $0x58] sm:$0xff] }
 0x32b   :  { %v5199_v5 = vpack.c.bf16 %v3387_v4, %v3386_v3 }
 0x32d   :  { %5164 = vmatpush1.bf16.msra.mxu0 %v5163_v21  ;;  %v5207_v21 = vpack.c.bf16 %v3391_v18, %v3390_v17 }
 0x32e   :  { %5166 = vmatprep.subr.bf16.mxu0 %v5165_v12  ;;  %v3425_v12 = vld [vmem:[#allocation9 + $0x188] sm:$0xff] }
 0x32f   :  { %v5209_v24 = vpack.c.bf16 %v3425_v12, %v3424_v23  ;;  %v3408_v23 = vld [vmem:[#allocation9 + $0x100] sm:$0xff]  ;;  %v3409_v12 = vld [vmem:[#allocation9 + $0x108] sm:$0xff] }
 0x331   :  { %5168 = vmatpush1.bf16.msra.mxu0 %v5167_v38 }
 0x332   :  { %5170 = vmatprep.subr.bf16.mxu0 %v5169_v39 }
 0x335   :  { %5172 = vmatpush1.bf16.msra.mxu0 %v5171_v41 }
 0x336   :  { %5174 = vmatprep.subr.bf16.mxu0 %v5173_v22 }
 0x339   :  { %5176 = vmatpush1.bf16.msra.mxu0 %v5175_v52 }
 0x33c   :  { %3178 = vmatmul.mubr.f32.vlgmr.msra.gmra.mrb[6].mxu0 %v5896_v15  ;;  %v3400_v15 = vld [vmem:[#allocation9 + $0xc0] sm:$0xff] }
 0x33d   :  { %3183 = vmatprep.mubr.f32.mxu0 %v5901_v29  ;;  %v3401_v29 = vld [vmem:[#allocation9 + $0xc8] sm:$0xff] }
 0x340   :  { %3184 = vmatmul.mubr.f32.gmra.mrb[8].mxu0 %v5906_v26  ;;  %v5193_v26 = vpack.c.bf16 %v3401_v29, %v3400_v15 }
 0x341   :  { %3189 = vmatprep.mubr.f32.mxu0 %v5910_v42  ;;  %v3384_v42 = vld [vmem:[#allocation9 + $0x40] sm:$0xff] }
 0x342   :  { %5194 = vmatprep.subr.bf16.mxu1 %v5193_v26 }
 0x344   :  { %3190 = vmatmul.mubr.f32.gmra.mrb[10].mxu0 %v5916_v10  ;;  %v5195_v10 = vpack.c.bf16 %v3385_v25, %v3384_v42 }
 0x346   :  { %5196 = vmatpush3.bf16.msra.mxu1 %v5195_v10 }
 0x347   :  { %5198 = vmatprep.subr.bf16.mxu1 %v5197_v2 }
 0x34a   :  { %5200 = vmatpush3.bf16.msra.mxu1 %v5199_v5 }
 0x34b   :  { %5202 = vmatprep.subr.bf16.mxu1 %v5201_v57 }
 0x34e   :  { %v2930_v54 = vpop.f32.mrb[6].mxu1  ;;  %5204 = vmatpush3.bf16.msra.mxu1 %v5203_v61 }
 0x34f   :  { %v5946_v7 = vpop.f32.mrb[7].mxu1  ;;  %5206 = vmatprep.subr.bf16.mxu1 %v5205_v20  ;;  %v3228_v34 = vmul.f32 %v2930_v54, %v2930_v54 }
 0x352   :  { %v2936_v62 = vpop.f32.mrb[8].mxu1  ;;  %5208 = vmatpush3.bf16.msra.mxu1 %v5207_v21 }
 0x353   :  { %v5948_v63 = vpop.f32.mrb[9].mxu1  ;;  %5210 = vmatprep.subr.bf16.mxu1 %v5209_v24  ;;  %v3233_v41 = vmul.f32 %v2936_v62, %v2936_v62 }
 0x356   :  { %v2942_v31 = vpop.f32.mrb[10].mxu1 }
 0x357   :  { %v5950_v1 = vpop.f32.mrb[11].mxu1  ;;  %v3238_v59 = vmul.f32 %v2942_v31, %v2942_v31 }
 0x38e   :  { %v3096_v30 = vpop.f32.mrb[12].mxu1 }
 0x38f   :  { %v2847_v28 = vpop.f32.mrb[12].mxu0  ;;  %v3098_v33 = vpop.f32.mrb[13].mxu1  ;;  %v3242_v51 = vmul.f32 %v3096_v30, %v3096_v30 }
 0x390   :  { %v5265_v37 = vadd.f32 %v2847_v28, %v5824_v43  ;;  %v2849_v36 = vpop.f32.mrb[13].mxu0  ;;  %v3243_v35 = vmul.f32 %v3098_v33, %v3098_v33  ;;  %v3426_v28 = vld [vmem:[#allocation9 + $0x190] sm:$0xff]  ;;  %v3427_v33 = vld [vmem:[#allocation9 + $0x198] sm:$0xff] }
 0x391   :  { %v5266_v38 = vadd.f32 %v2849_v36, %v5826_v46 }
 0x392   :  { %v5954_v39 = vadd.f32 %v3243_v35, %v3228_v34  ;;  %v3102_v50 = vpop.f32.mrb[14].mxu1 }
 0x393   :  { %v3227_v44 = vmul.f32 %v5266_v38, %v5266_v38  ;;  %v2853_v45 = vpop.f32.mrb[14].mxu0  ;;  %v3104_v48 = vpop.f32.mrb[15].mxu1  ;;  %v3247_v6 = vmul.f32 %v3102_v50, %v3102_v50 }
 0x394   :  { %v5267_v22 = vadd.f32 %v2853_v45, %v5828_v27  ;;  %v2855_v13 = vpop.f32.mrb[15].mxu0  ;;  %v3248_v47 = vmul.f32 %v3104_v48, %v3104_v48  ;;  %v3410_v45 = vld [vmem:[#allocation9 + $0x110] sm:$0xff]  ;;  %v3411_v48 = vld [vmem:[#allocation9 + $0x118] sm:$0xff]  ;;  %vm3287_vm15 = vcmp.eq.f32.partialorder %v5954_v39, inf  ;;  %vm3289_vm2 = vcmp.eq.f32.partialorder %v5954_v39, 0.0 }
 0x395   :  { %v3257_v52 = vadd.f32 %v3242_v51, %v3227_v44  ;;  %v5268_v54 = vadd.f32 %v2855_v13, %v5830_v53  ;;  %v5213_v44 = vpack.c.bf16 %v3427_v33, %v3426_v28  ;;  %v3428_v13 = vld [vmem:[#allocation9 + $0x1a0] sm:$0xff]  ;;  %v3421_v33 = vld [vmem:[#allocation9 + $0x168] sm:$0xff] }
 0x396   :  { %v5958_v43 = vadd.f32 %v3248_v47, %v3233_v41  ;;  %v3108_v56 = vpop.f32.mrb[16].mxu1  ;;  %v3231_v57 = vmul.f32 %v5267_v22, %v5267_v22  ;;  %v3429_v47 = vld [vmem:[#allocation9 + $0x1a8] sm:$0xff]  ;;  %v3420_v28 = vld [vmem:[#allocation9 + $0x160] sm:$0xff] }
 0x397   :  { %v3232_v46 = vmul.f32 %v5268_v54, %v5268_v54  ;;  %v2859_v55 = vpop.f32.mrb[16].mxu0  ;;  %v3110_v58 = vpop.f32.mrb[17].mxu1  ;;  %5371 = vrsqrt.f32 %v3257_v52  ;;  %v3252_v53 = vmul.f32 %v3108_v56, %v3108_v56  ;;  %vm3280_vm3 = vcmp.eq.f32.partialorder %v3257_v52, inf }
 0x398   :  { %v5269_v60 = vadd.f32 %v2859_v55, %v5832_v9  ;;  %v2861_v15 = vpop.f32.mrb[17].mxu0  ;;  %v3253_v62 = vmul.f32 %v3110_v58, %v3110_v58  ;;  %v3283_v0 = vand.u32 2147483648, %v3257_v52  ;;  %vm3282_vm4 = vcmp.eq.f32.partialorder %v3257_v52, 0.0 }
 0x399   :  { %v5961_v29 = vadd.f32 %v3247_v6, %v3232_v46  ;;  %v5270_v27 = vadd.f32 %v2861_v15, %v5834_v14  ;;  %v3226_v14 = vmul.f32 %v5265_v37, %v5265_v37  ;;  %v5211_v37 = vpack.c.bf16 %v3409_v12, %v3408_v23  ;;  %v3413_v15 = vld [vmem:[#allocation9 + $0x128] sm:$0xff]  ;;  %v3436_v23 = vld [vmem:[#allocation9 + $0x1e0] sm:$0xff] }
 0x39a   :  { %v5964_v26 = vadd.f32 %v3253_v62, %v3238_v59  ;;  %v3236_v16 = vmul.f32 %v5269_v60, %v5269_v60  ;;  %v5215_v46 = vpack.c.bf16 %v3411_v48, %v3410_v45  ;;  %v5217_v59 = vpack.c.bf16 %v3429_v47, %v3428_v13  ;;  %v3412_v60 = vld [vmem:[#allocation9 + $0x120] sm:$0xff]  ;;  %v3437_v12 = vld [vmem:[#allocation9 + $0x1e8] sm:$0xff] }
 0x39b   :  { %v3237_v42 = vmul.f32 %v5270_v27, %v5270_v27  ;;  %5373 = vrsqrt.f32 %v5961_v29  ;;  %vm3315_vm5 = vcmp.eq.f32.partialorder %v5961_v29, inf  ;;  %v3318_v51 = vand.u32 2147483648, %v5961_v29  ;;  %v3430_v27 = vld [vmem:[#allocation9 + $0x1b0] sm:$0xff] }
 0x39c   :  { %vm3317_vm8 = vcmp.eq.f32.partialorder %v5961_v29, 0.0  ;;  %v3229_v48 = vmul.f32 %v5946_v7, %v5946_v7 }
 0x39d   :  { %v5966_v25 = vadd.f32 %v3252_v53, %v3237_v42  ;;  %v3431_v53 = vld [vmem:[#allocation9 + $0x1b8] sm:$0xff] }
 0x39f   :  { %5375 = vrsqrt.f32 %v5966_v25  ;;  %vm3350_vm9 = vcmp.eq.f32.partialorder %v5966_v25, inf  ;;  %v3353_v58 = vand.u32 2147483648, %v5966_v25  ;;  %vm3352_vm12 = vcmp.eq.f32.partialorder %v5966_v25, 0.0 }
 0x3a1   :  { %v5372_v10 = vpop.eup %5371 }
 0x3a2   :  { %v3279_v49 = vmul.f32 %v5372_v10, %v3257_v52 }
 0x3a4   :  { %v3281_v2 = vsel %vm3280_vm3, %v3257_v52, %v3279_v49  ;;  %vm3322_vm3 = vcmp.eq.f32.partialorder %v5958_v43, inf }
 0x3a5   :  { %v3284_v31 = vsel %vm3282_vm4, %v3283_v0, %v3281_v2  ;;  %v5374_v18 = vpop.eup %5373  ;;  %v5219_v0 = vpack.c.bf16 %v3413_v15, %v3412_v60  ;;  %v3239_v15 = vmul.f32 %v5950_v1, %v5950_v1 }
 0x3a6   :  { %3520 = vmatprep.mubr.f32.mxu1 %v3284_v31  ;;  %v3314_v21 = vmul.f32 %v5374_v18, %v5961_v29  ;;  %v5221_v31 = vpack.c.bf16 %v3431_v53, %v3430_v27 }
 0x3a8   :  { %v3316_v35 = vsel %vm3315_vm5, %v5961_v29, %v3314_v21  ;;  %v3419_v21 = vld [vmem:[#allocation9 + $0x158] sm:$0xff] }
 0x3a9   :  { %v5376_v24 = vpop.eup %5375  ;;  %v3319_v52 = vsel %vm3317_vm8, %v3318_v51, %v3316_v35 }
 0x3aa   :  { %v3349_v38 = vmul.f32 %v5376_v24, %v5966_v25 }
 0x3ac   :  { %v3351_v6 = vsel %vm3350_vm9, %v5966_v25, %v3349_v38  ;;  %v3414_v25 = vld [vmem:[#allocation9 + $0x130] sm:$0xff] }
 0x3ad   :  { %v3354_v42 = vsel %vm3352_vm12, %v3353_v58, %v3351_v6  ;;  %v3422_v38 = vld [vmem:[#allocation9 + $0x170] sm:$0xff]  ;;  %v3234_v6 = vmul.f32 %v5948_v63, %v5948_v63 }
 0x3cf   :  { %v5968_v9 = vpop.f32.mrb[0].mxu0 }
 0x3d0   :  { %v3015_v3 = vpop.f32.mrb[1].mxu0  ;;  %v3230_v13 = vmul.f32 %v5968_v9, %v5968_v9 }
 0x3d1   :  { %v3241_v4 = vmul.f32 %v3015_v3, %v3015_v3  ;;  %v3415_v3 = vld [vmem:[#allocation9 + $0x138] sm:$0xff] }
 0x3d3   :  { %v3256_v5 = vadd.f32 %v3241_v4, %v3226_v14  ;;  %v5971_v8 = vpop.f32.mrb[2].mxu0  ;;  %v3432_v4 = vld [vmem:[#allocation9 + $0x1c0] sm:$0xff] }
 0x3d4   :  { %v3021_v11 = vpop.f32.mrb[3].mxu0  ;;  %v3235_v7 = vmul.f32 %v5971_v8, %v5971_v8 }
 0x3d5   :  { %5377 = vrsqrt.f32 %v3256_v5  ;;  %v3246_v19 = vmul.f32 %v3021_v11, %v3021_v11  ;;  %vm3273_vm6 = vcmp.eq.f32.partialorder %v3256_v5, inf  ;;  %v3276_v36 = vand.u32 2147483648, %v3256_v5 }
 0x3d6   :  { %vm3275_vm7 = vcmp.eq.f32.partialorder %v3256_v5, 0.0  ;;  %v5223_v11 = vpack.c.bf16 %v3415_v3, %v3414_v25 }
 0x3d7   :  { %v3261_v40 = vadd.f32 %v3246_v19, %v3231_v57  ;;  %v5974_v32 = vpop.f32.mrb[4].mxu0  ;;  %v3416_v19 = vld [vmem:[#allocation9 + $0x140] sm:$0xff] }
 0x3d8   :  { %v3027_v61 = vpop.f32.mrb[5].mxu0  ;;  %v3240_v27 = vmul.f32 %v5974_v32, %v5974_v32 }
 0x3d9   :  { %v3251_v17 = vmul.f32 %v3027_v61, %v3027_v61  ;;  %5379 = vrsqrt.f32 %v3261_v40  ;;  %vm3308_vm10 = vcmp.eq.f32.partialorder %v3261_v40, inf  ;;  %v3311_v56 = vand.u32 2147483648, %v3261_v40  ;;  %v3434_v61 = vld [vmem:[#allocation9 + $0x1d0] sm:$0xff] }
 0x3da   :  { %vm3310_vm11 = vcmp.eq.f32.partialorder %v3261_v40, 0.0 }
 0x3db   :  { %v5976_v20 = vadd.f32 %v3251_v17, %v3236_v16  ;;  %v3435_v16 = vld [vmem:[#allocation9 + $0x1d8] sm:$0xff] }
 0x3dc   :  { %v5229_v18 = vpack.c.bf16 %v3435_v16, %v3434_v61  ;;  %v3443_v61 = vld [vmem:[#allocation9 + $0x218] sm:$0xff] }
 0x3dd   :  { %5381 = vrsqrt.f32 %v5976_v20  ;;  %vm3343_vm13 = vcmp.eq.f32.partialorder %v5976_v20, inf  ;;  %v3346_v49 = vand.u32 2147483648, %v5976_v20  ;;  %vm3345_vm14 = vcmp.eq.f32.partialorder %v5976_v20, 0.0 }
 0x3de   :  { %5383 = vrsqrt.f32 %v5954_v39 }
 0x3df   :  { %v5378_v30 = vpop.eup %5377  ;;  %5385 = vrsqrt.f32 %v5958_v43 }
 0x3e0   :  { %v3272_v34 = vmul.f32 %v5378_v30, %v3256_v5  ;;  %v5233_v30 = vpack.c.bf16 %v3437_v12, %v3436_v23  ;;  %v3325_v12 = vand.u32 2147483648, %v5958_v43 }
 0x3e2   :  { %v3274_v50 = vsel %vm3273_vm6, %v3256_v5, %v3272_v34  ;;  %v3433_v5 = vld [vmem:[#allocation9 + $0x1c8] sm:$0xff]  ;;  %v3438_v34 = vld [vmem:[#allocation9 + $0x1f0] sm:$0xff]  ;;  %vm3324_vm6 = vcmp.eq.f32.partialorder %v5958_v43, 0.0 }
 0x3e3   :  { %v5380_v41 = vpop.eup %5379  ;;  %v3277_v22 = vsel %vm3275_vm7, %v3276_v36, %v3274_v50  ;;  %v5225_v57 = vpack.c.bf16 %v3433_v5, %v3432_v4  ;;  %v5235_v36 = vpack.c.bf16 %v3421_v33, %v3420_v28  ;;  %v3423_v50 = vld [vmem:[#allocation9 + $0x178] sm:$0xff]  ;;  %v3290_v5 = vand.u32 2147483648, %v5954_v39  ;;  %v3444_v28 = vld [vmem:[#allocation9 + $0x220] sm:$0xff]  ;;  %v3445_v33 = vld [vmem:[#allocation9 + $0x228] sm:$0xff] }
 0x3e4   :  { %3521 = vmatmul.mubr.f32.vlgmr.msra.gmra.mrb[18].mxu1 %v3277_v22  ;;  %v3307_v54 = vmul.f32 %v5380_v41, %v3261_v40  ;;  %v5239_v51 = vpack.c.bf16 %v3423_v50, %v3422_v38  ;;  %vm3357_vm7 = vcmp.eq.f32.partialorder %v5964_v26, inf  ;;  %v3360_v50 = vand.u32 2147483648, %v5964_v26 }
 0x3e5   :  { %3525 = vmatprep.mubr.f32.mxu1 %v3319_v52  ;;  %5212 = vmatpush3.bf16.msra.mxu1 %v5211_v37  ;;  %v3439_v37 = vld [vmem:[#allocation9 + $0x1f8] sm:$0xff] }
 0x3e6   :  { %v3309_v55 = vsel %vm3308_vm10, %v3261_v40, %v3307_v54  ;;  %5214 = vmatprep.subr.bf16.mxu1 %v5213_v44  ;;  %v3417_v40 = vld [vmem:[#allocation9 + $0x148] sm:$0xff]  ;;  %v5237_v35 = vpack.c.bf16 %v3439_v37, %v3438_v34  ;;  %v5600_v44 = vmov 0.0|0.0   ;;  %vm3359_vm10 = vcmp.eq.f32.partialorder %v5964_v26, 0.0 }
 0x3e7   :  { %v5382_v62 = vpop.eup %5381  ;;  %v3312_v29 = vsel %vm3310_vm11, %v3311_v56, %v3309_v55  ;;  %v5227_v17 = vpack.c.bf16 %v3417_v40, %v3416_v19  ;;  %v3442_v40 = vld [vmem:[#allocation9 + $0x210] sm:$0xff]  ;;  %vm5601_vm11 = vmmov 0  }
 0x3e8   :  { %3526 = vmatmul.mubr.f32.gmra.mrb[20].mxu1 %v3312_v29  ;;  %v3342_v10 = vmul.f32 %v5382_v62, %v5976_v20  ;;  %v5384_v63 = vpop.eup %5383 }
 0x3e9   :  { %3530 = vmatprep.mubr.f32.mxu1 %v3354_v42  ;;  %5216 = vmatpush3.bf16.msra.mxu1 %v5215_v46 }
 0x3ea   :  { %v3344_v2 = vsel %vm3343_vm13, %v5976_v20, %v3342_v10  ;;  %5218 = vmatprep.subr.bf16.mxu1 %v5217_v59  ;;  %v3418_v20 = vld [vmem:[#allocation9 + $0x150] sm:$0xff]  ;;  %v3286_v10 = vmul.f32 %v5384_v63, %v5954_v39 }
 0x3eb   :  { %v3347_v14 = vsel %vm3345_vm14, %v3346_v49, %v3344_v2  ;;  %v5231_v24 = vpack.c.bf16 %v3419_v21, %v3418_v20  ;;  %v5386_v49 = vpop.eup %5385  ;;  %v3440_v2 = vld [vmem:[#allocation9 + $0x200] sm:$0xff] }
 0x3ec   :  { %3531 = vmatmul.mubr.f32.gmra.mrb[22].mxu1 %v3347_v14  ;;  %v3288_v3 = vsel %vm3287_vm15, %v5954_v39, %v3286_v10  ;;  %v3321_v32 = vmul.f32 %v5386_v49, %v5958_v43  ;;  %v5245_v39 = vpack.c.bf16 %v3443_v61, %v3442_v40 }
 0x3ed   :  { %5220 = vmatpush3.bf16.msra.mxu1 %v5219_v0  ;;  %v3291_v16 = vsel %vm3289_vm2, %v3290_v5, %v3288_v3 }
 0x3ee   :  { %5222 = vmatprep.subr.bf16.mxu1 %v5221_v31  ;;  %v3441_v31 = vld [vmem:[#allocation9 + $0x208] sm:$0xff]  ;;  %v3323_v20 = vsel %vm3322_vm3, %v5958_v43, %v3321_v32  ;;  %v3446_v43 = vld [vmem:[#allocation9 + $0x230] sm:$0xff] }
 0x3ef   :  { %v3326_v34 = vsel %vm3324_vm6, %v3325_v12, %v3323_v20 }
 0x3f1   :  { %5224 = vmatpush3.bf16.msra.mxu1 %v5223_v11  ;;  %v5242_v11 = vpack.c.bf16 %v3441_v31, %v3440_v2 }
 0x3f2   :  { %5226 = vmatprep.subr.bf16.mxu1 %v5225_v57 }
 0x3f5   :  { %5228 = vmatpush3.bf16.msra.mxu1 %v5227_v17 }
 0x3f6   :  { %5230 = vmatprep.subr.bf16.mxu1 %v5229_v18 }
 0x3f9   :  { %5232 = vmatpush3.bf16.msra.mxu1 %v5231_v24 }
 0x3fa   :  { %5234 = vmatprep.subr.bf16.mxu1 %v5233_v30 }
 0x3fd   :  { %5236 = vmatpush3.bf16.msra.mxu1 %v5235_v36 }
 0x3fe   :  { %5238 = vmatprep.subr.bf16.mxu1 %v5237_v35 }
 0x401   :  { %5240 = vmatpush3.bf16.msra.mxu1 %v5239_v51  ;;  %v5248_v51 = vpack.c.bf16 %v3445_v33, %v3444_v28 }
 0x402   :  { %5241 = vmatprep.subr.bf16.mxu1 %v5600_v44 }
 0x40f   :  { %v3179_v45 = vpop.f32.mrb[6].mxu0 }
 0x410   :  { %v3244_v41 = vmul.f32 %v3179_v45, %v3179_v45  ;;  %v3181_v22 = vpop.f32.mrb[7].mxu0 }
 0x411   :  { %v3245_v47 = vmul.f32 %v3181_v22, %v3181_v22 }
 0x412   :  { %v3259_v52 = vadd.f32 %v3244_v41, %v3229_v48  ;;  %v3447_v48 = vld [vmem:[#allocation9 + $0x238] sm:$0xff] }
 0x413   :  { %v6000_v54 = vadd.f32 %v3245_v47, %v3230_v13  ;;  %v3185_v56 = vpop.f32.mrb[8].mxu0  ;;  %v5251_v22 = vpack.c.bf16 %v3447_v48, %v3446_v43  ;;  %v5602_v13 = vmov 0.0   ;;  %v3448_v47 = vld [vmem:[#allocation9 + $0x240] sm:$0xff] }
 0x414   :  { %v3249_v46 = vmul.f32 %v3185_v56, %v3185_v56  ;;  %v3187_v55 = vpop.f32.mrb[9].mxu0  ;;  %5387 = vrsqrt.f32 %v3259_v52  ;;  %vm3294_vm0 = vcmp.eq.f32.partialorder %v3259_v52, inf  ;;  %v3297_v1 = vand.u32 2147483648, %v3259_v52 }
 0x415   :  { %v3250_v58 = vmul.f32 %v3187_v55, %v3187_v55  ;;  %5389 = vrsqrt.f32 %v5964_v26  ;;  %vm3296_vm1 = vcmp.eq.f32.partialorder %v3259_v52, 0.0  ;;  %v3452_v55 = vld [vmem:[#allocation9 + $0x260] sm:$0xff]  ;;  %vm3301_vm12 = vcmp.eq.f32.partialorder %v6000_v54, inf }
 0x416   :  { %v3264_v59 = vadd.f32 %v3249_v46, %v3234_v6  ;;  %v3451_v6 = vld [vmem:[#allocation9 + $0x258] sm:$0xff]  ;;  %v3304_v10 = vand.u32 2147483648, %v6000_v54  ;;  %vm3303_vm13 = vcmp.eq.f32.partialorder %v6000_v54, 0.0 }
 0x417   :  { %v6007_v60 = vadd.f32 %v3250_v58, %v3235_v7  ;;  %v3191_v9 = vpop.f32.mrb[10].mxu0  ;;  %v3453_v7 = vld [vmem:[#allocation9 + $0x268] sm:$0xff] }
 0x418   :  { %v3254_v62 = vmul.f32 %v3191_v9, %v3191_v9  ;;  %v3193_v29 = vpop.f32.mrb[11].mxu0  ;;  %5391 = vrsqrt.f32 %v3264_v59  ;;  %vm3329_vm4 = vcmp.eq.f32.partialorder %v3264_v59, inf  ;;  %v3332_v18 = vand.u32 2147483648, %v3264_v59  ;;  %v3454_v9 = vld [vmem:[#allocation9 + $0x270] sm:$0xff] }
 0x419   :  { %v3255_v53 = vmul.f32 %v3193_v29, %v3193_v29  ;;  %vm3331_vm5 = vcmp.eq.f32.partialorder %v3264_v59, 0.0  ;;  %vm3336_vm14 = vcmp.eq.f32.partialorder %v6007_v60, inf  ;;  %v3339_v2 = vand.u32 2147483648, %v6007_v60 }
 0x41a   :  { %v3269_v42 = vadd.f32 %v3254_v62, %v3239_v15  ;;  %v3455_v15 = vld [vmem:[#allocation9 + $0x278] sm:$0xff]  ;;  %vm3338_vm15 = vcmp.eq.f32.partialorder %v6007_v60, 0.0 }
 0x41b   :  { %v6014_v8 = vadd.f32 %v3255_v53, %v3240_v27  ;;  %v5263_v63 = vpack.c.bf16 %v3455_v15, %v3454_v9 }
 0x41c   :  { %5393 = vrsqrt.f32 %v3269_v42  ;;  %vm3364_vm8 = vcmp.eq.f32.partialorder %v3269_v42, inf  ;;  %v3367_v36 = vand.u32 2147483648, %v3269_v42  ;;  %vm3366_vm9 = vcmp.eq.f32.partialorder %v3269_v42, 0.0 }
 0x41d   :  { %5395 = vrsqrt.f32 %v6000_v54 }
 0x41e   :  { %v5388_v0 = vpop.eup %5387  ;;  %5397 = vrsqrt.f32 %v6007_v60 }
 0x41f   :  { %v3293_v25 = vmul.f32 %v5388_v0, %v3259_v52  ;;  %v5390_v14 = vpop.eup %5389  ;;  %5399 = vrsqrt.f32 %v6014_v8 }
 0x420   :  { %v3356_v21 = vmul.f32 %v5390_v14, %v5964_v26 }
 0x421   :  { %v3295_v4 = vsel %vm3294_vm0, %v3259_v52, %v3293_v25  ;;  %v3449_v52 = vld [vmem:[#allocation9 + $0x248] sm:$0xff]  ;;  %vm3371_vm0 = vcmp.eq.f32.partialorder %v6014_v8, inf  ;;  %v3374_v25 = vand.u32 2147483648, %v6014_v8 }
 0x422   :  { %v5392_v57 = vpop.eup %5391  ;;  %v3298_v19 = vsel %vm3296_vm1, %v3297_v1, %v3295_v4  ;;  %v3358_v35 = vsel %vm3357_vm7, %v5964_v26, %v3356_v21  ;;  %v5254_v56 = vpack.c.bf16 %v3449_v52, %v3448_v47  ;;  %v3450_v26 = vld [vmem:[#allocation9 + $0x250] sm:$0xff]  ;;  %vm3373_vm1 = vcmp.eq.f32.partialorder %v6014_v8, 0.0 }
 0x423   :  { %3600 = vmatprep.mubr.f32.mxu1 %v3298_v19  ;;  %v3328_v17 = vmul.f32 %v5392_v57, %v3264_v59  ;;  %v3361_v41 = vsel %vm3359_vm10, %v3360_v50, %v3358_v35  ;;  %v5257_v46 = vpack.c.bf16 %v3451_v6, %v3450_v26 }
 0x424   :  { %3601 = vmatmul.mubr.f32.vlgmr.msra.gmra.mrb[24].mxu1 %v3291_v16 }
 0x425   :  { %5243 = vmatpush3.bf16.msra.mxu1 %v5242_v11  ;;  %v3330_v23 = vsel %vm3329_vm4, %v3264_v59, %v3328_v17  ;;  %v5260_v59 = vpack.c.bf16 %v3453_v7, %v3452_v55 }
 0x426   :  { %v5394_v24 = vpop.eup %5393  ;;  %v3333_v30 = vsel %vm3331_vm5, %v3332_v18, %v3330_v23  ;;  %5244 = vmatprep.subr.bf16.mxu1 %v5600_v44 }
 0x427   :  { %3605 = vmatprep.mubr.f32.mxu1 %v3333_v30  ;;  %v3363_v37 = vmul.f32 %v5394_v24, %v3269_v42  ;;  %v5396_v58 = vpop.eup %5395 }
 0x428   :  { %3606 = vmatmul.mubr.f32.gmra.mrb[26].mxu1 %v3326_v34  ;;  %v3300_v62 = vmul.f32 %v5396_v58, %v6000_v54  ;;  %v5398_v29 = vpop.eup %5397 }
 0x429   :  { %5246 = vmatpush3.bf16.msra.mxu1 %v5245_v39  ;;  %v3365_v38 = vsel %vm3364_vm8, %v3269_v42, %v3363_v37  ;;  %v3335_v53 = vmul.f32 %v5398_v29, %v6007_v60  ;;  %v5400_v42 = vpop.eup %5399 }
 0x42a   :  { %v3368_v45 = vsel %vm3366_vm9, %v3367_v36, %v3365_v38  ;;  %5247 = vmatprep.subr.bf16.mxu1 %v5600_v44  ;;  %v3302_v27 = vsel %vm3301_vm12, %v6000_v54, %v3300_v62 }
 0x42b   :  { %3610 = vmatprep.mubr.f32.mxu1 %v3368_v45  ;;  %v3305_v49 = vsel %vm3303_vm13, %v3304_v10, %v3302_v27  ;;  %v3337_v0 = vsel %vm3336_vm14, %v6007_v60, %v3335_v53 }
 0x42c   :  { %3611 = vmatmul.mubr.f32.gmra.mrb[28].mxu1 %v3361_v41  ;;  %v3340_v31 = vsel %vm3338_vm15, %v3339_v2, %v3337_v0  ;;  %v3753_v41 = vld [vmem:[#allocation11] ss:$0 sm:$0xff] }
 0x42d   :  { %5249 = vmatpush3.bf16.msra.mxu1 %v5248_v51  ;;  %3888 = vmatprep.mubr.msk.f32.mxu1 %vm5601_vm11, %v5602_v13 }
 0x42e   :  { %5250 = vmatprep.subr.bf16.mxu1 %v5600_v44 }
 0x431   :  { %5252 = vmatpush3.bf16.msra.mxu1 %v5251_v22 }
 0x432   :  { %5253 = vmatprep.subr.bf16.mxu1 %v5600_v44 }
 0x435   :  { %5255 = vmatpush3.bf16.msra.mxu1 %v5254_v56 }
 0x436   :  { %5256 = vmatprep.subr.bf16.mxu1 %v5600_v44 }
 0x439   :  { %5258 = vmatpush3.bf16.msra.mxu1 %v5257_v46 }
 0x43a   :  { %5259 = vmatprep.subr.bf16.mxu1 %v5600_v44 }
 0x43d   :  { %5261 = vmatpush3.bf16.msra.mxu1 %v5260_v59 }
 0x43e   :  { %5262 = vmatprep.subr.bf16.mxu1 %v5600_v44  ;;  %v3370_v44 = vmul.f32 %v5400_v42, %v6014_v8 }
 0x440   :  { %v3372_v54 = vsel %vm3371_vm0, %v6014_v8, %v3370_v44 }
 0x441   :  { %5264 = vmatpush3.bf16.msra.mxu1 %v5263_v63  ;;  %v3375_v1 = vsel %vm3373_vm1, %v3374_v25, %v3372_v54 }
 0x444   :  { %3889 = vmatmul.mubr.f32.vlgmr.msra.gmra.mrb[30].mxu1 %v3305_v49 }
 0x445   :  { %3891 = vmatprep.mubr.msk.f32.mxu1 %vm5601_vm11, %v5602_v13 }
 0x448   :  { %3892 = vmatmul.mubr.f32.gmra.mrb[32].mxu1 %v3340_v31 }
 0x449   :  { %3894 = vmatprep.mubr.msk.f32.mxu1 %vm5601_vm11, %v5602_v13  ;;  %v3754_v13 = vld [vmem:[#allocation12] ss:$0 sm:$0xff] }
 0x44c   :  { %3895 = vmatmul.mubr.f32.gmra.mrb[34].mxu1 %v3375_v1 }
 0x4b7   :  { %v3787_v3 = vpop.f32.mrb[18].mxu1 }
 0x4b8   :  { %v3788_v32 = vpop.f32.mrb[19].mxu1 }
 0x4b9   :  { %v3789_v14 = vadd.f32 %v3788_v32, %v3787_v3 }
 0x4bb   :  { %v3790_v4 = vpop.f32.mrb[20].mxu1 }
 0x4bc   :  { %v3791_v5 = vpop.f32.mrb[21].mxu1 }
 0x4bd   :  { %v3792_v60 = vadd.f32 %v3791_v5, %v3790_v4 }
 0x4bf   :  { %v3793_v11 = vpop.f32.mrb[22].mxu1 }
 0x4c0   :  { %v3794_v57 = vpop.f32.mrb[23].mxu1 }
 0x4c1   :  { %v3795_v19 = vadd.f32 %v3794_v57, %v3793_v11 }
 0x4f7   :  { %v3828_v40 = vpop.f32.mrb[24].mxu1 }
 0x4f8   :  { %v3829_v61 = vpop.f32.mrb[25].mxu1 }
 0x4f9   :  { %v3830_v16 = vadd.f32 %v3829_v61, %v3828_v40 }
 0x4fb   :  { %v3831_v17 = vpop.f32.mrb[26].mxu1  ;;  %v3603_v18 = vadd.f32 %v3830_v16, %v3789_v14 }
 0x4fc   :  { %v3832_v20 = vpop.f32.mrb[27].mxu1 }
 0x4fd   :  { %v3833_v21 = vadd.f32 %v3832_v20, %v3831_v17 }
 0x4ff   :  { %v3834_v23 = vpop.f32.mrb[28].mxu1  ;;  %v3608_v8 = vadd.f32 %v3833_v21, %v3792_v60 }
 0x500   :  { %v3835_v12 = vpop.f32.mrb[29].mxu1 }
 0x501   :  { %v3836_v39 = vadd.f32 %v3835_v12, %v3834_v23 }
 0x503   :  { %v3613_v24 = vadd.f32 %v3836_v39, %v3795_v19 }
 0x517   :  { %v3682_v30 = vpop.f32.mrb[30].mxu1 }
 0x518   :  { %v3683_v28 = vadd.f32 %v3682_v30, %v3603_v18  ;;  %v3890_v33 = vpop.f32.mrb[31].mxu1 }
 0x51a   :  { %v3696_v34 = vmax.f32 %v3683_v28, 1e-05 }
 0x51b   :  { %v3687_v37 = vpop.f32.mrb[32].mxu1 }
 0x51c   :  { %5401 = vlog2.f32 %v3696_v34  ;;  %v3688_v36 = vadd.f32 %v3687_v37, %v3608_v8  ;;  %v3893_v35 = vpop.f32.mrb[33].mxu1 }
 0x51e   :  { %v3697_v38 = vmax.f32 %v3688_v36, 1e-05 }
 0x51f   :  { %v3692_v50 = vpop.f32.mrb[34].mxu1 }
 0x520   :  { %5403 = vlog2.f32 %v3697_v38  ;;  %v3693_v51 = vadd.f32 %v3692_v50, %v3613_v24  ;;  %v3896_v45 = vpop.f32.mrb[35].mxu1 }
 0x522   :  { %v3698_v43 = vmax.f32 %v3693_v51, 1e-05 }
 0x524   :  { %5405 = vlog2.f32 %v3698_v43 }
 0x526   :  { %v5402_v48 = vpop.eup %5401 }
 0x527   :  { %v3700_v22 = vmul.f32 0.6931472, %v5402_v48 }
 0x529   :  { %v3712_v47 = vmul.f32 %v3753_v41, %v3700_v22 }
 0x52a   :  { %v5404_v52 = vpop.eup %5403 }
 0x52b   :  { %v3702_v56 = vmul.f32 0.6931472, %v5404_v52  ;;  %v3722_v26 = vadd.f32 %v3754_v13, %v3712_v47 }
 0x52d   :  { %v3713_v6 = vmul.f32 %v3753_v41, %v3702_v56  ;;  %3725 = vst [vmem:[#allocation14] sm:$0xff] %v3722_v26 }
 0x52e   :  { %v5406_v46 = vpop.eup %5405 }
 0x52f   :  { %v3704_v55 = vmul.f32 0.6931472, %v5406_v46  ;;  %v3723_v7 = vadd.f32 %v3754_v13, %v3713_v6 }
 0x531   :  { %v3714_v58 = vmul.f32 %v3753_v41, %v3704_v55  ;;  %3726 = vst [vmem:[#allocation14 + $0x8] sm:$0xff] %v3723_v7 }
 0x533   :  { %v3724_v59 = vadd.f32 %v3754_v13, %v3714_v58 }
 0x535   :  { %3727 = vst [vmem:[#allocation14 + $0x10] sm:$0xff] %v3724_v59 }
 0x536   :  { %5567 = shalt.err (!%p5564_p2)
}
 0x537   :  { %s5568_s7 = scalar_lea.hbm %s6080_s6, 384 }
 0x538   :  { %p5569_p3 = scmp.ne.s32.totalorder %s6080_s6, %s5568_s7  ;;  %p5572_p4 = scmp.lt.u32.totalorder %s5568_s7, %s6080_s6 }
 0x53a   :  { %p5574_p5 = pnand %p5572_p4, %p5569_p3 }
 0x53c   :  { %5577 = shalt.err (!%p5574_p5)
}
 0x53d   :  { %3743 = dma.vmem_to_hbm [thread:$0]  %s3738_s26, 384, %s6080_s6, [#allocation5], %s5590_s17, %s5590_s17, %s5591_s18  }
 0x53e   :  { %5586 = dma.done.wait [#allocation5], 384  }
 0x53f   :  { %5587 = vsyncadd [#allocation5], 4294966912 }
 0x540   :  { %3747 = vsyncpa [#allocation4], 1 }
 0x541   :  { %3748 = vsyncpa [#allocation7], 1 }
 0x542   :  { %3749 = vsyncpa [#allocation10], 1 }
 0x543   :  { %3750 = vsyncpa [#allocation13], 1 }
 0x544   :  { %3751 = vsyncpa [#allocation5], 1 }

</bundles_post_ra>
